<compile_context>
chip_gen: v7x
topology: tpu7x:2x2x1
jax: 0.10.0
libtpu: 0.0.40
codegen_flags: <defaults>
</compile_context>

<pallas_src>
import functools
import math

import jax
import jax.numpy as jnp
from jax.experimental import pallas as pl
from jax.experimental.pallas import tpu as pltpu

FIXED_1D_LENGTH = 8500
MAX_ANGLE = 90
MIN_ANGLE = 5
NUM_CLASSES = 230
CLASS_PAD = 256          # lane-dense output width (multiple of 128)


# ----------------------------------------------------------------------------
# In-kernel helpers
# ----------------------------------------------------------------------------
def _layernorm(x, gamma, beta, eps=1e-5):
    mu = jnp.mean(x, axis=-1, keepdims=True)
    xc = x - mu
    var = jnp.mean(xc * xc, axis=-1, keepdims=True)
    inv = jax.lax.rsqrt(var + eps)
    return xc * inv * gamma + beta


# ----------------------------------------------------------------------------
# Fused Pallas kernel: L encoder layers + mean-pool + classifier head
# ----------------------------------------------------------------------------
def fused_kernel(n_heads, n_layers,
                 x_ref, mask_ref,
                 wqkv_ref, bqkv_ref, wo_ref, bo_ref,
                 g1_ref, be1_ref, w1_ref, bf1_ref, w2_ref, bf2_ref,
                 g2_ref, be2_ref,
                 wc1_ref, bc1_ref, wc2_ref, bc2_ref,
                 o_ref):
    BT, S, D = x_ref.shape
    hd = D // n_heads
    scale = 1.0 / math.sqrt(hd)

    # Key-padding bias, computed once and reused across layers/heads.
    # mask == 1.0 where the key position is padded; broadcasts over query rows.
    bias = mask_ref[...] * jnp.float32(-1e9)           # (BT, 1, S)

    # Activations stay resident in VMEM/vregs across all layers.
    xf = x_ref[...].reshape(BT * S, D)                  # (BT*S, D)

    for l in range(n_layers):
        # Packed QKV projection: single (BT*S, D) @ (D, 3D) matmul.
        qkv = jnp.dot(xf, wqkv_ref[l],
                      preferred_element_type=jnp.float32) + bqkv_ref[l]
        q = qkv[:, 0 * D:1 * D].reshape(BT, S, D)
        k = qkv[:, 1 * D:2 * D].reshape(BT, S, D)
        v = qkv[:, 2 * D:3 * D].reshape(BT, S, D)

        wo_l = wo_ref[l]                                # (D, D)
        attn = jnp.zeros((BT * S, D), jnp.float32)
        for h in range(n_heads):
            lo = h * hd
            qh = q[:, :, lo:lo + hd]                    # (BT, S, hd)
            kh = k[:, :, lo:lo + hd]
            vh = v[:, :, lo:lo + hd]
            s = jnp.einsum('bqd,bkd->bqk', qh, kh,
                           preferred_element_type=jnp.float32) * scale + bias
            s = s - jnp.max(s, axis=-1, keepdims=True)
            p = jnp.exp(s)
            p = p * pl.reciprocal(jnp.sum(p, axis=-1, keepdims=True),
                                  approx=True)
            ctx = jnp.einsum('bqk,bkd->bqd', p, vh,
                             preferred_element_type=jnp.float32)
            # Fold the head back through its rows of W_o (no lane concat).
            attn = attn + jnp.dot(ctx.reshape(BT * S, hd),
                                  wo_l[lo:lo + hd, :],
                                  preferred_element_type=jnp.float32)
        attn = attn + bo_ref[l]

        h1 = _layernorm(xf + attn, g1_ref[l], be1_ref[l])

        ff = jnp.dot(h1, w1_ref[l],
                     preferred_element_type=jnp.float32) + bf1_ref[l]
        ff = jnp.maximum(ff, 0.0)
        ff = jnp.dot(ff, w2_ref[l],
                     preferred_element_type=jnp.float32) + bf2_ref[l]

        xf = _layernorm(h1 + ff, g2_ref[l], be2_ref[l])

    # Mean-pool over the sequence (all positions, matching torch .mean(dim=1)).
    pooled = jnp.mean(xf.reshape(BT, S, D), axis=1)     # (BT, D)
    hcls = jnp.dot(pooled, wc1_ref[...],
                   preferred_element_type=jnp.float32) + bc1_ref[...]
    # Lane-dense 256-wide store; wrapper slices back to 230 classes.
    o_ref[...] = jnp.dot(hcls, wc2_ref[...],
                         preferred_element_type=jnp.float32) + bc2_ref[...]


def fused_forward(x, mask_f, layers, cls, n_heads):
    B, S, D = x.shape
    L = layers["wqkv"].shape[0]
    CP = cls["w2"].shape[1]

    # Whole batch per grid step at these sizes; for large B, tile the batch
    # axis in multiples of 8 — the "parallel" semantics shards it across
    # TensorCores on v7x.
    bt = B
    nb = B // bt

    kernel = functools.partial(fused_kernel, n_heads, L)

    def full(shape):
        nd = len(shape)
        return pl.BlockSpec(shape, lambda i, _nd=nd: (0,) * _nd)

    return pl.pallas_call(
        kernel,
        out_shape=jax.ShapeDtypeStruct((B, CP), jnp.float32),
        grid=(nb,),
        in_specs=[
            pl.BlockSpec((bt, S, D), lambda i: (i, 0, 0)),   # x
            pl.BlockSpec((bt, 1, S), lambda i: (i, 0, 0)),   # key-padding mask
            full(layers["wqkv"].shape), full(layers["bqkv"].shape),
            full(layers["wo"].shape), full(layers["bo"].shape),
            full(layers["g1"].shape), full(layers["be1"].shape),
            full(layers["w1"].shape), full(layers["bf1"].shape),
            full(layers["w2"].shape), full(layers["bf2"].shape),
            full(layers["g2"].shape), full(layers["be2"].shape),
            full(cls["w1"].shape), full(cls["b1"].shape),
            full(cls["w2"].shape), full(cls["b2"].shape),
        ],
        out_specs=pl.BlockSpec((bt, CP), lambda i: (i, 0)),
        compiler_params=pltpu.CompilerParams(
            dimension_semantics=("parallel",)),
    )(x, mask_f,
      layers["wqkv"], layers["bqkv"], layers["wo"], layers["bo"],
      layers["g1"], layers["be1"], layers["w1"], layers["bf1"],
      layers["w2"], layers["bf2"], layers["g2"], layers["be2"],
      cls["w1"], cls["b1"], cls["w2"], cls["b2"])


# ----------------------------------------------------------------------------
# Parameter init (deterministic, synthetic) and full forward
# ----------------------------------------------------------------------------
def init_params(key, embed_len=64, n_layers=2, d_ff=256):
    D = embed_len

    def w(kk, shape):
        return jax.random.normal(kk, shape, jnp.float32) * 0.02

    keys = jax.random.split(key, n_layers + 2)
    embed = w(keys[0], (FIXED_1D_LENGTH + 1, D - 1))
    embed = embed.at[0].set(0.0)  # padding_idx=0

    wqkv, wo, w1, w2 = [], [], [], []
    for l in range(n_layers):
        k = jax.random.split(keys[1 + l], 6)
        wq, wk, wv = w(k[0], (D, D)), w(k[1], (D, D)), w(k[2], (D, D))
        wqkv.append(jnp.concatenate([wq, wk, wv], axis=1))    # (D, 3D)
        wo.append(w(k[3], (D, D)))
        w1.append(w(k[4], (D, d_ff)))
        w2.append(w(k[5], (d_ff, D)))
    L = n_layers
    layers = dict(
        wqkv=jnp.stack(wqkv), bqkv=jnp.zeros((L, 1, 3 * D), jnp.float32),
        wo=jnp.stack(wo), bo=jnp.zeros((L, 1, D), jnp.float32),
        g1=jnp.ones((L, 1, D), jnp.float32), be1=jnp.zeros((L, 1, D), jnp.float32),
        w1=jnp.stack(w1), bf1=jnp.zeros((L, 1, d_ff), jnp.float32),
        w2=jnp.stack(w2), bf2=jnp.zeros((L, 1, D), jnp.float32),
        g2=jnp.ones((L, 1, D), jnp.float32), be2=jnp.zeros((L, 1, D), jnp.float32),
    )

    kc = jax.random.split(keys[-1], 2)
    wc1 = w(kc[0], (D, 128))
    bc1 = jnp.zeros((1, 128), jnp.float32)
    wc2 = w(kc[1], (128, NUM_CLASSES))
    bc2 = jnp.zeros((1, NUM_CLASSES), jnp.float32)
    # Zero-pad the class dim to 256 lanes for an unmasked lane-dense store.
    wc2p = jnp.zeros((128, CLASS_PAD), jnp.float32).at[:, :NUM_CLASSES].set(wc2)
    bc2p = jnp.zeros((1, CLASS_PAD), jnp.float32).at[:, :NUM_CLASSES].set(bc2)
    cls = dict(w1=wc1, b1=bc1, w2=wc2p, b2=bc2p)
    return dict(embed=embed, layers=layers, cls=cls)


def atlv2_forward(params, intensity, angle, n_heads=4):
    B = intensity.shape[0]

    # mask / index computation + embedding gather + concat (glue, plain JAX)
    att_mask = angle.reshape(B, 1, -1) < 1e-5                       # (B, 1, S) bool
    angle_f = angle.reshape(B, -1).astype(jnp.float32)              # (B, S)
    idx_f = (angle_f - MIN_ANGLE) \
        * (FIXED_1D_LENGTH // (MAX_ANGLE - MIN_ANGLE)) \
        * (angle_f > 1e-5).astype(jnp.float32)
    idx = idx_f.astype(jnp.int32)                                   # trunc toward 0
    angle_features = jnp.take(params["embed"], idx, axis=0)         # (B, S, 63)
    inten = intensity.reshape(B, -1, 1).astype(jnp.float32)         # (B, S, 1)
    x = jnp.concatenate([inten, angle_features], axis=-1)           # (B, S, 64)

    mask_f = att_mask.astype(jnp.float32)                           # (B, 1, S)

    # fused encoder stack + pool + classifier (single Pallas kernel)
    out_p = fused_forward(x, mask_f, params["layers"], params["cls"], n_heads)
    return out_p[:, :NUM_CLASSES]                                   # (B, 230)


if __name__ == "__main__":
    key = jax.random.PRNGKey(0)
    pk, ik, ak = jax.random.split(key, 3)

    B, S = 2, 8                      # small shapes for the synthetic run
    params = init_params(pk, embed_len=64, n_layers=2, d_ff=256)

    intensity = jax.random.normal(ik, (B, S), jnp.float32)
    angle = jax.random.uniform(ak, (B, S), jnp.float32,
                               minval=float(MIN_ANGLE), maxval=float(MAX_ANGLE))
    angle = angle.at[:, -2:].set(0.0)  # a couple of padded positions per row

    out = atlv2_forward(params, intensity, angle)
    out = jax.block_until_ready(out)
    assert out.shape == (B, NUM_CLASSES) and out.dtype == jnp.float32
    assert bool(jnp.all(jnp.isfinite(out)))
    print("KERNEL_OK")
</pallas_src>

<mosaic_0001>
module attributes {stable_mosaic.version = 11 : i64} {
  func.func @fused_kernel(%arg0: i32, %arg1: memref<2x8x64xf32, #tpu.memory_space<vmem>>, %arg2: memref<2x1x8xf32, #tpu.memory_space<vmem>>, %arg3: memref<2x64x192xf32, #tpu.memory_space<vmem>>, %arg4: memref<2x1x192xf32, #tpu.memory_space<vmem>>, %arg5: memref<2x64x64xf32, #tpu.memory_space<vmem>>, %arg6: memref<2x1x64xf32, #tpu.memory_space<vmem>>, %arg7: memref<2x1x64xf32, #tpu.memory_space<vmem>>, %arg8: memref<2x1x64xf32, #tpu.memory_space<vmem>>, %arg9: memref<2x64x256xf32, #tpu.memory_space<vmem>>, %arg10: memref<2x1x256xf32, #tpu.memory_space<vmem>>, %arg11: memref<2x256x64xf32, #tpu.memory_space<vmem>>, %arg12: memref<2x1x64xf32, #tpu.memory_space<vmem>>, %arg13: memref<2x1x64xf32, #tpu.memory_space<vmem>>, %arg14: memref<2x1x64xf32, #tpu.memory_space<vmem>>, %arg15: memref<64x128xf32, #tpu.memory_space<vmem>>, %arg16: memref<1x128xf32, #tpu.memory_space<vmem>>, %arg17: memref<128x256xf32, #tpu.memory_space<vmem>>, %arg18: memref<1x256xf32, #tpu.memory_space<vmem>>, %arg19: memref<2x256xf32, #tpu.memory_space<vmem>>) attributes {dimension_semantics = [#tpu.dimension_semantics<parallel>], iteration_bounds = array<i64: 1>, scalar_prefetch = 0 : i64, scratch_operands = 0 : i64, tpu.core_type = #tpu.core_type<tc>, window_params = [{transform_indices = @transform_0, window_bounds = array<i64: 2, 8, 64>}, {transform_indices = @transform_1, window_bounds = array<i64: 2, 1, 8>}, {pipeline_mode = #tpu.pipeline_mode<synchronous>, transform_indices = @transform_2, window_bounds = array<i64: 2, 64, 192>}, {pipeline_mode = #tpu.pipeline_mode<synchronous>, transform_indices = @transform_3, window_bounds = array<i64: 2, 1, 192>}, {pipeline_mode = #tpu.pipeline_mode<synchronous>, transform_indices = @transform_4, window_bounds = array<i64: 2, 64, 64>}, {pipeline_mode = #tpu.pipeline_mode<synchronous>, transform_indices = @transform_5, window_bounds = array<i64: 2, 1, 64>}, {pipeline_mode = #tpu.pipeline_mode<synchronous>, transform_indices = @transform_6, window_bounds = array<i64: 2, 1, 64>}, {pipeline_mode = #tpu.pipeline_mode<synchronous>, transform_indices = @transform_7, window_bounds = array<i64: 2, 1, 64>}, {pipeline_mode = #tpu.pipeline_mode<synchronous>, transform_indices = @transform_8, window_bounds = array<i64: 2, 64, 256>}, {pipeline_mode = #tpu.pipeline_mode<synchronous>, transform_indices = @transform_9, window_bounds = array<i64: 2, 1, 256>}, {pipeline_mode = #tpu.pipeline_mode<synchronous>, transform_indices = @transform_10, window_bounds = array<i64: 2, 256, 64>}, {pipeline_mode = #tpu.pipeline_mode<synchronous>, transform_indices = @transform_11, window_bounds = array<i64: 2, 1, 64>}, {pipeline_mode = #tpu.pipeline_mode<synchronous>, transform_indices = @transform_12, window_bounds = array<i64: 2, 1, 64>}, {pipeline_mode = #tpu.pipeline_mode<synchronous>, transform_indices = @transform_13, window_bounds = array<i64: 2, 1, 64>}, {pipeline_mode = #tpu.pipeline_mode<synchronous>, transform_indices = @transform_14, window_bounds = array<i64: 64, 128>}, {pipeline_mode = #tpu.pipeline_mode<synchronous>, transform_indices = @transform_15, window_bounds = array<i64: 1, 128>}, {pipeline_mode = #tpu.pipeline_mode<synchronous>, transform_indices = @transform_16, window_bounds = array<i64: 128, 256>}, {pipeline_mode = #tpu.pipeline_mode<synchronous>, transform_indices = @transform_17, window_bounds = array<i64: 1, 256>}, {transform_indices = @transform_18, window_bounds = array<i64: 2, 256>}]} {
    %c0 = arith.constant 0 : index
    %c0_0 = arith.constant 0 : index
    %c0_1 = arith.constant 0 : index
    %0 = vector.load %arg2[%c0, %c0_0, %c0_1] : memref<2x1x8xf32, #tpu.memory_space<vmem>>, vector<2x1x8xf32>
    %cst = arith.constant -1.000000e+09 : f32
    %1 = vector.broadcast %cst : f32 to vector<2x1x8xf32>
    %2 = arith.mulf %0, %1 : vector<2x1x8xf32>
    %c0_2 = arith.constant 0 : index
    %c0_3 = arith.constant 0 : index
    %c0_4 = arith.constant 0 : index
    %3 = vector.load %arg1[%c0_2, %c0_3, %c0_4] : memref<2x8x64xf32, #tpu.memory_space<vmem>>, vector<2x8x64xf32>
    %4 = vector.shape_cast %3 : vector<2x8x64xf32> to vector<16x64xf32>
    %c0_5 = arith.constant 0 : index
    %c0_6 = arith.constant 0 : index
    %c0_7 = arith.constant 0 : index
    %5 = vector.load %arg3[%c0_5, %c0_6, %c0_7] : memref<2x64x192xf32, #tpu.memory_space<vmem>>, vector<1x64x192xf32>
    %6 = vector.shape_cast %5 : vector<1x64x192xf32> to vector<64x192xf32>
    %cst_8 = arith.constant dense<0.000000e+00> : vector<16x192xf32>
    %7 = tpu.matmul %4, %6, %cst_8 {dimension_numbers = #tpu.dot_dimension_numbers<[1], [0], [0], [1], [0, 0, 1, 1], [], []>} : vector<16x64xf32>, vector<64x192xf32>, vector<16x192xf32> -> vector<16x192xf32>
    %c0_9 = arith.constant 0 : index
    %c0_10 = arith.constant 0 : index
    %c0_11 = arith.constant 0 : index
    %8 = vector.load %arg4[%c0_9, %c0_10, %c0_11] : memref<2x1x192xf32, #tpu.memory_space<vmem>>, vector<1x1x192xf32>
    %9 = vector.shape_cast %8 : vector<1x1x192xf32> to vector<1x192xf32>
    %10 = vector.broadcast %9 : vector<1x192xf32> to vector<16x192xf32>
    %11 = arith.addf %7, %10 : vector<16x192xf32>
    %12 = vector.extract_strided_slice %11 {offsets = [0, 0], sizes = [16, 64], strides = [1, 1]} : vector<16x192xf32> to vector<16x64xf32>
    %13 = vector.shape_cast %12 : vector<16x64xf32> to vector<2x8x64xf32>
    %14 = vector.extract_strided_slice %11 {offsets = [0, 64], sizes = [16, 64], strides = [1, 1]} : vector<16x192xf32> to vector<16x64xf32>
    %15 = vector.shape_cast %14 : vector<16x64xf32> to vector<2x8x64xf32>
    %16 = vector.extract_strided_slice %11 {offsets = [0, 128], sizes = [16, 64], strides = [1, 1]} : vector<16x192xf32> to vector<16x64xf32>
    %17 = vector.shape_cast %16 : vector<16x64xf32> to vector<2x8x64xf32>
    %c0_12 = arith.constant 0 : index
    %c0_13 = arith.constant 0 : index
    %c0_14 = arith.constant 0 : index
    %18 = vector.load %arg5[%c0_12, %c0_13, %c0_14] : memref<2x64x64xf32, #tpu.memory_space<vmem>>, vector<1x64x64xf32>
    %19 = vector.shape_cast %18 : vector<1x64x64xf32> to vector<64x64xf32>
    %cst_15 = arith.constant 0.000000e+00 : f32
    %20 = vector.broadcast %cst_15 : f32 to vector<16x64xf32>
    %21 = vector.extract_strided_slice %13 {offsets = [0, 0, 0], sizes = [2, 8, 16], strides = [1, 1, 1]} : vector<2x8x64xf32> to vector<2x8x16xf32>
    %22 = vector.extract_strided_slice %15 {offsets = [0, 0, 0], sizes = [2, 8, 16], strides = [1, 1, 1]} : vector<2x8x64xf32> to vector<2x8x16xf32>
    %23 = vector.extract_strided_slice %17 {offsets = [0, 0, 0], sizes = [2, 8, 16], strides = [1, 1, 1]} : vector<2x8x64xf32> to vector<2x8x16xf32>
    "tpu.trace_start"() <{level = 10 : i32, message = "bqd,bkd->bqk"}> : () -> ()
    %cst_16 = arith.constant dense<0.000000e+00> : vector<2x8x8xf32>
    %24 = tpu.matmul %21, %22, %cst_16 {dimension_numbers = #tpu.dot_dimension_numbers<[2], [2], [1], [1], [0, 0, 0, 1, 1, 1], [0], [0]>} : vector<2x8x16xf32>, vector<2x8x16xf32>, vector<2x8x8xf32> -> vector<2x8x8xf32>
    "tpu.trace_stop"() : () -> ()
    %cst_17 = arith.constant 2.500000e-01 : f32
    %25 = vector.broadcast %cst_17 : f32 to vector<2x8x8xf32>
    %26 = arith.mulf %24, %25 : vector<2x8x8xf32>
    %27 = vector.broadcast %2 : vector<2x1x8xf32> to vector<2x8x8xf32>
    %28 = arith.addf %26, %27 : vector<2x8x8xf32>
    %cst_18 = arith.constant dense<0xFF800000> : vector<2x8xf32>
    %29 = vector.multi_reduction <maximumf>, %28, %cst_18 [2] : vector<2x8x8xf32> to vector<2x8xf32>
    %30 = vector.shape_cast %29 : vector<2x8xf32> to vector<2x8x1xf32>
    %31 = vector.broadcast %30 : vector<2x8x1xf32> to vector<2x8x8xf32>
    %32 = arith.subf %28, %31 : vector<2x8x8xf32>
    %33 = math.exp %32 : vector<2x8x8xf32>
    %cst_19 = arith.constant dense<0.000000e+00> : vector<2x8xf32>
    %34 = vector.multi_reduction <add>, %33, %cst_19 [2] : vector<2x8x8xf32> to vector<2x8xf32>
    %35 = vector.shape_cast %34 : vector<2x8xf32> to vector<2x8x1xf32>
    %36 = tpu.reciprocal %35 {approx = true} : vector<2x8x1xf32> -> vector<2x8x1xf32>
    %37 = vector.broadcast %36 : vector<2x8x1xf32> to vector<2x8x8xf32>
    %38 = arith.mulf %33, %37 : vector<2x8x8xf32>
    "tpu.trace_start"() <{level = 10 : i32, message = "bqk,bkd->bqd"}> : () -> ()
    %cst_20 = arith.constant dense<0.000000e+00> : vector<2x8x16xf32>
    %39 = tpu.matmul %38, %23, %cst_20 {dimension_numbers = #tpu.dot_dimension_numbers<[2], [1], [1], [2], [0, 0, 0, 1, 1, 2], [0], [0]>} : vector<2x8x8xf32>, vector<2x8x16xf32>, vector<2x8x16xf32> -> vector<2x8x16xf32>
    "tpu.trace_stop"() : () -> ()
    %40 = vector.shape_cast %39 : vector<2x8x16xf32> to vector<16x16xf32>
    %41 = vector.extract_strided_slice %19 {offsets = [0, 0], sizes = [16, 64], strides = [1, 1]} : vector<64x64xf32> to vector<16x64xf32>
    %cst_21 = arith.constant dense<0.000000e+00> : vector<16x64xf32>
    %42 = tpu.matmul %40, %41, %cst_21 {dimension_numbers = #tpu.dot_dimension_numbers<[1], [0], [0], [1], [0, 0, 1, 1], [], []>} : vector<16x16xf32>, vector<16x64xf32>, vector<16x64xf32> -> vector<16x64xf32>
    %43 = arith.addf %20, %42 : vector<16x64xf32>
    %44 = vector.extract_strided_slice %13 {offsets = [0, 0, 16], sizes = [2, 8, 16], strides = [1, 1, 1]} : vector<2x8x64xf32> to vector<2x8x16xf32>
    %45 = vector.extract_strided_slice %15 {offsets = [0, 0, 16], sizes = [2, 8, 16], strides = [1, 1, 1]} : vector<2x8x64xf32> to vector<2x8x16xf32>
    %46 = vector.extract_strided_slice %17 {offsets = [0, 0, 16], sizes = [2, 8, 16], strides = [1, 1, 1]} : vector<2x8x64xf32> to vector<2x8x16xf32>
    "tpu.trace_start"() <{level = 10 : i32, message = "bqd,bkd->bqk"}> : () -> ()
    %cst_22 = arith.constant dense<0.000000e+00> : vector<2x8x8xf32>
    %47 = tpu.matmul %44, %45, %cst_22 {dimension_numbers = #tpu.dot_dimension_numbers<[2], [2], [1], [1], [0, 0, 0, 1, 1, 1], [0], [0]>} : vector<2x8x16xf32>, vector<2x8x16xf32>, vector<2x8x8xf32> -> vector<2x8x8xf32>
    "tpu.trace_stop"() : () -> ()
    %cst_23 = arith.constant 2.500000e-01 : f32
    %48 = vector.broadcast %cst_23 : f32 to vector<2x8x8xf32>
    %49 = arith.mulf %47, %48 : vector<2x8x8xf32>
    %50 = vector.broadcast %2 : vector<2x1x8xf32> to vector<2x8x8xf32>
    %51 = arith.addf %49, %50 : vector<2x8x8xf32>
    %cst_24 = arith.constant dense<0xFF800000> : vector<2x8xf32>
    %52 = vector.multi_reduction <maximumf>, %51, %cst_24 [2] : vector<2x8x8xf32> to vector<2x8xf32>
    %53 = vector.shape_cast %52 : vector<2x8xf32> to vector<2x8x1xf32>
    %54 = vector.broadcast %53 : vector<2x8x1xf32> to vector<2x8x8xf32>
    %55 = arith.subf %51, %54 : vector<2x8x8xf32>
    %56 = math.exp %55 : vector<2x8x8xf32>
    %cst_25 = arith.constant dense<0.000000e+00> : vector<2x8xf32>
    %57 = vector.multi_reduction <add>, %56, %cst_25 [2] : vector<2x8x8xf32> to vector<2x8xf32>
    %58 = vector.shape_cast %57 : vector<2x8xf32> to vector<2x8x1xf32>
    %59 = tpu.reciprocal %58 {approx = true} : vector<2x8x1xf32> -> vector<2x8x1xf32>
    %60 = vector.broadcast %59 : vector<2x8x1xf32> to vector<2x8x8xf32>
    %61 = arith.mulf %56, %60 : vector<2x8x8xf32>
    "tpu.trace_start"() <{level = 10 : i32, message = "bqk,bkd->bqd"}> : () -> ()
    %cst_26 = arith.constant dense<0.000000e+00> : vector<2x8x16xf32>
    %62 = tpu.matmul %61, %46, %cst_26 {dimension_numbers = #tpu.dot_dimension_numbers<[2], [1], [1], [2], [0, 0, 0, 1, 1, 2], [0], [0]>} : vector<2x8x8xf32>, vector<2x8x16xf32>, vector<2x8x16xf32> -> vector<2x8x16xf32>
    "tpu.trace_stop"() : () -> ()
    %63 = vector.shape_cast %62 : vector<2x8x16xf32> to vector<16x16xf32>
    %64 = vector.extract_strided_slice %19 {offsets = [16, 0], sizes = [16, 64], strides = [1, 1]} : vector<64x64xf32> to vector<16x64xf32>
    %cst_27 = arith.constant dense<0.000000e+00> : vector<16x64xf32>
    %65 = tpu.matmul %63, %64, %cst_27 {dimension_numbers = #tpu.dot_dimension_numbers<[1], [0], [0], [1], [0, 0, 1, 1], [], []>} : vector<16x16xf32>, vector<16x64xf32>, vector<16x64xf32> -> vector<16x64xf32>
    %66 = arith.addf %43, %65 : vector<16x64xf32>
    %67 = vector.extract_strided_slice %13 {offsets = [0, 0, 32], sizes = [2, 8, 16], strides = [1, 1, 1]} : vector<2x8x64xf32> to vector<2x8x16xf32>
    %68 = vector.extract_strided_slice %15 {offsets = [0, 0, 32], sizes = [2, 8, 16], strides = [1, 1, 1]} : vector<2x8x64xf32> to vector<2x8x16xf32>
    %69 = vector.extract_strided_slice %17 {offsets = [0, 0, 32], sizes = [2, 8, 16], strides = [1, 1, 1]} : vector<2x8x64xf32> to vector<2x8x16xf32>
    "tpu.trace_start"() <{level = 10 : i32, message = "bqd,bkd->bqk"}> : () -> ()
    %cst_28 = arith.constant dense<0.000000e+00> : vector<2x8x8xf32>
    %70 = tpu.matmul %67, %68, %cst_28 {dimension_numbers = #tpu.dot_dimension_numbers<[2], [2], [1], [1], [0, 0, 0, 1, 1, 1], [0], [0]>} : vector<2x8x16xf32>, vector<2x8x16xf32>, vector<2x8x8xf32> -> vector<2x8x8xf32>
    "tpu.trace_stop"() : () -> ()
    %cst_29 = arith.constant 2.500000e-01 : f32
    %71 = vector.broadcast %cst_29 : f32 to vector<2x8x8xf32>
    %72 = arith.mulf %70, %71 : vector<2x8x8xf32>
    %73 = vector.broadcast %2 : vector<2x1x8xf32> to vector<2x8x8xf32>
    %74 = arith.addf %72, %73 : vector<2x8x8xf32>
    %cst_30 = arith.constant dense<0xFF800000> : vector<2x8xf32>
    %75 = vector.multi_reduction <maximumf>, %74, %cst_30 [2] : vector<2x8x8xf32> to vector<2x8xf32>
    %76 = vector.shape_cast %75 : vector<2x8xf32> to vector<2x8x1xf32>
    %77 = vector.broadcast %76 : vector<2x8x1xf32> to vector<2x8x8xf32>
    %78 = arith.subf %74, %77 : vector<2x8x8xf32>
    %79 = math.exp %78 : vector<2x8x8xf32>
    %cst_31 = arith.constant dense<0.000000e+00> : vector<2x8xf32>
    %80 = vector.multi_reduction <add>, %79, %cst_31 [2] : vector<2x8x8xf32> to vector<2x8xf32>
    %81 = vector.shape_cast %80 : vector<2x8xf32> to vector<2x8x1xf32>
    %82 = tpu.reciprocal %81 {approx = true} : vector<2x8x1xf32> -> vector<2x8x1xf32>
    %83 = vector.broadcast %82 : vector<2x8x1xf32> to vector<2x8x8xf32>
    %84 = arith.mulf %79, %83 : vector<2x8x8xf32>
    "tpu.trace_start"() <{level = 10 : i32, message = "bqk,bkd->bqd"}> : () -> ()
    %cst_32 = arith.constant dense<0.000000e+00> : vector<2x8x16xf32>
    %85 = tpu.matmul %84, %69, %cst_32 {dimension_numbers = #tpu.dot_dimension_numbers<[2], [1], [1], [2], [0, 0, 0, 1, 1, 2], [0], [0]>} : vector<2x8x8xf32>, vector<2x8x16xf32>, vector<2x8x16xf32> -> vector<2x8x16xf32>
    "tpu.trace_stop"() : () -> ()
    %86 = vector.shape_cast %85 : vector<2x8x16xf32> to vector<16x16xf32>
    %87 = vector.extract_strided_slice %19 {offsets = [32, 0], sizes = [16, 64], strides = [1, 1]} : vector<64x64xf32> to vector<16x64xf32>
    %cst_33 = arith.constant dense<0.000000e+00> : vector<16x64xf32>
    %88 = tpu.matmul %86, %87, %cst_33 {dimension_numbers = #tpu.dot_dimension_numbers<[1], [0], [0], [1], [0, 0, 1, 1], [], []>} : vector<16x16xf32>, vector<16x64xf32>, vector<16x64xf32> -> vector<16x64xf32>
    %89 = arith.addf %66, %88 : vector<16x64xf32>
    %90 = vector.extract_strided_slice %13 {offsets = [0, 0, 48], sizes = [2, 8, 16], strides = [1, 1, 1]} : vector<2x8x64xf32> to vector<2x8x16xf32>
    %91 = vector.extract_strided_slice %15 {offsets = [0, 0, 48], sizes = [2, 8, 16], strides = [1, 1, 1]} : vector<2x8x64xf32> to vector<2x8x16xf32>
    %92 = vector.extract_strided_slice %17 {offsets = [0, 0, 48], sizes = [2, 8, 16], strides = [1, 1, 1]} : vector<2x8x64xf32> to vector<2x8x16xf32>
    "tpu.trace_start"() <{level = 10 : i32, message = "bqd,bkd->bqk"}> : () -> ()
    %cst_34 = arith.constant dense<0.000000e+00> : vector<2x8x8xf32>
    %93 = tpu.matmul %90, %91, %cst_34 {dimension_numbers = #tpu.dot_dimension_numbers<[2], [2], [1], [1], [0, 0, 0, 1, 1, 1], [0], [0]>} : vector<2x8x16xf32>, vector<2x8x16xf32>, vector<2x8x8xf32> -> vector<2x8x8xf32>
    "tpu.trace_stop"() : () -> ()
    %cst_35 = arith.constant 2.500000e-01 : f32
    %94 = vector.broadcast %cst_35 : f32 to vector<2x8x8xf32>
    %95 = arith.mulf %93, %94 : vector<2x8x8xf32>
    %96 = vector.broadcast %2 : vector<2x1x8xf32> to vector<2x8x8xf32>
    %97 = arith.addf %95, %96 : vector<2x8x8xf32>
    %cst_36 = arith.constant dense<0xFF800000> : vector<2x8xf32>
    %98 = vector.multi_reduction <maximumf>, %97, %cst_36 [2] : vector<2x8x8xf32> to vector<2x8xf32>
    %99 = vector.shape_cast %98 : vector<2x8xf32> to vector<2x8x1xf32>
    %100 = vector.broadcast %99 : vector<2x8x1xf32> to vector<2x8x8xf32>
    %101 = arith.subf %97, %100 : vector<2x8x8xf32>
    %102 = math.exp %101 : vector<2x8x8xf32>
    %cst_37 = arith.constant dense<0.000000e+00> : vector<2x8xf32>
    %103 = vector.multi_reduction <add>, %102, %cst_37 [2] : vector<2x8x8xf32> to vector<2x8xf32>
    %104 = vector.shape_cast %103 : vector<2x8xf32> to vector<2x8x1xf32>
    %105 = tpu.reciprocal %104 {approx = true} : vector<2x8x1xf32> -> vector<2x8x1xf32>
    %106 = vector.broadcast %105 : vector<2x8x1xf32> to vector<2x8x8xf32>
    %107 = arith.mulf %102, %106 : vector<2x8x8xf32>
    "tpu.trace_start"() <{level = 10 : i32, message = "bqk,bkd->bqd"}> : () -> ()
    %cst_38 = arith.constant dense<0.000000e+00> : vector<2x8x16xf32>
    %108 = tpu.matmul %107, %92, %cst_38 {dimension_numbers = #tpu.dot_dimension_numbers<[2], [1], [1], [2], [0, 0, 0, 1, 1, 2], [0], [0]>} : vector<2x8x8xf32>, vector<2x8x16xf32>, vector<2x8x16xf32> -> vector<2x8x16xf32>
    "tpu.trace_stop"() : () -> ()
    %109 = vector.shape_cast %108 : vector<2x8x16xf32> to vector<16x16xf32>
    %110 = vector.extract_strided_slice %19 {offsets = [48, 0], sizes = [16, 64], strides = [1, 1]} : vector<64x64xf32> to vector<16x64xf32>
    %cst_39 = arith.constant dense<0.000000e+00> : vector<16x64xf32>
    %111 = tpu.matmul %109, %110, %cst_39 {dimension_numbers = #tpu.dot_dimension_numbers<[1], [0], [0], [1], [0, 0, 1, 1], [], []>} : vector<16x16xf32>, vector<16x64xf32>, vector<16x64xf32> -> vector<16x64xf32>
    %112 = arith.addf %89, %111 : vector<16x64xf32>
    %c0_40 = arith.constant 0 : index
    %c0_41 = arith.constant 0 : index
    %c0_42 = arith.constant 0 : index
    %113 = vector.load %arg6[%c0_40, %c0_41, %c0_42] : memref<2x1x64xf32, #tpu.memory_space<vmem>>, vector<1x1x64xf32>
    %114 = vector.shape_cast %113 : vector<1x1x64xf32> to vector<1x64xf32>
    %115 = vector.broadcast %114 : vector<1x64xf32> to vector<16x64xf32>
    %116 = arith.addf %112, %115 : vector<16x64xf32>
    %117 = arith.addf %4, %116 : vector<16x64xf32>
    %c0_43 = arith.constant 0 : index
    %c0_44 = arith.constant 0 : index
    %c0_45 = arith.constant 0 : index
    %118 = vector.load %arg7[%c0_43, %c0_44, %c0_45] : memref<2x1x64xf32, #tpu.memory_space<vmem>>, vector<1x1x64xf32>
    %119 = vector.shape_cast %118 : vector<1x1x64xf32> to vector<1x64xf32>
    %c0_46 = arith.constant 0 : index
    %c0_47 = arith.constant 0 : index
    %c0_48 = arith.constant 0 : index
    %120 = vector.load %arg8[%c0_46, %c0_47, %c0_48] : memref<2x1x64xf32, #tpu.memory_space<vmem>>, vector<1x1x64xf32>
    %121 = vector.shape_cast %120 : vector<1x1x64xf32> to vector<1x64xf32>
    %cst_49 = arith.constant dense<0.000000e+00> : vector<16xf32>
    %122 = vector.multi_reduction <add>, %117, %cst_49 [1] : vector<16x64xf32> to vector<16xf32>
    %123 = vector.shape_cast %122 : vector<16xf32> to vector<16x1xf32>
    %cst_50 = arith.constant 6.400000e+01 : f32
    %124 = vector.broadcast %cst_50 : f32 to vector<16x1xf32>
    %125 = arith.divf %123, %124 : vector<16x1xf32>
    %126 = vector.broadcast %125 : vector<16x1xf32> to vector<16x64xf32>
    %127 = arith.subf %117, %126 : vector<16x64xf32>
    %128 = arith.mulf %127, %127 : vector<16x64xf32>
    %cst_51 = arith.constant dense<0.000000e+00> : vector<16xf32>
    %129 = vector.multi_reduction <add>, %128, %cst_51 [1] : vector<16x64xf32> to vector<16xf32>
    %130 = vector.shape_cast %129 : vector<16xf32> to vector<16x1xf32>
    %cst_52 = arith.constant 6.400000e+01 : f32
    %131 = vector.broadcast %cst_52 : f32 to vector<16x1xf32>
    %132 = arith.divf %130, %131 : vector<16x1xf32>
    %cst_53 = arith.constant 9.99999974E-6 : f32
    %133 = vector.broadcast %cst_53 : f32 to vector<16x1xf32>
    %134 = arith.addf %132, %133 : vector<16x1xf32>
    %135 = math.rsqrt %134 : vector<16x1xf32>
    %136 = vector.broadcast %135 : vector<16x1xf32> to vector<16x64xf32>
    %137 = arith.mulf %127, %136 : vector<16x64xf32>
    %138 = vector.broadcast %119 : vector<1x64xf32> to vector<16x64xf32>
    %139 = arith.mulf %137, %138 : vector<16x64xf32>
    %140 = vector.broadcast %121 : vector<1x64xf32> to vector<16x64xf32>
    %141 = arith.addf %139, %140 : vector<16x64xf32>
    %c0_54 = arith.constant 0 : index
    %c0_55 = arith.constant 0 : index
    %c0_56 = arith.constant 0 : index
    %142 = vector.load %arg9[%c0_54, %c0_55, %c0_56] : memref<2x64x256xf32, #tpu.memory_space<vmem>>, vector<1x64x256xf32>
    %143 = vector.shape_cast %142 : vector<1x64x256xf32> to vector<64x256xf32>
    %cst_57 = arith.constant dense<0.000000e+00> : vector<16x256xf32>
    %144 = tpu.matmul %141, %143, %cst_57 {dimension_numbers = #tpu.dot_dimension_numbers<[1], [0], [0], [1], [0, 0, 1, 1], [], []>} : vector<16x64xf32>, vector<64x256xf32>, vector<16x256xf32> -> vector<16x256xf32>
    %c0_58 = arith.constant 0 : index
    %c0_59 = arith.constant 0 : index
    %c0_60 = arith.constant 0 : index
    %145 = vector.load %arg10[%c0_58, %c0_59, %c0_60] : memref<2x1x256xf32, #tpu.memory_space<vmem>>, vector<1x1x256xf32>
    %146 = vector.shape_cast %145 : vector<1x1x256xf32> to vector<1x256xf32>
    %147 = vector.broadcast %146 : vector<1x256xf32> to vector<16x256xf32>
    %148 = arith.addf %144, %147 : vector<16x256xf32>
    %cst_61 = arith.constant 0.000000e+00 : f32
    %149 = vector.broadcast %cst_61 : f32 to vector<16x256xf32>
    %150 = arith.maximumf %148, %149 : vector<16x256xf32>
    %c0_62 = arith.constant 0 : index
    %c0_63 = arith.constant 0 : index
    %c0_64 = arith.constant 0 : index
    %151 = vector.load %arg11[%c0_62, %c0_63, %c0_64] : memref<2x256x64xf32, #tpu.memory_space<vmem>>, vector<1x256x64xf32>
    %152 = vector.shape_cast %151 : vector<1x256x64xf32> to vector<256x64xf32>
    %cst_65 = arith.constant dense<0.000000e+00> : vector<16x64xf32>
    %153 = tpu.matmul %150, %152, %cst_65 {dimension_numbers = #tpu.dot_dimension_numbers<[1], [0], [0], [1], [0, 0, 1, 1], [], []>} : vector<16x256xf32>, vector<256x64xf32>, vector<16x64xf32> -> vector<16x64xf32>
    %c0_66 = arith.constant 0 : index
    %c0_67 = arith.constant 0 : index
    %c0_68 = arith.constant 0 : index
    %154 = vector.load %arg12[%c0_66, %c0_67, %c0_68] : memref<2x1x64xf32, #tpu.memory_space<vmem>>, vector<1x1x64xf32>
    %155 = vector.shape_cast %154 : vector<1x1x64xf32> to vector<1x64xf32>
    %156 = vector.broadcast %155 : vector<1x64xf32> to vector<16x64xf32>
    %157 = arith.addf %153, %156 : vector<16x64xf32>
    %158 = arith.addf %141, %157 : vector<16x64xf32>
    %c0_69 = arith.constant 0 : index
    %c0_70 = arith.constant 0 : index
    %c0_71 = arith.constant 0 : index
    %159 = vector.load %arg13[%c0_69, %c0_70, %c0_71] : memref<2x1x64xf32, #tpu.memory_space<vmem>>, vector<1x1x64xf32>
    %160 = vector.shape_cast %159 : vector<1x1x64xf32> to vector<1x64xf32>
    %c0_72 = arith.constant 0 : index
    %c0_73 = arith.constant 0 : index
    %c0_74 = arith.constant 0 : index
    %161 = vector.load %arg14[%c0_72, %c0_73, %c0_74] : memref<2x1x64xf32, #tpu.memory_space<vmem>>, vector<1x1x64xf32>
    %162 = vector.shape_cast %161 : vector<1x1x64xf32> to vector<1x64xf32>
    %cst_75 = arith.constant dense<0.000000e+00> : vector<16xf32>
    %163 = vector.multi_reduction <add>, %158, %cst_75 [1] : vector<16x64xf32> to vector<16xf32>
    %164 = vector.shape_cast %163 : vector<16xf32> to vector<16x1xf32>
    %cst_76 = arith.constant 6.400000e+01 : f32
    %165 = vector.broadcast %cst_76 : f32 to vector<16x1xf32>
    %166 = arith.divf %164, %165 : vector<16x1xf32>
    %167 = vector.broadcast %166 : vector<16x1xf32> to vector<16x64xf32>
    %168 = arith.subf %158, %167 : vector<16x64xf32>
    %169 = arith.mulf %168, %168 : vector<16x64xf32>
    %cst_77 = arith.constant dense<0.000000e+00> : vector<16xf32>
    %170 = vector.multi_reduction <add>, %169, %cst_77 [1] : vector<16x64xf32> to vector<16xf32>
    %171 = vector.shape_cast %170 : vector<16xf32> to vector<16x1xf32>
    %cst_78 = arith.constant 6.400000e+01 : f32
    %172 = vector.broadcast %cst_78 : f32 to vector<16x1xf32>
    %173 = arith.divf %171, %172 : vector<16x1xf32>
    %cst_79 = arith.constant 9.99999974E-6 : f32
    %174 = vector.broadcast %cst_79 : f32 to vector<16x1xf32>
    %175 = arith.addf %173, %174 : vector<16x1xf32>
    %176 = math.rsqrt %175 : vector<16x1xf32>
    %177 = vector.broadcast %176 : vector<16x1xf32> to vector<16x64xf32>
    %178 = arith.mulf %168, %177 : vector<16x64xf32>
    %179 = vector.broadcast %160 : vector<1x64xf32> to vector<16x64xf32>
    %180 = arith.mulf %178, %179 : vector<16x64xf32>
    %181 = vector.broadcast %162 : vector<1x64xf32> to vector<16x64xf32>
    %182 = arith.addf %180, %181 : vector<16x64xf32>
    %c1 = arith.constant 1 : index
    %c0_80 = arith.constant 0 : index
    %c0_81 = arith.constant 0 : index
    %183 = vector.load %arg3[%c1, %c0_80, %c0_81] : memref<2x64x192xf32, #tpu.memory_space<vmem>>, vector<1x64x192xf32>
    %184 = vector.shape_cast %183 : vector<1x64x192xf32> to vector<64x192xf32>
    %cst_82 = arith.constant dense<0.000000e+00> : vector<16x192xf32>
    %185 = tpu.matmul %182, %184, %cst_82 {dimension_numbers = #tpu.dot_dimension_numbers<[1], [0], [0], [1], [0, 0, 1, 1], [], []>} : vector<16x64xf32>, vector<64x192xf32>, vector<16x192xf32> -> vector<16x192xf32>
    %c1_83 = arith.constant 1 : index
    %c0_84 = arith.constant 0 : index
    %c0_85 = arith.constant 0 : index
    %186 = vector.load %arg4[%c1_83, %c0_84, %c0_85] : memref<2x1x192xf32, #tpu.memory_space<vmem>>, vector<1x1x192xf32>
    %187 = vector.shape_cast %186 : vector<1x1x192xf32> to vector<1x192xf32>
    %188 = vector.broadcast %187 : vector<1x192xf32> to vector<16x192xf32>
    %189 = arith.addf %185, %188 : vector<16x192xf32>
    %190 = vector.extract_strided_slice %189 {offsets = [0, 0], sizes = [16, 64], strides = [1, 1]} : vector<16x192xf32> to vector<16x64xf32>
    %191 = vector.shape_cast %190 : vector<16x64xf32> to vector<2x8x64xf32>
    %192 = vector.extract_strided_slice %189 {offsets = [0, 64], sizes = [16, 64], strides = [1, 1]} : vector<16x192xf32> to vector<16x64xf32>
    %193 = vector.shape_cast %192 : vector<16x64xf32> to vector<2x8x64xf32>
    %194 = vector.extract_strided_slice %189 {offsets = [0, 128], sizes = [16, 64], strides = [1, 1]} : vector<16x192xf32> to vector<16x64xf32>
    %195 = vector.shape_cast %194 : vector<16x64xf32> to vector<2x8x64xf32>
    %c1_86 = arith.constant 1 : index
    %c0_87 = arith.constant 0 : index
    %c0_88 = arith.constant 0 : index
    %196 = vector.load %arg5[%c1_86, %c0_87, %c0_88] : memref<2x64x64xf32, #tpu.memory_space<vmem>>, vector<1x64x64xf32>
    %197 = vector.shape_cast %196 : vector<1x64x64xf32> to vector<64x64xf32>
    %cst_89 = arith.constant 0.000000e+00 : f32
    %198 = vector.broadcast %cst_89 : f32 to vector<16x64xf32>
    %199 = vector.extract_strided_slice %191 {offsets = [0, 0, 0], sizes = [2, 8, 16], strides = [1, 1, 1]} : vector<2x8x64xf32> to vector<2x8x16xf32>
    %200 = vector.extract_strided_slice %193 {offsets = [0, 0, 0], sizes = [2, 8, 16], strides = [1, 1, 1]} : vector<2x8x64xf32> to vector<2x8x16xf32>
    %201 = vector.extract_strided_slice %195 {offsets = [0, 0, 0], sizes = [2, 8, 16], strides = [1, 1, 1]} : vector<2x8x64xf32> to vector<2x8x16xf32>
    "tpu.trace_start"() <{level = 10 : i32, message = "bqd,bkd->bqk"}> : () -> ()
    %cst_90 = arith.constant dense<0.000000e+00> : vector<2x8x8xf32>
    %202 = tpu.matmul %199, %200, %cst_90 {dimension_numbers = #tpu.dot_dimension_numbers<[2], [2], [1], [1], [0, 0, 0, 1, 1, 1], [0], [0]>} : vector<2x8x16xf32>, vector<2x8x16xf32>, vector<2x8x8xf32> -> vector<2x8x8xf32>
    "tpu.trace_stop"() : () -> ()
    %cst_91 = arith.constant 2.500000e-01 : f32
    %203 = vector.broadcast %cst_91 : f32 to vector<2x8x8xf32>
    %204 = arith.mulf %202, %203 : vector<2x8x8xf32>
    %205 = vector.broadcast %2 : vector<2x1x8xf32> to vector<2x8x8xf32>
    %206 = arith.addf %204, %205 : vector<2x8x8xf32>
    %cst_92 = arith.constant dense<0xFF800000> : vector<2x8xf32>
    %207 = vector.multi_reduction <maximumf>, %206, %cst_92 [2] : vector<2x8x8xf32> to vector<2x8xf32>
    %208 = vector.shape_cast %207 : vector<2x8xf32> to vector<2x8x1xf32>
    %209 = vector.broadcast %208 : vector<2x8x1xf32> to vector<2x8x8xf32>
    %210 = arith.subf %206, %209 : vector<2x8x8xf32>
    %211 = math.exp %210 : vector<2x8x8xf32>
    %cst_93 = arith.constant dense<0.000000e+00> : vector<2x8xf32>
    %212 = vector.multi_reduction <add>, %211, %cst_93 [2] : vector<2x8x8xf32> to vector<2x8xf32>
    %213 = vector.shape_cast %212 : vector<2x8xf32> to vector<2x8x1xf32>
    %214 = tpu.reciprocal %213 {approx = true} : vector<2x8x1xf32> -> vector<2x8x1xf32>
    %215 = vector.broadcast %214 : vector<2x8x1xf32> to vector<2x8x8xf32>
    %216 = arith.mulf %211, %215 : vector<2x8x8xf32>
    "tpu.trace_start"() <{level = 10 : i32, message = "bqk,bkd->bqd"}> : () -> ()
    %cst_94 = arith.constant dense<0.000000e+00> : vector<2x8x16xf32>
    %217 = tpu.matmul %216, %201, %cst_94 {dimension_numbers = #tpu.dot_dimension_numbers<[2], [1], [1], [2], [0, 0, 0, 1, 1, 2], [0], [0]>} : vector<2x8x8xf32>, vector<2x8x16xf32>, vector<2x8x16xf32> -> vector<2x8x16xf32>
    "tpu.trace_stop"() : () -> ()
    %218 = vector.shape_cast %217 : vector<2x8x16xf32> to vector<16x16xf32>
    %219 = vector.extract_strided_slice %197 {offsets = [0, 0], sizes = [16, 64], strides = [1, 1]} : vector<64x64xf32> to vector<16x64xf32>
    %cst_95 = arith.constant dense<0.000000e+00> : vector<16x64xf32>
    %220 = tpu.matmul %218, %219, %cst_95 {dimension_numbers = #tpu.dot_dimension_numbers<[1], [0], [0], [1], [0, 0, 1, 1], [], []>} : vector<16x16xf32>, vector<16x64xf32>, vector<16x64xf32> -> vector<16x64xf32>
    %221 = arith.addf %198, %220 : vector<16x64xf32>
    %222 = vector.extract_strided_slice %191 {offsets = [0, 0, 16], sizes = [2, 8, 16], strides = [1, 1, 1]} : vector<2x8x64xf32> to vector<2x8x16xf32>
    %223 = vector.extract_strided_slice %193 {offsets = [0, 0, 16], sizes = [2, 8, 16], strides = [1, 1, 1]} : vector<2x8x64xf32> to vector<2x8x16xf32>
    %224 = vector.extract_strided_slice %195 {offsets = [0, 0, 16], sizes = [2, 8, 16], strides = [1, 1, 1]} : vector<2x8x64xf32> to vector<2x8x16xf32>
    "tpu.trace_start"() <{level = 10 : i32, message = "bqd,bkd->bqk"}> : () -> ()
    %cst_96 = arith.constant dense<0.000000e+00> : vector<2x8x8xf32>
    %225 = tpu.matmul %222, %223, %cst_96 {dimension_numbers = #tpu.dot_dimension_numbers<[2], [2], [1], [1], [0, 0, 0, 1, 1, 1], [0], [0]>} : vector<2x8x16xf32>, vector<2x8x16xf32>, vector<2x8x8xf32> -> vector<2x8x8xf32>
    "tpu.trace_stop"() : () -> ()
    %cst_97 = arith.constant 2.500000e-01 : f32
    %226 = vector.broadcast %cst_97 : f32 to vector<2x8x8xf32>
    %227 = arith.mulf %225, %226 : vector<2x8x8xf32>
    %228 = vector.broadcast %2 : vector<2x1x8xf32> to vector<2x8x8xf32>
    %229 = arith.addf %227, %228 : vector<2x8x8xf32>
    %cst_98 = arith.constant dense<0xFF800000> : vector<2x8xf32>
    %230 = vector.multi_reduction <maximumf>, %229, %cst_98 [2] : vector<2x8x8xf32> to vector<2x8xf32>
    %231 = vector.shape_cast %230 : vector<2x8xf32> to vector<2x8x1xf32>
    %232 = vector.broadcast %231 : vector<2x8x1xf32> to vector<2x8x8xf32>
    %233 = arith.subf %229, %232 : vector<2x8x8xf32>
    %234 = math.exp %233 : vector<2x8x8xf32>
    %cst_99 = arith.constant dense<0.000000e+00> : vector<2x8xf32>
    %235 = vector.multi_reduction <add>, %234, %cst_99 [2] : vector<2x8x8xf32> to vector<2x8xf32>
    %236 = vector.shape_cast %235 : vector<2x8xf32> to vector<2x8x1xf32>
    %237 = tpu.reciprocal %236 {approx = true} : vector<2x8x1xf32> -> vector<2x8x1xf32>
    %238 = vector.broadcast %237 : vector<2x8x1xf32> to vector<2x8x8xf32>
    %239 = arith.mulf %234, %238 : vector<2x8x8xf32>
    "tpu.trace_start"() <{level = 10 : i32, message = "bqk,bkd->bqd"}> : () -> ()
    %cst_100 = arith.constant dense<0.000000e+00> : vector<2x8x16xf32>
    %240 = tpu.matmul %239, %224, %cst_100 {dimension_numbers = #tpu.dot_dimension_numbers<[2], [1], [1], [2], [0, 0, 0, 1, 1, 2], [0], [0]>} : vector<2x8x8xf32>, vector<2x8x16xf32>, vector<2x8x16xf32> -> vector<2x8x16xf32>
    "tpu.trace_stop"() : () -> ()
    %241 = vector.shape_cast %240 : vector<2x8x16xf32> to vector<16x16xf32>
    %242 = vector.extract_strided_slice %197 {offsets = [16, 0], sizes = [16, 64], strides = [1, 1]} : vector<64x64xf32> to vector<16x64xf32>
    %cst_101 = arith.constant dense<0.000000e+00> : vector<16x64xf32>
    %243 = tpu.matmul %241, %242, %cst_101 {dimension_numbers = #tpu.dot_dimension_numbers<[1], [0], [0], [1], [0, 0, 1, 1], [], []>} : vector<16x16xf32>, vector<16x64xf32>, vector<16x64xf32> -> vector<16x64xf32>
    %244 = arith.addf %221, %243 : vector<16x64xf32>
    %245 = vector.extract_strided_slice %191 {offsets = [0, 0, 32], sizes = [2, 8, 16], strides = [1, 1, 1]} : vector<2x8x64xf32> to vector<2x8x16xf32>
    %246 = vector.extract_strided_slice %193 {offsets = [0, 0, 32], sizes = [2, 8, 16], strides = [1, 1, 1]} : vector<2x8x64xf32> to vector<2x8x16xf32>
    %247 = vector.extract_strided_slice %195 {offsets = [0, 0, 32], sizes = [2, 8, 16], strides = [1, 1, 1]} : vector<2x8x64xf32> to vector<2x8x16xf32>
    "tpu.trace_start"() <{level = 10 : i32, message = "bqd,bkd->bqk"}> : () -> ()
    %cst_102 = arith.constant dense<0.000000e+00> : vector<2x8x8xf32>
    %248 = tpu.matmul %245, %246, %cst_102 {dimension_numbers = #tpu.dot_dimension_numbers<[2], [2], [1], [1], [0, 0, 0, 1, 1, 1], [0], [0]>} : vector<2x8x16xf32>, vector<2x8x16xf32>, vector<2x8x8xf32> -> vector<2x8x8xf32>
    "tpu.trace_stop"() : () -> ()
    %cst_103 = arith.constant 2.500000e-01 : f32
    %249 = vector.broadcast %cst_103 : f32 to vector<2x8x8xf32>
    %250 = arith.mulf %248, %249 : vector<2x8x8xf32>
    %251 = vector.broadcast %2 : vector<2x1x8xf32> to vector<2x8x8xf32>
    %252 = arith.addf %250, %251 : vector<2x8x8xf32>
    %cst_104 = arith.constant dense<0xFF800000> : vector<2x8xf32>
    %253 = vector.multi_reduction <maximumf>, %252, %cst_104 [2] : vector<2x8x8xf32> to vector<2x8xf32>
    %254 = vector.shape_cast %253 : vector<2x8xf32> to vector<2x8x1xf32>
    %255 = vector.broadcast %254 : vector<2x8x1xf32> to vector<2x8x8xf32>
    %256 = arith.subf %252, %255 : vector<2x8x8xf32>
    %257 = math.exp %256 : vector<2x8x8xf32>
    %cst_105 = arith.constant dense<0.000000e+00> : vector<2x8xf32>
    %258 = vector.multi_reduction <add>, %257, %cst_105 [2] : vector<2x8x8xf32> to vector<2x8xf32>
    %259 = vector.shape_cast %258 : vector<2x8xf32> to vector<2x8x1xf32>
    %260 = tpu.reciprocal %259 {approx = true} : vector<2x8x1xf32> -> vector<2x8x1xf32>
    %261 = vector.broadcast %260 : vector<2x8x1xf32> to vector<2x8x8xf32>
    %262 = arith.mulf %257, %261 : vector<2x8x8xf32>
    "tpu.trace_start"() <{level = 10 : i32, message = "bqk,bkd->bqd"}> : () -> ()
    %cst_106 = arith.constant dense<0.000000e+00> : vector<2x8x16xf32>
    %263 = tpu.matmul %262, %247, %cst_106 {dimension_numbers = #tpu.dot_dimension_numbers<[2], [1], [1], [2], [0, 0, 0, 1, 1, 2], [0], [0]>} : vector<2x8x8xf32>, vector<2x8x16xf32>, vector<2x8x16xf32> -> vector<2x8x16xf32>
    "tpu.trace_stop"() : () -> ()
    %264 = vector.shape_cast %263 : vector<2x8x16xf32> to vector<16x16xf32>
    %265 = vector.extract_strided_slice %197 {offsets = [32, 0], sizes = [16, 64], strides = [1, 1]} : vector<64x64xf32> to vector<16x64xf32>
    %cst_107 = arith.constant dense<0.000000e+00> : vector<16x64xf32>
    %266 = tpu.matmul %264, %265, %cst_107 {dimension_numbers = #tpu.dot_dimension_numbers<[1], [0], [0], [1], [0, 0, 1, 1], [], []>} : vector<16x16xf32>, vector<16x64xf32>, vector<16x64xf32> -> vector<16x64xf32>
    %267 = arith.addf %244, %266 : vector<16x64xf32>
    %268 = vector.extract_strided_slice %191 {offsets = [0, 0, 48], sizes = [2, 8, 16], strides = [1, 1, 1]} : vector<2x8x64xf32> to vector<2x8x16xf32>
    %269 = vector.extract_strided_slice %193 {offsets = [0, 0, 48], sizes = [2, 8, 16], strides = [1, 1, 1]} : vector<2x8x64xf32> to vector<2x8x16xf32>
    %270 = vector.extract_strided_slice %195 {offsets = [0, 0, 48], sizes = [2, 8, 16], strides = [1, 1, 1]} : vector<2x8x64xf32> to vector<2x8x16xf32>
    "tpu.trace_start"() <{level = 10 : i32, message = "bqd,bkd->bqk"}> : () -> ()
    %cst_108 = arith.constant dense<0.000000e+00> : vector<2x8x8xf32>
    %271 = tpu.matmul %268, %269, %cst_108 {dimension_numbers = #tpu.dot_dimension_numbers<[2], [2], [1], [1], [0, 0, 0, 1, 1, 1], [0], [0]>} : vector<2x8x16xf32>, vector<2x8x16xf32>, vector<2x8x8xf32> -> vector<2x8x8xf32>
    "tpu.trace_stop"() : () -> ()
    %cst_109 = arith.constant 2.500000e-01 : f32
    %272 = vector.broadcast %cst_109 : f32 to vector<2x8x8xf32>
    %273 = arith.mulf %271, %272 : vector<2x8x8xf32>
    %274 = vector.broadcast %2 : vector<2x1x8xf32> to vector<2x8x8xf32>
    %275 = arith.addf %273, %274 : vector<2x8x8xf32>
    %cst_110 = arith.constant dense<0xFF800000> : vector<2x8xf32>
    %276 = vector.multi_reduction <maximumf>, %275, %cst_110 [2] : vector<2x8x8xf32> to vector<2x8xf32>
    %277 = vector.shape_cast %276 : vector<2x8xf32> to vector<2x8x1xf32>
    %278 = vector.broadcast %277 : vector<2x8x1xf32> to vector<2x8x8xf32>
    %279 = arith.subf %275, %278 : vector<2x8x8xf32>
    %280 = math.exp %279 : vector<2x8x8xf32>
    %cst_111 = arith.constant dense<0.000000e+00> : vector<2x8xf32>
    %281 = vector.multi_reduction <add>, %280, %cst_111 [2] : vector<2x8x8xf32> to vector<2x8xf32>
    %282 = vector.shape_cast %281 : vector<2x8xf32> to vector<2x8x1xf32>
    %283 = tpu.reciprocal %282 {approx = true} : vector<2x8x1xf32> -> vector<2x8x1xf32>
    %284 = vector.broadcast %283 : vector<2x8x1xf32> to vector<2x8x8xf32>
    %285 = arith.mulf %280, %284 : vector<2x8x8xf32>
    "tpu.trace_start"() <{level = 10 : i32, message = "bqk,bkd->bqd"}> : () -> ()
    %cst_112 = arith.constant dense<0.000000e+00> : vector<2x8x16xf32>
    %286 = tpu.matmul %285, %270, %cst_112 {dimension_numbers = #tpu.dot_dimension_numbers<[2], [1], [1], [2], [0, 0, 0, 1, 1, 2], [0], [0]>} : vector<2x8x8xf32>, vector<2x8x16xf32>, vector<2x8x16xf32> -> vector<2x8x16xf32>
    "tpu.trace_stop"() : () -> ()
    %287 = vector.shape_cast %286 : vector<2x8x16xf32> to vector<16x16xf32>
    %288 = vector.extract_strided_slice %197 {offsets = [48, 0], sizes = [16, 64], strides = [1, 1]} : vector<64x64xf32> to vector<16x64xf32>
    %cst_113 = arith.constant dense<0.000000e+00> : vector<16x64xf32>
    %289 = tpu.matmul %287, %288, %cst_113 {dimension_numbers = #tpu.dot_dimension_numbers<[1], [0], [0], [1], [0, 0, 1, 1], [], []>} : vector<16x16xf32>, vector<16x64xf32>, vector<16x64xf32> -> vector<16x64xf32>
    %290 = arith.addf %267, %289 : vector<16x64xf32>
    %c1_114 = arith.constant 1 : index
    %c0_115 = arith.constant 0 : index
    %c0_116 = arith.constant 0 : index
    %291 = vector.load %arg6[%c1_114, %c0_115, %c0_116] : memref<2x1x64xf32, #tpu.memory_space<vmem>>, vector<1x1x64xf32>
    %292 = vector.shape_cast %291 : vector<1x1x64xf32> to vector<1x64xf32>
    %293 = vector.broadcast %292 : vector<1x64xf32> to vector<16x64xf32>
    %294 = arith.addf %290, %293 : vector<16x64xf32>
    %295 = arith.addf %182, %294 : vector<16x64xf32>
    %c1_117 = arith.constant 1 : index
    %c0_118 = arith.constant 0 : index
    %c0_119 = arith.constant 0 : index
    %296 = vector.load %arg7[%c1_117, %c0_118, %c0_119] : memref<2x1x64xf32, #tpu.memory_space<vmem>>, vector<1x1x64xf32>
    %297 = vector.shape_cast %296 : vector<1x1x64xf32> to vector<1x64xf32>
    %c1_120 = arith.constant 1 : index
    %c0_121 = arith.constant 0 : index
    %c0_122 = arith.constant 0 : index
    %298 = vector.load %arg8[%c1_120, %c0_121, %c0_122] : memref<2x1x64xf32, #tpu.memory_space<vmem>>, vector<1x1x64xf32>
    %299 = vector.shape_cast %298 : vector<1x1x64xf32> to vector<1x64xf32>
    %cst_123 = arith.constant dense<0.000000e+00> : vector<16xf32>
    %300 = vector.multi_reduction <add>, %295, %cst_123 [1] : vector<16x64xf32> to vector<16xf32>
    %301 = vector.shape_cast %300 : vector<16xf32> to vector<16x1xf32>
    %cst_124 = arith.constant 6.400000e+01 : f32
    %302 = vector.broadcast %cst_124 : f32 to vector<16x1xf32>
    %303 = arith.divf %301, %302 : vector<16x1xf32>
    %304 = vector.broadcast %303 : vector<16x1xf32> to vector<16x64xf32>
    %305 = arith.subf %295, %304 : vector<16x64xf32>
    %306 = arith.mulf %305, %305 : vector<16x64xf32>
    %cst_125 = arith.constant dense<0.000000e+00> : vector<16xf32>
    %307 = vector.multi_reduction <add>, %306, %cst_125 [1] : vector<16x64xf32> to vector<16xf32>
    %308 = vector.shape_cast %307 : vector<16xf32> to vector<16x1xf32>
    %cst_126 = arith.constant 6.400000e+01 : f32
    %309 = vector.broadcast %cst_126 : f32 to vector<16x1xf32>
    %310 = arith.divf %308, %309 : vector<16x1xf32>
    %cst_127 = arith.constant 9.99999974E-6 : f32
    %311 = vector.broadcast %cst_127 : f32 to vector<16x1xf32>
    %312 = arith.addf %310, %311 : vector<16x1xf32>
    %313 = math.rsqrt %312 : vector<16x1xf32>
    %314 = vector.broadcast %313 : vector<16x1xf32> to vector<16x64xf32>
    %315 = arith.mulf %305, %314 : vector<16x64xf32>
    %316 = vector.broadcast %297 : vector<1x64xf32> to vector<16x64xf32>
    %317 = arith.mulf %315, %316 : vector<16x64xf32>
    %318 = vector.broadcast %299 : vector<1x64xf32> to vector<16x64xf32>
    %319 = arith.addf %317, %318 : vector<16x64xf32>
    %c1_128 = arith.constant 1 : index
    %c0_129 = arith.constant 0 : index
    %c0_130 = arith.constant 0 : index
    %320 = vector.load %arg9[%c1_128, %c0_129, %c0_130] : memref<2x64x256xf32, #tpu.memory_space<vmem>>, vector<1x64x256xf32>
    %321 = vector.shape_cast %320 : vector<1x64x256xf32> to vector<64x256xf32>
    %cst_131 = arith.constant dense<0.000000e+00> : vector<16x256xf32>
    %322 = tpu.matmul %319, %321, %cst_131 {dimension_numbers = #tpu.dot_dimension_numbers<[1], [0], [0], [1], [0, 0, 1, 1], [], []>} : vector<16x64xf32>, vector<64x256xf32>, vector<16x256xf32> -> vector<16x256xf32>
    %c1_132 = arith.constant 1 : index
    %c0_133 = arith.constant 0 : index
    %c0_134 = arith.constant 0 : index
    %323 = vector.load %arg10[%c1_132, %c0_133, %c0_134] : memref<2x1x256xf32, #tpu.memory_space<vmem>>, vector<1x1x256xf32>
    %324 = vector.shape_cast %323 : vector<1x1x256xf32> to vector<1x256xf32>
    %325 = vector.broadcast %324 : vector<1x256xf32> to vector<16x256xf32>
    %326 = arith.addf %322, %325 : vector<16x256xf32>
    %cst_135 = arith.constant 0.000000e+00 : f32
    %327 = vector.broadcast %cst_135 : f32 to vector<16x256xf32>
    %328 = arith.maximumf %326, %327 : vector<16x256xf32>
    %c1_136 = arith.constant 1 : index
    %c0_137 = arith.constant 0 : index
    %c0_138 = arith.constant 0 : index
    %329 = vector.load %arg11[%c1_136, %c0_137, %c0_138] : memref<2x256x64xf32, #tpu.memory_space<vmem>>, vector<1x256x64xf32>
    %330 = vector.shape_cast %329 : vector<1x256x64xf32> to vector<256x64xf32>
    %cst_139 = arith.constant dense<0.000000e+00> : vector<16x64xf32>
    %331 = tpu.matmul %328, %330, %cst_139 {dimension_numbers = #tpu.dot_dimension_numbers<[1], [0], [0], [1], [0, 0, 1, 1], [], []>} : vector<16x256xf32>, vector<256x64xf32>, vector<16x64xf32> -> vector<16x64xf32>
    %c1_140 = arith.constant 1 : index
    %c0_141 = arith.constant 0 : index
    %c0_142 = arith.constant 0 : index
    %332 = vector.load %arg12[%c1_140, %c0_141, %c0_142] : memref<2x1x64xf32, #tpu.memory_space<vmem>>, vector<1x1x64xf32>
    %333 = vector.shape_cast %332 : vector<1x1x64xf32> to vector<1x64xf32>
    %334 = vector.broadcast %333 : vector<1x64xf32> to vector<16x64xf32>
    %335 = arith.addf %331, %334 : vector<16x64xf32>
    %336 = arith.addf %319, %335 : vector<16x64xf32>
    %c1_143 = arith.constant 1 : index
    %c0_144 = arith.constant 0 : index
    %c0_145 = arith.constant 0 : index
    %337 = vector.load %arg13[%c1_143, %c0_144, %c0_145] : memref<2x1x64xf32, #tpu.memory_space<vmem>>, vector<1x1x64xf32>
    %338 = vector.shape_cast %337 : vector<1x1x64xf32> to vector<1x64xf32>
    %c1_146 = arith.constant 1 : index
    %c0_147 = arith.constant 0 : index
    %c0_148 = arith.constant 0 : index
    %339 = vector.load %arg14[%c1_146, %c0_147, %c0_148] : memref<2x1x64xf32, #tpu.memory_space<vmem>>, vector<1x1x64xf32>
    %340 = vector.shape_cast %339 : vector<1x1x64xf32> to vector<1x64xf32>
    %cst_149 = arith.constant dense<0.000000e+00> : vector<16xf32>
    %341 = vector.multi_reduction <add>, %336, %cst_149 [1] : vector<16x64xf32> to vector<16xf32>
    %342 = vector.shape_cast %341 : vector<16xf32> to vector<16x1xf32>
    %cst_150 = arith.constant 6.400000e+01 : f32
    %343 = vector.broadcast %cst_150 : f32 to vector<16x1xf32>
    %344 = arith.divf %342, %343 : vector<16x1xf32>
    %345 = vector.broadcast %344 : vector<16x1xf32> to vector<16x64xf32>
    %346 = arith.subf %336, %345 : vector<16x64xf32>
    %347 = arith.mulf %346, %346 : vector<16x64xf32>
    %cst_151 = arith.constant dense<0.000000e+00> : vector<16xf32>
    %348 = vector.multi_reduction <add>, %347, %cst_151 [1] : vector<16x64xf32> to vector<16xf32>
    %349 = vector.shape_cast %348 : vector<16xf32> to vector<16x1xf32>
    %cst_152 = arith.constant 6.400000e+01 : f32
    %350 = vector.broadcast %cst_152 : f32 to vector<16x1xf32>
    %351 = arith.divf %349, %350 : vector<16x1xf32>
    %cst_153 = arith.constant 9.99999974E-6 : f32
    %352 = vector.broadcast %cst_153 : f32 to vector<16x1xf32>
    %353 = arith.addf %351, %352 : vector<16x1xf32>
    %354 = math.rsqrt %353 : vector<16x1xf32>
    %355 = vector.broadcast %354 : vector<16x1xf32> to vector<16x64xf32>
    %356 = arith.mulf %346, %355 : vector<16x64xf32>
    %357 = vector.broadcast %338 : vector<1x64xf32> to vector<16x64xf32>
    %358 = arith.mulf %356, %357 : vector<16x64xf32>
    %359 = vector.broadcast %340 : vector<1x64xf32> to vector<16x64xf32>
    %360 = arith.addf %358, %359 : vector<16x64xf32>
    %361 = vector.shape_cast %360 : vector<16x64xf32> to vector<2x8x64xf32>
    %cst_154 = arith.constant dense<0.000000e+00> : vector<2x64xf32>
    %362 = vector.multi_reduction <add>, %361, %cst_154 [1] : vector<2x8x64xf32> to vector<2x64xf32>
    %cst_155 = arith.constant 8.000000e+00 : f32
    %363 = vector.broadcast %cst_155 : f32 to vector<2x64xf32>
    %364 = arith.divf %362, %363 : vector<2x64xf32>
    %c0_156 = arith.constant 0 : index
    %c0_157 = arith.constant 0 : index
    %365 = vector.load %arg15[%c0_156, %c0_157] : memref<64x128xf32, #tpu.memory_space<vmem>>, vector<64x128xf32>
    %cst_158 = arith.constant dense<0.000000e+00> : vector<2x128xf32>
    %366 = tpu.matmul %364, %365, %cst_158 {dimension_numbers = #tpu.dot_dimension_numbers<[1], [0], [0], [1], [0, 0, 1, 1], [], []>} : vector<2x64xf32>, vector<64x128xf32>, vector<2x128xf32> -> vector<2x128xf32>
    %c0_159 = arith.constant 0 : index
    %c0_160 = arith.constant 0 : index
    %367 = vector.load %arg16[%c0_159, %c0_160] : memref<1x128xf32, #tpu.memory_space<vmem>>, vector<1x128xf32>
    %368 = vector.broadcast %367 : vector<1x128xf32> to vector<2x128xf32>
    %369 = arith.addf %366, %368 : vector<2x128xf32>
    %c0_161 = arith.constant 0 : index
    %c0_162 = arith.constant 0 : index
    %370 = vector.load %arg17[%c0_161, %c0_162] : memref<128x256xf32, #tpu.memory_space<vmem>>, vector<128x256xf32>
    %cst_163 = arith.constant dense<0.000000e+00> : vector<2x256xf32>
    %371 = tpu.matmul %369, %370, %cst_163 {dimension_numbers = #tpu.dot_dimension_numbers<[1], [0], [0], [1], [0, 0, 1, 1], [], []>} : vector<2x128xf32>, vector<128x256xf32>, vector<2x256xf32> -> vector<2x256xf32>
    %c0_164 = arith.constant 0 : index
    %c0_165 = arith.constant 0 : index
    %372 = vector.load %arg18[%c0_164, %c0_165] : memref<1x256xf32, #tpu.memory_space<vmem>>, vector<1x256xf32>
    %373 = vector.broadcast %372 : vector<1x256xf32> to vector<2x256xf32>
    %374 = arith.addf %371, %373 : vector<2x256xf32>
    %c0_166 = arith.constant 0 : index
    %c0_167 = arith.constant 0 : index
    %375 = vector.load %arg19[%c0_166, %c0_167] : memref<2x256xf32, #tpu.memory_space<vmem>>, vector<2x256xf32>
    tpu.vector_store %arg19[%c0_166, %c0_167], %374 {strides = array<i32>} : memref<2x256xf32, #tpu.memory_space<vmem>>, vector<2x256xf32>,
    return
  }
  func.func @transform_0(%arg0: i32) -> (i32, i32, i32) {
    %c0_i32 = arith.constant 0 : i32
    %c0_i32_0 = arith.constant 0 : i32
    %c0_i32_1 = arith.constant 0 : i32
    return %arg0, %c0_i32, %c0_i32_0 : i32, i32, i32
  }
  func.func @transform_1(%arg0: i32) -> (i32, i32, i32) {
    %c0_i32 = arith.constant 0 : i32
    %c0_i32_0 = arith.constant 0 : i32
    %c0_i32_1 = arith.constant 0 : i32
    return %arg0, %c0_i32, %c0_i32_0 : i32, i32, i32
  }
  func.func @transform_2(%arg0: i32) -> (i32, i32, i32) {
    %c0_i32 = arith.constant 0 : i32
    %c0_i32_0 = arith.constant 0 : i32
    %c0_i32_1 = arith.constant 0 : i32
    %c0_i32_2 = arith.constant 0 : i32
    return %c0_i32, %c0_i32_0, %c0_i32_1 : i32, i32, i32
  }
  func.func @transform_3(%arg0: i32) -> (i32, i32, i32) {
    %c0_i32 = arith.constant 0 : i32
    %c0_i32_0 = arith.constant 0 : i32
    %c0_i32_1 = arith.constant 0 : i32
    %c0_i32_2 = arith.constant 0 : i32
    return %c0_i32, %c0_i32_0, %c0_i32_1 : i32, i32, i32
  }
  func.func @transform_4(%arg0: i32) -> (i32, i32, i32) {
    %c0_i32 = arith.constant 0 : i32
    %c0_i32_0 = arith.constant 0 : i32
    %c0_i32_1 = arith.constant 0 : i32
    %c0_i32_2 = arith.constant 0 : i32
    return %c0_i32, %c0_i32_0, %c0_i32_1 : i32, i32, i32
  }
  func.func @transform_5(%arg0: i32) -> (i32, i32, i32) {
    %c0_i32 = arith.constant 0 : i32
    %c0_i32_0 = arith.constant 0 : i32
    %c0_i32_1 = arith.constant 0 : i32
    %c0_i32_2 = arith.constant 0 : i32
    return %c0_i32, %c0_i32_0, %c0_i32_1 : i32, i32, i32
  }
  func.func @transform_6(%arg0: i32) -> (i32, i32, i32) {
    %c0_i32 = arith.constant 0 : i32
    %c0_i32_0 = arith.constant 0 : i32
    %c0_i32_1 = arith.constant 0 : i32
    %c0_i32_2 = arith.constant 0 : i32
    return %c0_i32, %c0_i32_0, %c0_i32_1 : i32, i32, i32
  }
  func.func @transform_7(%arg0: i32) -> (i32, i32, i32) {
    %c0_i32 = arith.constant 0 : i32
    %c0_i32_0 = arith.constant 0 : i32
    %c0_i32_1 = arith.constant 0 : i32
    %c0_i32_2 = arith.constant 0 : i32
    return %c0_i32, %c0_i32_0, %c0_i32_1 : i32, i32, i32
  }
  func.func @transform_8(%arg0: i32) -> (i32, i32, i32) {
    %c0_i32 = arith.constant 0 : i32
    %c0_i32_0 = arith.constant 0 : i32
    %c0_i32_1 = arith.constant 0 : i32
    %c0_i32_2 = arith.constant 0 : i32
    return %c0_i32, %c0_i32_0, %c0_i32_1 : i32, i32, i32
  }
  func.func @transform_9(%arg0: i32) -> (i32, i32, i32) {
    %c0_i32 = arith.constant 0 : i32
    %c0_i32_0 = arith.constant 0 : i32
    %c0_i32_1 = arith.constant 0 : i32
    %c0_i32_2 = arith.constant 0 : i32
    return %c0_i32, %c0_i32_0, %c0_i32_1 : i32, i32, i32
  }
  func.func @transform_10(%arg0: i32) -> (i32, i32, i32) {
    %c0_i32 = arith.constant 0 : i32
    %c0_i32_0 = arith.constant 0 : i32
    %c0_i32_1 = arith.constant 0 : i32
    %c0_i32_2 = arith.constant 0 : i32
    return %c0_i32, %c0_i32_0, %c0_i32_1 : i32, i32, i32
  }
  func.func @transform_11(%arg0: i32) -> (i32, i32, i32) {
    %c0_i32 = arith.constant 0 : i32
    %c0_i32_0 = arith.constant 0 : i32
    %c0_i32_1 = arith.constant 0 : i32
    %c0_i32_2 = arith.constant 0 : i32
    return %c0_i32, %c0_i32_0, %c0_i32_1 : i32, i32, i32
  }
  func.func @transform_12(%arg0: i32) -> (i32, i32, i32) {
    %c0_i32 = arith.constant 0 : i32
    %c0_i32_0 = arith.constant 0 : i32
    %c0_i32_1 = arith.constant 0 : i32
    %c0_i32_2 = arith.constant 0 : i32
    return %c0_i32, %c0_i32_0, %c0_i32_1 : i32, i32, i32
  }
  func.func @transform_13(%arg0: i32) -> (i32, i32, i32) {
    %c0_i32 = arith.constant 0 : i32
    %c0_i32_0 = arith.constant 0 : i32
    %c0_i32_1 = arith.constant 0 : i32
    %c0_i32_2 = arith.constant 0 : i32
    return %c0_i32, %c0_i32_0, %c0_i32_1 : i32, i32, i32
  }
  func.func @transform_14(%arg0: i32) -> (i32, i32) {
    %c0_i32 = arith.constant 0 : i32
    %c0_i32_0 = arith.constant 0 : i32
    %c0_i32_1 = arith.constant 0 : i32
    return %c0_i32, %c0_i32_0 : i32, i32
  }
  func.func @transform_15(%arg0: i32) -> (i32, i32) {
    %c0_i32 = arith.constant 0 : i32
    %c0_i32_0 = arith.constant 0 : i32
    %c0_i32_1 = arith.constant 0 : i32
    return %c0_i32, %c0_i32_0 : i32, i32
  }
  func.func @transform_16(%arg0: i32) -> (i32, i32) {
    %c0_i32 = arith.constant 0 : i32
    %c0_i32_0 = arith.constant 0 : i32
    %c0_i32_1 = arith.constant 0 : i32
    return %c0_i32, %c0_i32_0 : i32, i32
  }
  func.func @transform_17(%arg0: i32) -> (i32, i32) {
    %c0_i32 = arith.constant 0 : i32
    %c0_i32_0 = arith.constant 0 : i32
    %c0_i32_1 = arith.constant 0 : i32
    return %c0_i32, %c0_i32_0 : i32, i32
  }
  func.func @transform_18(%arg0: i32) -> (i32, i32) {
    %c0_i32 = arith.constant 0 : i32
    %c0_i32_0 = arith.constant 0 : i32
    return %arg0, %c0_i32 : i32, i32
  }
}

</mosaic_0001>

<bundles_post_ra>
// kernel: tpu_custom_call.1
= control target key start
LH: loop header
LB: loop body
LE: loop exit
PB: predicated region body
PF: predicated region fallthrough
CT: control target
= control target key end

     0   :  { %s6778_s0 = inlined_call_operand.hbm [shape: f32[2,8,64], index: 0, kind: input, shape index: {}]   ;;  %s6779_s1 = inlined_call_operand.hbm [shape: f32[2,1,8], index: 1, kind: input, shape index: {}]   ;;  %s6780_s2 = inlined_call_operand.vmem [shape: f32[2,64,192], index: 2, kind: input, shape index: {}]   ;;  %s6781_s3 = inlined_call_operand.vmem [shape: f32[2,1,192], index: 3, kind: input, shape index: {}]   ;;  %s6782_s4 = inlined_call_operand.hbm [shape: f32[2,64,64], index: 4, kind: input, shape index: {}]   ;;  %s6783_s5 = inlined_call_operand.vmem [shape: f32[2,1,64], index: 5, kind: input, shape index: {}]   ;;  %s6784_s6 = inlined_call_operand.vmem [shape: f32[2,1,64], index: 6, kind: input, shape index: {}]   ;;  %s6785_s7 = inlined_call_operand.vmem [shape: f32[2,1,64], index: 7, kind: input, shape index: {}]   ;;  %s6786_s8 = inlined_call_operand.vmem [shape: f32[2,64,256], index: 8, kind: input, shape index: {}]   ;;  %s6787_s9 = inlined_call_operand.vmem [shape: f32[2,1,256], index: 9, kind: input, shape index: {}]   ;;  %s6788_s10 = inlined_call_operand.vmem [shape: f32[2,256,64], index: 10, kind: input, shape index: {}]   ;;  %s6789_s11 = inlined_call_operand.vmem [shape: f32[2,1,64], index: 11, kind: input, shape index: {}]   ;;  %s6790_s12 = inlined_call_operand.vmem [shape: f32[2,1,64], index: 12, kind: input, shape index: {}]   ;;  %s6791_s13 = inlined_call_operand.vmem [shape: f32[2,1,64], index: 13, kind: input, shape index: {}]   ;;  %s6792_s14 = inlined_call_operand.hbm [shape: f32[64,128], index: 14, kind: input, shape index: {}]   ;;  %s6793_s15 = inlined_call_operand.vmem [shape: f32[1,128], index: 15, kind: input, shape index: {}]   ;;  %s6794_s16 = inlined_call_operand.vmem [shape: f32[128,256], index: 16, kind: input, shape index: {}]   ;;  %s6795_s17 = inlined_call_operand.vmem [shape: f32[1,256], index: 17, kind: input, shape index: {}]   ;;  %s6796_s18 = inlined_call_operand.hbm [shape: f32[2,256], index: 18, kind: output, shape index: {}]  }
   0x1   :  { %6803 = sst [smem:[#allocation15_spill]] %s6778_s0 }
   0x2   :  { %6804 = sst [smem:[#allocation16_spill]] %s6779_s1 }
   0x3   :  { %6805 = sst [smem:[#allocation17_spill]] %s6780_s2 }
   0x4   :  { %6806 = sst [smem:[#allocation18_spill]] %s6795_s17 }
   0x5   :  { %6807 = sst [smem:[#allocation19_spill]] %s6796_s18 }
   0x6   :  { %23 = vsyncpa [#allocation3], 0 }
   0x7   :  { %24 = vsyncpa [#allocation6], 0 }
   0x8   :  { %25 = vsyncpa [#allocation9], 0 }
   0x9   :  { %26 = vsyncpa [#allocation4], 0  ;;  %s5622_s27 = smov [#allocation5]   ;;  %s6808_s0 = sld [smem:[#allocation16_spill]] }
   0xa   :  { %s44_s28 = sshll.u32 %s5622_s27, 4  ;;  %s45_s28 = int_to_ptr.vmem [resolvable:$true] %s44_s28 }
   0xf   :  { %s5504_s19 = scalar_lea.hbm %s6808_s0, 32 }
  0x10   :  { %p5505_p0 = scmp.ne.s32.totalorder %s6808_s0, %s5504_s19  ;;  %p5508_p1 = scmp.lt.u32.totalorder %s5504_s19, %s6808_s0 }
  0x12   :  { %p5510_p2 = pnand %p5508_p1, %p5505_p0 }
  0x14   :  { %5513 = shalt.err (!%p5510_p2)
}
  0x15   :  { %s5514_s2 = scalar_lea.vmem %s45_s28, 32  ;;  %p5519_p4 = scmp.lt.s32.totalorder %s45_s28, %s45_s28 }
  0x16   :  { %p5515_p3 = scmp.ne.s32.totalorder %s45_s28, %s5514_s2  ;;  %p5520_p5 = scmp.lt.s32.totalorder %s5514_s2, %s5514_s2 }
  0x18   :  { %p5521_p6 = por %p5520_p5, %p5519_p4 }
  0x1a   :  { %p5522_p7 = pnand %p5521_p6, %p5515_p3 }
  0x1c   :  { %5525 = shalt.err (!%p5522_p7)
}
  0x1d   :  { %s6801_s23 = smov 16   ;;  %s5624_s24 = smov 1  }
  0x1e   :  { %50 = dma.hbm_to_vmem [thread:$0]  %s6808_s0, 32, %s45_s28, [#allocation6], %s6801_s23, %s6801_s23, %s5624_s24  }
  0x1f   :  { %s5625_s27 = smov [#allocation2]   ;;  %s6809_s1 = sld [smem:[#allocation15_spill]] }
  0x20   :  { %s32_s29 = sshll.u32 %s5625_s27, 4  ;;  %s33_s29 = int_to_ptr.vmem [resolvable:$true] %s32_s29 }
  0x25   :  { %s5526_s20 = scalar_lea.hbm %s6809_s1, 256 }
  0x26   :  { %p5527_p8 = scmp.ne.s32.totalorder %s6809_s1, %s5526_s20  ;;  %p5530_p9 = scmp.lt.u32.totalorder %s5526_s20, %s6809_s1 }
  0x28   :  { %p5532_p10 = pnand %p5530_p9, %p5527_p8 }
  0x2a   :  { %5535 = shalt.err (!%p5532_p10)
}
  0x2b   :  { %s5536_s17 = scalar_lea.vmem %s33_s29, 256  ;;  %p5541_p12 = scmp.lt.s32.totalorder %s33_s29, %s33_s29 }
  0x2c   :  { %p5537_p11 = scmp.ne.s32.totalorder %s33_s29, %s5536_s17  ;;  %p5542_p13 = scmp.lt.s32.totalorder %s5536_s17, %s5536_s17 }
  0x2e   :  { %p5543_p0 = por %p5542_p13, %p5541_p12 }
  0x30   :  { %p5544_p1 = pnand %p5543_p0, %p5537_p11 }
  0x32   :  { %5547 = shalt.err (!%p5544_p1)
}
  0x33   :  { %s5626_s28 = smov 128   ;;  %s5627_s0 = smov 8  }
  0x34   :  { %38 = dma.hbm_to_vmem [thread:$0]  %s6809_s1, 256, %s33_s29, [#allocation3], %s5626_s28, %s5626_s28, %s5627_s0  }
  0x35   :  { %s5628_s18 = smov [#allocation7]   ;;  %s5629_s27 = smov [#allocation8]  }
  0x36   :  { %s60_s26 = sshll.u32 %s5628_s18, 4  ;;  %s90_s30 = sshll.u32 %s5629_s27, 4  ;;  %s61_s26 = int_to_ptr.vmem [resolvable:$true] %s60_s26  ;;  %s5764_s30 = int_to_ptr.vmem [resolvable:$true] %s90_s30 }
  0x37   :  { %s5548_s20 = scalar_lea.hbm %s6782_s4, 2048 }
  0x38   :  { %p5549_p2 = scmp.ne.s32.totalorder %s6782_s4, %s5548_s20  ;;  %p5552_p3 = scmp.lt.u32.totalorder %s5548_s20, %s6782_s4 }
  0x3a   :  { %p5554_p4 = pnand %p5552_p3, %p5549_p2 }
  0x3c   :  { %5557 = shalt.err (!%p5554_p4)
}
  0x3d   :  { %s5558_s29 = scalar_lea.vmem %s61_s26, 2048  ;;  %p5563_p6 = scmp.lt.s32.totalorder %s61_s26, %s61_s26 }
  0x3e   :  { %p5559_p5 = scmp.ne.s32.totalorder %s61_s26, %s5558_s29  ;;  %p5564_p7 = scmp.lt.s32.totalorder %s5558_s29, %s5558_s29 }
  0x40   :  { %p5565_p8 = por %p5564_p7, %p5563_p6 }
  0x42   :  { %p5566_p9 = pnand %p5565_p8, %p5559_p5 }
  0x44   :  { %5569 = shalt.err (!%p5566_p9)
}
  0x45   :  { %66 = dma.hbm_to_vmem [thread:$0]  %s6782_s4, 2048, %s61_s26, [#allocation6], %s5626_s28, %s5626_s28, %s5627_s0  }
  0x46   :  { %s5570_s23 = scalar_lea.hbm %s6792_s14, 1024 }
  0x47   :  { %p5571_p10 = scmp.ne.s32.totalorder %s6792_s14, %s5570_s23  ;;  %p5574_p11 = scmp.lt.u32.totalorder %s5570_s23, %s6792_s14 }
  0x49   :  { %p5576_p12 = pnand %p5574_p11, %p5571_p10 }
  0x4b   :  { %5579 = shalt.err (!%p5576_p12)
}
  0x4c   :  { %s5580_s21 = scalar_lea.vmem %s5764_s30, 1024  ;;  %p5585_p0 = scmp.lt.s32.totalorder %s5764_s30, %s5764_s30 }
  0x4d   :  { %p5581_p13 = scmp.ne.s32.totalorder %s5764_s30, %s5580_s21  ;;  %p5586_p1 = scmp.lt.s32.totalorder %s5580_s21, %s5580_s21 }
  0x4f   :  { %p5587_p2 = por %p5586_p1, %p5585_p0 }
  0x51   :  { %p5588_p3 = pnand %p5587_p2, %p5581_p13 }
  0x53   :  { %5591 = shalt.err (!%p5588_p3)
}
  0x54   :  { %96 = dma.hbm_to_vmem [thread:$0]  %s6792_s14, 1024, %s5764_s30, [#allocation9], %s5626_s28, %s5626_s28, %s5627_s0  }
  0x55   :  { %5614 = dma.done.wait [#allocation3], 256  }
  0x56   :  { %5615 = vsyncadd [#allocation3], 4294967040 }
  0x57   :  { %5616 = dma.done.wait [#allocation6], 2080  }
  0x58   :  { %5617 = vsyncadd [#allocation6], 4294965216 }
  0x59   :  { %5618 = dma.done.wait [#allocation9], 1024  }
  0x5a   :  { %5619 = vsyncadd [#allocation9], 4294966272  ;;  %v5630_v0 = vmov 0.0   ;;  %s6810_s29 = sld [smem:[#allocation17_spill]]  ;;  %v5851_v25 = vld [vmem:[#allocation2] sm:$0xff]  ;;  %vm149_vm0 = vcmask 523264   ;;  %v139_v27 = vlaneseq }
  0x5b   :  { %220 = vmatprep.mubr.f32.mxu0 %v5630_v0  ;;  %4955 = vmatprep.subr.mxu1 %v5630_v0  ;;  %v5857_v26 = vld [vmem:[#allocation2 + $0x8] sm:$0xff]  ;;  %vm5631_vm1 = vmmov 0   ;;  %v137_v30 = vld [vmem:[%s6781_s3] sm:$0x3]  ;;  %s5632_s4 = smov 64   ;;  %s5633_s26 = smov 48  }
  0x5c   :  { %v140_v28 = vshrl.u32 %v139_v27, 7  ;;  %4957 = vmatprep.mubr.msk.f32.mxu1 %vm5631_vm1, %v5630_v0  ;;  %s5634_s22 = smov 112   ;;  %vm244_vm2 = vcmask 130048   ;;  %v115_v46 = vld [vmem:[#allocation5] sm:$0x1]  ;;  %vm412_vm3 = vcmask 64512  }
  0x5d   :  { %v117_v47 = vmul.f32 -1e+09, %v115_v46  ;;  %v116_v48 = vld [vmem:[#allocation5 + $0x1] sm:$0x1]  ;;  %s5635_s2 = smov 96   ;;  %s5636_s1 = smov 32  }
  0x5e   :  { %v5865_v29 = vsub.s32 0, %v140_v28  ;;  %v5871_v33 = vsub.s32 1, %v140_v28  ;;  %v118_v50 = vmul.f32 -1e+09, %v116_v48  ;;  %s6811_s24 = smov 16   ;;  %s5637_s14 = smov 80  }
  0x5f   :  { %vm4397_vm4 = vcmask 1041409  }
  0x60   :  { %v122_v1 = vld [vmem:[%s6810_s29 + $0x8] sm:$0xff]  ;;  %v124_v2 = vld [vmem:[%s6810_s29 + $0x18] sm:$0xff]  ;;  %v121_v3 = vld [vmem:[%s6810_s29] sm:$0xff]  ;;  %v142_v31 = vrot.slane %v137_v30, %v5865_v29  ;;  %v146_v36 = vrot.slane %v137_v30, %v5871_v33  ;;  %v5910_v49 = vrot.slane %v117_v47, %v5865_v29  ;;  %v5914_v55 = vrot.slane %v118_v50, %v5865_v29 }
  0x61   :  { %v5190_v4 = vpack.c.bf16 %v124_v2, %v122_v1  ;;  %v123_v5 = vld [vmem:[%s6810_s29 + $0x10] sm:$0xff]  ;;  %v126_v6 = vld [vmem:[%s6810_s29 + $0x28] sm:$0xff]  ;;  %v128_v7 = vld [vmem:[%s6810_s29 + $0x38] sm:$0xff] }
  0x62   :  { %v5192_v8 = vpack.c.bf16 %v123_v5, %v121_v3  ;;  %v5194_v9 = vpack.c.bf16 %v128_v7, %v126_v6  ;;  %v125_v10 = vld [vmem:[%s6810_s29 + $0x20] sm:$0xff]  ;;  %v127_v11 = vld [vmem:[%s6810_s29 + $0x30] sm:$0xff]  ;;  %v130_v12 = vld [vmem:[%s6810_s29 + $0x48] sm:$0xff] }
  0x63   :  { %5191 = vmatprep.subr.bf16.mxu0 %v5190_v4  ;;  %v132_v13 = vld [vmem:[%s6810_s29 + $0x58] sm:$0xff]  ;;  %v5196_v14 = vpack.c.bf16 %v127_v11, %v125_v10  ;;  %v129_v16 = vld [vmem:[%s6810_s29 + $0x40] sm:$0xff]  ;;  %v131_v17 = vld [vmem:[%s6810_s29 + $0x50] sm:$0xff] }
  0x64   :  { %5193 = vmatpush1.bf16.msra.mxu0 %v5192_v8  ;;  %v5198_v15 = vpack.c.bf16 %v132_v13, %v130_v12  ;;  %v134_v18 = vld [vmem:[%s6810_s29 + $0x68] sm:$0xff]  ;;  %v136_v19 = vld [vmem:[%s6810_s29 + $0x78] sm:$0xff]  ;;  %v5200_v20 = vpack.c.bf16 %v131_v17, %v129_v16  ;;  %v133_v22 = vld [vmem:[%s6810_s29 + $0x60] sm:$0xff] }
  0x65   :  { %5195 = vmatprep.subr.bf16.mxu0 %v5194_v9  ;;  %v5202_v21 = vpack.c.bf16 %v136_v19, %v134_v18  ;;  %v135_v23 = vld [vmem:[%s6810_s29 + $0x70] sm:$0xff] }
  0x66   :  { %v5204_v24 = vpack.c.bf16 %v135_v23, %v133_v22 }
  0x68   :  { %5197 = vmatpush1.bf16.msra.mxu0 %v5196_v14 }
  0x69   :  { %5199 = vmatprep.subr.bf16.mxu0 %v5198_v15 }
  0x6c   :  { %5201 = vmatpush1.bf16.msra.mxu0 %v5200_v20 }
  0x6d   :  { %5203 = vmatprep.subr.bf16.mxu0 %v5202_v21 }
  0x70   :  { %5205 = vmatpush1.bf16.msra.mxu0 %v5204_v24 }
  0x71   :  { %4980 = vmatprep.subr.mxu0 %v5630_v0 }
  0x73   :  { %4615 = vmatmul.mubr.msk.f32.vlgmr.msra.gmra.mrb[0].mxu0 %vm149_vm0, %v5851_v25 }
  0x74   :  { %226 = vmatprep.mubr.f32.mxu0 %v5630_v0 }
  0x77   :  { %4616 = vmatmul.mubr.msk.f32.gmra.mrb[2].mxu0 %vm149_vm0, %v5857_v26 }
  0x78   :  { %4982 = vmatprep.mubr.msk.f32.mxu0 %vm5631_vm1, %v5630_v0 }
 0x146   :  { %v222_v32 = vpop.f32.mrb[0].mxu0 }
 0x147   :  { %v5873_v34 = vadd.f32 %v222_v32, %v142_v31  ;;  %v224_v35 = vpop.f32.mrb[1].mxu0 }
 0x148   :  { %v5897_v44 = vadd.f32 %v224_v35, %v146_v36 }
 0x149   :  { %242 = vrot.lane.b32.xlu0 %v5873_v34, %s5632_s4 }
 0x14a   :  { %v228_v37 = vpop.f32.mrb[2].mxu0 }
 0x14b   :  { %v5878_v38 = vadd.f32 %v228_v37, %v142_v31  ;;  %v230_v39 = vpop.f32.mrb[3].mxu0 }
 0x14c   :  { %v5880_v40 = vadd.f32 %v230_v39, %v146_v36 }
 0x14d   :  { %661 = vrot.lane.b32.xlu1 %v5878_v38, %s5633_s26  ;;  %320 = vrot.lane.b32.xlu0 %v5878_v38, %s5632_s4 }
 0x151   :  { %659 = vrot.lane.b32.xlu1 %v5878_v38, %s5634_s22 }
 0x1bb   :  { %v243_v41 = vpop.permute.xlu0 %242 }
 0x1bc   :  { %4956 = vmatpush3.xpose.msk.msra.mxu1 %vm244_vm2, %v243_v41 }
 0x1bd   :  { %4960 = vmatprep.subr.mxu1 %v5630_v0 }
 0x1bf   :  { %v662_v42 = vpop.permute.xlu1 %661  ;;  %4958 = vmatmul.mubr.msk.f32.vlgmr.msra.gmra.mrb[0].mxu1 %vm244_vm2, %v5873_v34  ;;  %v321_v43 = vpop.permute.xlu0 %320 }
 0x1c0   :  { %4961 = vmatpush3.xpose.msk.msra.mxu1 %vm244_vm2, %v321_v43  ;;  %4981 = vmatpush3.xpose.msk.msra.mxu0 %vm244_vm2, %v662_v42 }
 0x1c1   :  { %4962 = vmatprep.mubr.msk.f32.mxu1 %vm5631_vm1, %v5630_v0  ;;  %4965 = vmatprep.subr.mxu1 %v5630_v0 }
 0x1c2   :  { %4990 = vmatprep.subr.mxu0 %v5630_v0 }
 0x1c3   :  { %v660_v45 = vpop.permute.xlu1 %659  ;;  %4963 = vmatmul.mubr.msk.f32.vlgmr.msra.gmra.mrb[2].mxu1 %vm244_vm2, %v5878_v38 }
 0x1c4   :  { %4966 = vmatpush3.msra.mxu1 %v5897_v44  ;;  %4983 = vmatmul.mubr.msk.f32.vlgmr.msra.gmra.mrb[4].mxu0 %vm244_vm2, %v660_v45 }
 0x1c5   :  { %4967 = vmatprep.mubr.msk.f32.mxu1 %vm5631_vm1, %v5630_v0  ;;  %4970 = vmatprep.subr.mxu1 %v5630_v0 }
 0x1c6   :  { %4992 = vmatprep.mubr.msk.f32.mxu0 %vm5631_vm1, %v5630_v0 }
 0x292   :  { %v315_v51 = vpop.f32.mrb[0].mxu1 }
 0x293   :  { %v396_v52 = vmul.f32 0.25, %v315_v51  ;;  %v4959_v53 = vpop.f32.mrb[1].mxu1 }
 0x295   :  { %v410_v54 = vadd.f32 %v5910_v49, %v396_v52 }
 0x296   :  { %v392_v56 = vpop.f32.mrb[2].mxu1 }
 0x297   :  { %v397_v57 = vmul.f32 0.25, %v392_v56  ;;  %v4964_v58 = vpop.f32.mrb[3].mxu1  ;;  %v733_v59 = vpop.f32.mrb[4].mxu0  ;;  %v413_v60 = vsel %vm412_vm3, %v410_v54, -inf }
 0x298   :  { %v4984_v61 = vpop.f32.mrb[5].mxu0  ;;  %414 = vmax.xlane.f32.xlu0 %v413_v60  ;;  %v738_v1 = vmul.f32 0.25, %v733_v59 }
 0x299   :  { %v411_v62 = vadd.f32 %v5914_v55, %v397_v57 }
 0x29a   :  { %v740_v2 = vadd.f32 %v738_v1, %v5914_v55 }
 0x29b   :  { %v416_v63 = vsel %vm412_vm3, %v411_v62, -inf }
 0x29c   :  { %417 = vmax.xlane.f32.xlu1 %v416_v63  ;;  %v744_v3 = vsel %vm412_vm3, %v740_v2, -inf }
 0x2ad   :  { %583 = vrot.lane.b32.xlu1 %v5873_v34, %s5633_s26 }
 0x2d1   :  { %745 = vmax.xlane.f32.xlu1 %v744_v3 }
 0x2e2   :  { %841 = vrot.lane.b32.xlu1 %v5880_v40, %s5634_s22 }
 0x2e6   :  { %1079 = vrot.lane.b32.xlu1 %v5873_v34, %s5635_s2 }
 0x2ea   :  { %1159 = vrot.lane.b32.xlu1 %v5878_v38, %s5636_s1 }
 0x325   :  { %v415_v4 = vpop.xlane.xlu0 %414 }
 0x326   :  { %v419_v5 = vsub.f32 %v410_v54, %v415_v4 }
 0x328   :  { %v421_v6 = vmul.f32 1.442695, %v419_v5 }
 0x329   :  { %v418_v7 = vpop.xlane.xlu1 %417 }
 0x32a   :  { %5424 = vpow2.f32 %v421_v6  ;;  %v420_v8 = vsub.f32 %v411_v62, %v418_v7 }
 0x32c   :  { %v423_v9 = vmul.f32 1.442695, %v420_v8 }
 0x32d   :  { %v584_v14 = vpop.permute.xlu1 %583 }
 0x32e   :  { %5426 = vpow2.f32 %v423_v9 }
 0x334   :  { %v5425_v10 = vpop.eup %5424 }
 0x335   :  { %v425_v11 = vsel %vm412_vm3, %v5425_v10, 0.0 }
 0x336   :  { %426 = vadd.xlane.f32.xlu0 %v425_v11 }
 0x338   :  { %v5427_v12 = vpop.eup %5426 }
 0x339   :  { %v428_v13 = vsel %vm412_vm3, %v5427_v12, 0.0 }
 0x33a   :  { %429 = vadd.xlane.f32.xlu0 %v428_v13 }
 0x350   :  { %581 = vrot.lane.b32.xlu0 %v5873_v34, %s5634_s22 }
 0x35e   :  { %v746_v15 = vpop.xlane.xlu1 %745 }
 0x35f   :  { %v748_v16 = vsub.f32 %v740_v2, %v746_v15 }
 0x361   :  { %v751_v17 = vmul.f32 1.442695, %v748_v16 }
 0x362   :  { %v842_v18 = vpop.permute.xlu1 %841 }
 0x363   :  { %5428 = vpow2.f32 %v751_v17  ;;  %4991 = vmatpush3.msra.mxu0 %v842_v18  ;;  %v235_v18 = vld [vmem:[#allocation7 + $0x10] sm:$0xff] }
 0x364   :  { %5009 = vmatprep.subr.mxu0 %v5630_v0 }
 0x366   :  { %v1080_v35 = vpop.permute.xlu1 %1079 }
 0x36a   :  { %v1160_v39 = vpop.permute.xlu1 %1159 }
 0x36d   :  { %v5429_v19 = vpop.eup %5428 }
 0x36e   :  { %v756_v20 = vsel %vm412_vm3, %v5429_v19, 0.0 }
 0x36f   :  { %757 = vadd.xlane.f32.xlu0 %v756_v20 }
 0x385   :  { %1081 = vrot.lane.b32.xlu0 %v5873_v34, %s5636_s1 }
 0x389   :  { %1157 = vrot.lane.b32.xlu0 %v5878_v38, %s5635_s2 }
 0x3c3   :  { %v427_v21 = vpop.xlane.xlu0 %426 }
 0x3c4   :  { %5430 = vrcp.f32 %v427_v21 }
 0x3c7   :  { %v430_v22 = vpop.xlane.xlu0 %429 }
 0x3c8   :  { %5432 = vrcp.f32 %v430_v22 }
 0x3cb   :  { %v582_v30 = vpop.permute.xlu0 %581 }
 0x3ce   :  { %v5431_v23 = vpop.eup %5430 }
 0x3cf   :  { %v433_v24 = vmul.f32 %v5431_v23, %v5425_v10 }
 0x3d1   :  { %4968 = vmatmul.mubr.msk.f32.vlgmr.msra.gmra.mrb[4].mxu1 %vm412_vm3, %v433_v24 }
 0x3d2   :  { %v5433_v27 = vpop.eup %5432  ;;  %4971 = vmatpush3.msra.mxu1 %v5880_v40  ;;  %4972 = vmatprep.mubr.msk.f32.mxu1 %vm5631_vm1, %v5630_v0 }
 0x3d3   :  { %v434_v28 = vmul.f32 %v5433_v27, %v5427_v12  ;;  %4975 = vmatprep.subr.mxu1 %v5630_v0 }
 0x3d5   :  { %4973 = vmatmul.mubr.msk.f32.vlgmr.msra.gmra.mrb[6].mxu1 %vm412_vm3, %v434_v28 }
 0x3d6   :  { %4977 = vmatprep.mubr.msk.f32.mxu1 %vm5631_vm1, %v5630_v0 }
 0x3d9   :  { %4976 = vmatpush3.xpose.msk.msra.mxu1 %vm244_vm2, %v584_v14 }
 0x3da   :  { %4985 = vmatprep.subr.mxu1 %v5630_v0 }
 0x3dc   :  { %4978 = vmatmul.mubr.msk.f32.vlgmr.msra.gmra.mrb[8].mxu1 %vm244_vm2, %v582_v30 }
 0x3dd   :  { %4987 = vmatprep.mubr.msk.f32.mxu1 %vm5631_vm1, %v5630_v0 }
 0x3fc   :  { %v758_v31 = vpop.xlane.xlu0 %757 }
 0x3fd   :  { %5434 = vrcp.f32 %v758_v31 }
 0x400   :  { %v1082_v37 = vpop.permute.xlu0 %1081 }
 0x404   :  { %v1158_v41 = vpop.permute.xlu0 %1157 }
 0x407   :  { %v5435_v32 = vpop.eup %5434 }
 0x408   :  { %v762_v36 = vmul.f32 %v5435_v32, %v5429_v19  ;;  %v236_v19 = vld [vmem:[#allocation7 + $0x18] sm:$0xff] }
 0x409   :  { %v5206_v20 = vpack.c.bf16 %v236_v19, %v235_v18  ;;  %v240_v18 = vld [vmem:[#allocation7 + $0x38] sm:$0xff] }
 0x40a   :  { %4993 = vmatmul.mubr.msk.f32.vlgmr.msra.gmra.mrb[6].mxu0 %vm412_vm3, %v762_v36  ;;  %v233_v36 = vld [vmem:[#allocation7] sm:$0xff] }
 0x40b   :  { %5010 = vmatpush3.xpose.msk.msra.mxu0 %vm244_vm2, %v1082_v37  ;;  %5011 = vmatprep.mubr.msk.f32.mxu0 %vm5631_vm1, %v5630_v0  ;;  %v234_v37 = vld [vmem:[#allocation7 + $0x8] sm:$0xff] }
 0x40c   :  { %5014 = vmatprep.subr.mxu0 %v5630_v0 }
 0x40e   :  { %5012 = vmatmul.mubr.msk.f32.vlgmr.msra.gmra.mrb[8].mxu0 %vm244_vm2, %v1080_v35 }
 0x40f   :  { %5015 = vmatpush3.xpose.msk.msra.mxu0 %vm244_vm2, %v1160_v39  ;;  %5016 = vmatprep.mubr.msk.f32.mxu0 %vm5631_vm1, %v5630_v0  ;;  %v5210_v39 = vpack.c.bf16 %v234_v37, %v233_v36 }
 0x410   :  { %5024 = vmatprep.subr.mxu0 %v5630_v0 }
 0x412   :  { %5017 = vmatmul.mubr.msk.f32.vlgmr.msra.gmra.mrb[10].mxu0 %vm244_vm2, %v1158_v41 }
 0x413   :  { %5026 = vmatprep.mubr.msk.f32.mxu0 %vm5631_vm1, %v5630_v0 }
 0x4a4   :  { %v5965_v42 = vpop.f32.mrb[4].mxu1 }
 0x4a5   :  { %v4969_v43 = vpop.f32.mrb[5].mxu1 }
 0x4a8   :  { %v5967_v45 = vpop.f32.mrb[6].mxu1 }
 0x4a9   :  { %v4974_v46 = vpop.f32.mrb[7].mxu1 }
 0x4af   :  { %v655_v47 = vpop.f32.mrb[8].mxu1 }
 0x4b0   :  { %v737_v48 = vmul.f32 0.25, %v655_v47  ;;  %v4979_v50 = vpop.f32.mrb[9].mxu1 }
 0x4b2   :  { %v739_v51 = vadd.f32 %v737_v48, %v5910_v49 }
 0x4b4   :  { %v741_v52 = vsel %vm412_vm3, %v739_v51, -inf }
 0x4b5   :  { %742 = vmax.xlane.f32.xlu1 %v741_v52 }
 0x4dd   :  { %v5971_v53 = vpop.f32.mrb[6].mxu0 }
 0x4de   :  { %v4994_v54 = vpop.f32.mrb[7].mxu0 }
 0x4e1   :  { %v1153_v56 = vpop.f32.mrb[8].mxu0 }
 0x4e2   :  { %v1235_v57 = vmul.f32 0.25, %v1153_v56  ;;  %v5013_v58 = vpop.f32.mrb[9].mxu0 }
 0x4e3   :  { %v238_v58 = vld [vmem:[#allocation7 + $0x28] sm:$0xff] }
 0x4e4   :  { %v1237_v59 = vadd.f32 %v1235_v57, %v5910_v49  ;;  %v237_v57 = vld [vmem:[#allocation7 + $0x20] sm:$0xff] }
 0x4e5   :  { %v1231_v60 = vpop.f32.mrb[10].mxu0 }
 0x4e6   :  { %v1236_v61 = vmul.f32 0.25, %v1231_v60  ;;  %v5018_v62 = vpop.f32.mrb[11].mxu0  ;;  %v1239_v63 = vsel %vm412_vm3, %v1237_v59, -inf }
 0x4e7   :  { %1240 = vmax.xlane.f32.xlu1 %v1239_v63 }
 0x4e8   :  { %v1238_v1 = vadd.f32 %v1236_v61, %v5914_v55 }
 0x4ea   :  { %v1242_v2 = vsel %vm412_vm3, %v1238_v1, -inf }
 0x4eb   :  { %1243 = vmax.xlane.f32.xlu1 %v1242_v2 }
 0x542   :  { %v743_v3 = vpop.xlane.xlu1 %742 }
 0x543   :  { %v747_v4 = vsub.f32 %v739_v51, %v743_v3 }
 0x545   :  { %v749_v5 = vmul.f32 1.442695, %v747_v4 }
 0x547   :  { %5436 = vpow2.f32 %v749_v5 }
 0x551   :  { %v5437_v6 = vpop.eup %5436 }
 0x552   :  { %v753_v7 = vsel %vm412_vm3, %v5437_v6, 0.0 }
 0x553   :  { %754 = vadd.xlane.f32.xlu0 %v753_v7 }
 0x569   :  { %764 = vrot.lane.b32.xlu0 %v5897_v44, %s5634_s22 }
 0x56d   :  { %1337 = vrot.lane.b32.xlu0 %v5880_v40, %s5635_s2 }
 0x571   :  { %1498 = vrot.lane.b32.xlu0 %v5873_v34, %s6811_s24 }
 0x574   :  { %v1241_v8 = vpop.xlane.xlu1 %1240 }
 0x575   :  { %1576 = vrot.lane.b32.xlu0 %v5878_v38, %s6811_s24  ;;  %v1245_v9 = vsub.f32 %v1237_v59, %v1241_v8 }
 0x577   :  { %v1247_v10 = vmul.f32 1.442695, %v1245_v9 }
 0x578   :  { %v1244_v11 = vpop.xlane.xlu1 %1243 }
 0x579   :  { %5438 = vpow2.f32 %v1247_v10  ;;  %1496 = vrot.lane.b32.xlu0 %v5873_v34, %s5637_s14  ;;  %v1246_v12 = vsub.f32 %v1238_v1, %v1244_v11 }
 0x57b   :  { %v1249_v13 = vmul.f32 1.442695, %v1246_v12 }
 0x57d   :  { %5440 = vpow2.f32 %v1249_v13 }
 0x583   :  { %v5439_v14 = vpop.eup %5438 }
 0x584   :  { %v1251_v15 = vsel %vm412_vm3, %v5439_v14, 0.0 }
 0x585   :  { %1252 = vadd.xlane.f32.xlu1 %v1251_v15 }
 0x587   :  { %v5441_v16 = vpop.eup %5440 }
 0x588   :  { %v1254_v17 = vsel %vm412_vm3, %v5441_v16, 0.0 }
 0x589   :  { %1255 = vadd.xlane.f32.xlu1 %v1254_v17 }
 0x59a   :  { %1261 = vrot.lane.b32.xlu1 %v5897_v44, %s5635_s2 }
 0x59e   :  { %1574 = vrot.lane.b32.xlu1 %v5878_v38, %s5637_s14 }
 0x5e0   :  { %v755_v34 = vpop.xlane.xlu0 %754 }
 0x5e1   :  { %5442 = vrcp.f32 %v755_v34 }
 0x5e4   :  { %v765_v21 = vpop.permute.xlu0 %764 }
 0x5e5   :  { %4986 = vmatpush3.msra.mxu1 %v765_v21 }
 0x5e6   :  { %5207 = vmatprep.subr.bf16.mxu1 %v5206_v20 }
 0x5e8   :  { %v1338_v22 = vpop.permute.xlu0 %1337 }
 0x5e9   :  { %5025 = vmatpush3.msra.mxu0 %v1338_v22 }
 0x5ea   :  { %5036 = vmatprep.subr.mxu0 %v5630_v0 }
 0x5eb   :  { %v5443_v23 = vpop.eup %5442 }
 0x5ec   :  { %v761_v24 = vmul.f32 %v5443_v23, %v5437_v6  ;;  %v1499_v38 = vpop.permute.xlu0 %1498 }
 0x5ee   :  { %4988 = vmatmul.mubr.msk.f32.vlgmr.msra.gmra.mrb[10].mxu1 %vm412_vm3, %v761_v24 }
 0x5ef   :  { %5209 = vmatpush3.bf16.msra.mxu1 %v5206_v20 }
 0x5f0   :  { %v1577_v31 = vpop.permute.xlu0 %1576  ;;  %5211 = vmatprep.subr.bf16.mxu1 %v5210_v39 }
 0x5f4   :  { %v1497_v35 = vpop.permute.xlu0 %1496 }
 0x612   :  { %v1253_v27 = vpop.xlane.xlu1 %1252 }
 0x616   :  { %v1256_v28 = vpop.xlane.xlu1 %1255 }
 0x617   :  { %5444 = vrcp.f32 %v1256_v28 }
 0x618   :  { %5446 = vrcp.f32 %v1253_v27 }
 0x61a   :  { %v1262_v47 = vpop.permute.xlu1 %1261 }
 0x61e   :  { %v1575_v3 = vpop.permute.xlu1 %1574 }
 0x621   :  { %v5445_v30 = vpop.eup %5444 }
 0x622   :  { %v1260_v32 = vmul.f32 %v5445_v30, %v5441_v16  ;;  %v5447_v46 = vpop.eup %5446 }
 0x623   :  { %v1259_v48 = vmul.f32 %v5447_v46, %v5439_v14 }
 0x624   :  { %5027 = vmatmul.mubr.msk.f32.vlgmr.msra.gmra.mrb[12].mxu0 %vm412_vm3, %v1260_v32 }
 0x625   :  { %5037 = vmatpush3.xpose.msk.msra.mxu0 %vm244_vm2, %v1499_v38  ;;  %5038 = vmatprep.mubr.msk.f32.mxu0 %vm5631_vm1, %v5630_v0 }
 0x626   :  { %5046 = vmatprep.subr.mxu0 %v5630_v0 }
 0x628   :  { %5039 = vmatmul.mubr.msk.f32.vlgmr.msra.gmra.mrb[14].mxu0 %vm244_vm2, %v1497_v35 }
 0x629   :  { %5048 = vmatprep.mubr.msk.f32.mxu0 %vm5631_vm1, %v5630_v0 }
 0x6c1   :  { %v836_v41 = vpop.f32.mrb[10].mxu1 }
 0x6c2   :  { %v4989_v43 = vpop.f32.mrb[11].mxu1  ;;  %4999 = vmatprep.mubr.msk.f32.mxu1 %vm244_vm2, %v836_v41 }
 0x6c3   :  { %5000 = vmatmul.mubr.msk.f32.vlgmr.msra.gmra.mrb[12].mxu1 %vm244_vm2, %v5971_v53 }
 0x6c4   :  { %5006 = vmatprep.mubr.msk.f32.mxu1 %vm244_vm2, %v5965_v42  ;;  %5213 = vmatpush3.bf16.msra.mxu1 %v5210_v39 }
 0x6c5   :  { %5019 = vmatprep.subr.mxu1 %v5630_v0 }
 0x6cb   :  { %5007 = vmatmul.mubr.msk.f32.vlgmr.msra.gmra.mrb[12].mxu1 %vm244_vm2, %v5967_v45  ;;  %v5214_v45 = vpack.c.bf16 %v238_v58, %v237_v57  ;;  %v1971_v57 = vld [vmem:[%s6786_s8 + $0x10] sm:$0xff] }
 0x6cc   :  { %5020 = vmatpush3.msra.mxu1 %v1262_v47  ;;  %5021 = vmatprep.mubr.msk.f32.mxu1 %vm5631_vm1, %v5630_v0 }
 0x6cd   :  { %5215 = vmatprep.subr.bf16.mxu1 %v5214_v45 }
 0x6cf   :  { %5022 = vmatmul.mubr.msk.f32.vlgmr.msra.gmra.mrb[14].mxu1 %vm412_vm3, %v1259_v48 }
 0x6d0   :  { %5217 = vmatpush3.bf16.msra.mxu1 %v5214_v45  ;;  %v1974_v45 = vld [vmem:[%s6786_s8 + $0x28] sm:$0xff] }
 0x6d1   :  { %5041 = vmatprep.subr.mxu1 %v5630_v0 }
 0x6f7   :  { %v1409_v50 = vpop.f32.mrb[12].mxu0 }
 0x6f8   :  { %v5028_v51 = vpop.f32.mrb[13].mxu0 }
 0x6fb   :  { %v1570_v52 = vpop.f32.mrb[14].mxu0 }
 0x6fc   :  { %v1652_v53 = vmul.f32 0.25, %v1570_v52  ;;  %v5040_v42 = vpop.f32.mrb[15].mxu0 }
 0x6fd   :  { %v1972_v42 = vld [vmem:[%s6786_s8 + $0x18] sm:$0xff] }
 0x6fe   :  { %v1654_v54 = vadd.f32 %v1652_v53, %v5910_v49  ;;  %v1970_v53 = vld [vmem:[%s6786_s8 + $0x8] sm:$0xff] }
 0x700   :  { %v1656_v56 = vsel %vm412_vm3, %v1654_v54, -inf }
 0x701   :  { %1657 = vmax.xlane.f32.xlu0 %v1656_v56  ;;  %v1969_v56 = vld [vmem:[%s6786_s8] sm:$0xff] }
 0x702   :  { %v5224_v58 = vpack.c.bf16 %v1971_v57, %v1969_v56  ;;  %v2113_v56 = vld [vmem:[%s6788_s10 + $0xe8] sm:$0xff] }
 0x78e   :  { %v1658_v59 = vpop.xlane.xlu0 %1657 }
 0x78f   :  { %v1662_v60 = vsub.f32 %v1654_v54, %v1658_v59  ;;  %v5222_v54 = vpack.c.bf16 %v1972_v42, %v1970_v53  ;;  %v1976_v59 = vld [vmem:[%s6786_s8 + $0x38] sm:$0xff]  ;;  %v2094_v53 = vld [vmem:[%s6788_s10 + $0x50] sm:$0xff] }
 0x790   :  { %v2095_v42 = vld [vmem:[%s6788_s10 + $0x58] sm:$0xff] }
 0x791   :  { %v1664_v61 = vmul.f32 1.442695, %v1662_v60  ;;  %v5226_v60 = vpack.c.bf16 %v1976_v59, %v1974_v45  ;;  %v5260_v57 = vpack.c.bf16 %v2095_v42, %v2094_v53 }
 0x793   :  { %5448 = vpow2.f32 %v1664_v61  ;;  %v1973_v61 = vld [vmem:[%s6786_s8 + $0x20] sm:$0xff] }
 0x79d   :  { %v5449_v62 = vpop.eup %5448 }
 0x79e   :  { %v1668_v63 = vsel %vm412_vm3, %v5449_v62, 0.0 }
 0x79f   :  { %1669 = vadd.xlane.f32.xlu0 %v1668_v63 }
 0x7a2   :  { %v1333_v1 = vpop.f32.mrb[14].mxu1 }
 0x7a3   :  { %v5023_v2 = vpop.f32.mrb[15].mxu1  ;;  %5033 = vmatprep.mubr.msk.f32.mxu1 %vm244_vm2, %v1333_v1  ;;  %v1978_v1 = vld [vmem:[%s6786_s8 + $0x48] sm:$0xff] }
 0x7a4   :  { %5034 = vmatmul.mubr.msk.f32.vlgmr.msra.gmra.mrb[12].mxu1 %vm244_vm2, %v1409_v50  ;;  %v1980_v2 = vld [vmem:[%s6786_s8 + $0x58] sm:$0xff] }
 0x7a5   :  { %5042 = vmatpush3.xpose.msk.msra.mxu1 %vm244_vm2, %v1577_v31  ;;  %5043 = vmatprep.mubr.msk.f32.mxu1 %vm5631_vm1, %v5630_v0 }
 0x7a6   :  { %5051 = vmatprep.subr.mxu1 %v5630_v0 }
 0x7a8   :  { %5044 = vmatmul.mubr.msk.f32.vlgmr.msra.gmra.mrb[16].mxu1 %vm244_vm2, %v1575_v3  ;;  %v5230_v3 = vpack.c.bf16 %v1980_v2, %v1978_v1 }
 0x7a9   :  { %5053 = vmatprep.mubr.msk.f32.mxu1 %vm5631_vm1, %v5630_v0 }
 0x82c   :  { %v1670_v9 = vpop.xlane.xlu0 %1669 }
 0x82d   :  { %5450 = vrcp.f32 %v1670_v9  ;;  %v1981_v9 = vld [vmem:[%s6786_s8 + $0x60] sm:$0xff] }
 0x837   :  { %v5451_v11 = vpop.eup %5450 }
 0x838   :  { %v1676_v14 = vmul.f32 %v5451_v11, %v5449_v62  ;;  %v1975_v62 = vld [vmem:[%s6786_s8 + $0x30] sm:$0xff] }
 0x839   :  { %v5228_v63 = vpack.c.bf16 %v1975_v62, %v1973_v61  ;;  %v1983_v11 = vld [vmem:[%s6786_s8 + $0x70] sm:$0xff] }
 0x87b   :  { %v1648_v4 = vpop.f32.mrb[16].mxu1 }
 0x87c   :  { %v1653_v5 = vmul.f32 0.25, %v1648_v4  ;;  %v5045_v6 = vpop.f32.mrb[17].mxu1  ;;  %v1977_v4 = vld [vmem:[%s6786_s8 + $0x40] sm:$0xff] }
 0x87e   :  { %v1655_v7 = vadd.f32 %v1653_v5, %v5914_v55  ;;  %v1979_v5 = vld [vmem:[%s6786_s8 + $0x50] sm:$0xff] }
 0x87f   :  { %v5232_v6 = vpack.c.bf16 %v1979_v5, %v1977_v4 }
 0x880   :  { %v1659_v8 = vsel %vm412_vm3, %v1655_v7, -inf }
 0x881   :  { %1660 = vmax.xlane.f32.xlu1 %v1659_v8  ;;  %v1984_v8 = vld [vmem:[%s6786_s8 + $0x78] sm:$0xff] }
 0x892   :  { %1678 = vrot.lane.b32.xlu1 %v5897_v44, %s5637_s14  ;;  %v239_v44 = vld [vmem:[#allocation7 + $0x30] sm:$0xff] }
 0x893   :  { %v5218_v34 = vpack.c.bf16 %v240_v18, %v239_v44  ;;  %v2102_v44 = vld [vmem:[%s6788_s10 + $0x90] sm:$0xff]  ;;  %v2103_v18 = vld [vmem:[%s6788_s10 + $0x98] sm:$0xff] }
 0x90e   :  { %v1661_v10 = vpop.xlane.xlu1 %1660 }
 0x90f   :  { %v1663_v12 = vsub.f32 %v1655_v7, %v1661_v10  ;;  %v1982_v7 = vld [vmem:[%s6786_s8 + $0x68] sm:$0xff] }
 0x910   :  { %v5234_v10 = vpack.c.bf16 %v1984_v8, %v1982_v7 }
 0x911   :  { %v1666_v13 = vmul.f32 1.442695, %v1663_v12  ;;  %v5236_v12 = vpack.c.bf16 %v1983_v11, %v1981_v9 }
 0x912   :  { %v1679_v15 = vpop.permute.xlu1 %1678 }
 0x913   :  { %5452 = vpow2.f32 %v1666_v13  ;;  %5047 = vmatpush3.msra.mxu0 %v1679_v15  ;;  %v2100_v13 = vld [vmem:[%s6788_s10 + $0x80] sm:$0xff] }
 0x914   :  { %5049 = vmatmul.mubr.msk.f32.vlgmr.msra.gmra.mrb[16].mxu0 %vm412_vm3, %v1676_v14  ;;  %5223 = vmatprep.subr.bf16.mxu0 %v5222_v54  ;;  %v2101_v14 = vld [vmem:[%s6788_s10 + $0x88] sm:$0xff]  ;;  %v2084_v15 = vld [vmem:[%s6788_s10] sm:$0xff] }
 0x915   :  { %2067 = vmatprep.mubr.f32.mxu0 %v5630_v0  ;;  %5225 = vmatpush1.bf16.msra.mxu0 %v5224_v58  ;;  %v2112_v54 = vld [vmem:[%s6788_s10 + $0xe0] sm:$0xff] }
 0x916   :  { %5227 = vmatprep.subr.bf16.mxu0 %v5226_v60  ;;  %v5262_v58 = vpack.c.bf16 %v2113_v56, %v2112_v54 }
 0x919   :  { %5229 = vmatpush1.bf16.msra.mxu0 %v5228_v63 }
 0x91a   :  { %5231 = vmatprep.subr.bf16.mxu0 %v5230_v3  ;;  %v4650_v3 = vld [vmem:[%s6784_s6] ss:$0 sm:$0xff] }
 0x91d   :  { %v5453_v16 = vpop.eup %5452  ;;  %5233 = vmatpush1.bf16.msra.mxu0 %v5232_v6  ;;  %v4651_v6 = vld [vmem:[%s6785_s7] ss:$0 sm:$0xff] }
 0x91e   :  { %v1671_v17 = vsel %vm412_vm3, %v5453_v16, 0.0  ;;  %5235 = vmatprep.subr.bf16.mxu0 %v5234_v10 }
 0x91f   :  { %1672 = vadd.xlane.f32.xlu0 %v1671_v17  ;;  %v2085_v17 = vld [vmem:[%s6788_s10 + $0x8] sm:$0xff] }
 0x921   :  { %5237 = vmatpush1.bf16.msra.mxu0 %v5236_v12  ;;  %v2114_v12 = vld [vmem:[%s6788_s10 + $0xf0] sm:$0xff] }
 0x935   :  { %1754 = vrot.lane.b32.xlu0 %v5880_v40, %s5637_s14  ;;  %v4649_v40 = vld [vmem:[%s6783_s5] ss:$0 sm:$0xff] }
 0x9ac   :  { %v1673_v19 = vpop.xlane.xlu0 %1672 }
 0x9ad   :  { %5454 = vrcp.f32 %v1673_v19  ;;  %v5240_v19 = vpack.c.bf16 %v2085_v17, %v2084_v15  ;;  %v2098_v15 = vld [vmem:[%s6788_s10 + $0x70] sm:$0xff] }
 0x9b0   :  { %v1755_v20 = vpop.permute.xlu0 %1754 }
 0x9b1   :  { %5052 = vmatpush3.msra.mxu1 %v1755_v20  ;;  %v2086_v20 = vld [vmem:[%s6788_s10 + $0x10] sm:$0xff] }
 0x9b2   :  { %5219 = vmatprep.subr.bf16.mxu1 %v5218_v34 }
 0x9b7   :  { %v5455_v21 = vpop.eup %5454 }
 0x9b8   :  { %v1677_v22 = vmul.f32 %v5455_v21, %v5453_v16  ;;  %v5238_v16 = vpack.c.bf16 %v2101_v14, %v2100_v13  ;;  %v2087_v21 = vld [vmem:[%s6788_s10 + $0x18] sm:$0xff] }
 0x9b9   :  { %v2115_v13 = vld [vmem:[%s6788_s10 + $0xf8] sm:$0xff] }
 0x9ba   :  { %5054 = vmatmul.mubr.msk.f32.vlgmr.msra.gmra.mrb[18].mxu1 %vm412_vm3, %v1677_v22  ;;  %v2104_v22 = vld [vmem:[%s6788_s10 + $0xa0] sm:$0xff]  ;;  %v5266_v14 = vpack.c.bf16 %v2115_v13, %v2114_v12  ;;  %v4667_v13 = vld [vmem:[%s6810_s29 + $0xd0] sm:$0xff] }
 0x9bb   :  { %5221 = vmatpush3.bf16.msra.mxu1 %v5218_v34  ;;  %v5242_v34 = vpack.c.bf16 %v2103_v18, %v2102_v44  ;;  %v1985_v44 = vld [vmem:[%s6787_s9] sm:$0x3] }
 0x9bc   :  { %5239 = vmatprep.subr.bf16.mxu1 %v5238_v16  ;;  %v2099_v16 = vld [vmem:[%s6788_s10 + $0x78] sm:$0xff]  ;;  %v1990_v18 = vrot.slane %v1985_v44, %v5865_v29  ;;  %v4665_v12 = vld [vmem:[%s6810_s29 + $0xc0] sm:$0xff] }
 0x9bd   :  { %v5268_v17 = vpack.c.bf16 %v2099_v16, %v2098_v15  ;;  %v4670_v15 = vld [vmem:[%s6810_s29 + $0xe8] sm:$0xff]  ;;  %v4672_v16 = vld [vmem:[%s6810_s29 + $0xf8] sm:$0xff] }
 0x9e7   :  { %v1750_v23 = vpop.f32.mrb[16].mxu0 }
 0x9e8   :  { %v5050_v24 = vpop.f32.mrb[17].mxu0  ;;  %5060 = vmatprep.mubr.msk.f32.mxu1 %vm244_vm2, %v1750_v23  ;;  %v2105_v23 = vld [vmem:[%s6788_s10 + $0xa8] sm:$0xff] }
 0x9e9   :  { %v5244_v24 = vpack.c.bf16 %v2087_v21, %v2086_v20 }
 0xa8d   :  { %v1826_v27 = vpop.f32.mrb[18].mxu1 }
 0xa8e   :  { %v5055_v28 = vpop.f32.mrb[19].mxu1  ;;  %5061 = vmatmul.mubr.msk.f32.vlgmr.msra.gmra.mrb[12].mxu1 %vm244_vm2, %v1826_v27  ;;  %v5246_v27 = vpack.c.bf16 %v2105_v23, %v2104_v22 }
 0xa8f   :  { %5241 = vmatpush3.bf16.msra.mxu1 %v5240_v19  ;;  %v2088_v28 = vld [vmem:[%s6788_s10 + $0x20] sm:$0xff]  ;;  %v1994_v19 = vrot.slane %v1985_v44, %v5871_v33 }
 0xa90   :  { %5243 = vmatprep.subr.bf16.mxu1 %v5242_v34  ;;  %v4669_v44 = vld [vmem:[%s6810_s29 + $0xe0] sm:$0xff] }
 0xa93   :  { %5245 = vmatpush3.bf16.msra.mxu1 %v5244_v24 }
 0xa94   :  { %5247 = vmatprep.subr.bf16.mxu1 %v5246_v27 }
 0xb61   :  { %v5062_v38 = vpop.f32.mrb[12].mxu1 }
 0xb62   :  { %v1921_v30 = vadd.f32 %v5062_v38, %v4649_v40  ;;  %v1902_v31 = vpop.f32.mrb[13].mxu1  ;;  %v2106_v38 = vld [vmem:[%s6788_s10 + $0xb0] sm:$0xff] }
 0xb63   :  { %v1920_v32 = vadd.f32 %v4649_v40, %v1902_v31  ;;  %v2089_v40 = vld [vmem:[%s6788_s10 + $0x28] sm:$0xff] }
 0xb64   :  { %v1923_v35 = vadd.f32 %v1921_v30, %v5857_v26  ;;  %v2107_v30 = vld [vmem:[%s6788_s10 + $0xb8] sm:$0xff]  ;;  %v5248_v31 = vpack.c.bf16 %v2089_v40, %v2088_v28 }
 0xb65   :  { %v1922_v36 = vadd.f32 %v1920_v32, %v5851_v25  ;;  %v5250_v32 = vpack.c.bf16 %v2107_v30, %v2106_v38 }
 0xb66   :  { %v1929_v37 = vsel %vm149_vm0, %v1923_v35, 0.0  ;;  %5249 = vmatpush3.bf16.msra.mxu1 %v5248_v31 }
 0xb67   :  { %1930 = vadd.xlane.f32.xlu0 %v1929_v37  ;;  %v1926_v39 = vsel %vm149_vm0, %v1922_v36, 0.0  ;;  %v2108_v37 = vld [vmem:[%s6788_s10 + $0xc0] sm:$0xff]  ;;  %5251 = vmatprep.subr.bf16.mxu1 %v5250_v32 }
 0xb68   :  { %1927 = vadd.xlane.f32.xlu1 %v1926_v39  ;;  %v2109_v39 = vld [vmem:[%s6788_s10 + $0xc8] sm:$0xff] }
 0xbf4   :  { %v1931_v41 = vpop.xlane.xlu0 %1930 }
 0xbf5   :  { %v1934_v43 = vmul.f32 0.015625, %v1931_v41  ;;  %v1928_v46 = vpop.xlane.xlu1 %1927 }
 0xbf6   :  { %v1933_v47 = vmul.f32 0.015625, %v1928_v46  ;;  %v2092_v46 = vld [vmem:[%s6788_s10 + $0x40] sm:$0xff] }
 0xbf7   :  { %v6047_v48 = vsub.f32 %v1923_v35, %v1934_v43  ;;  %v2090_v35 = vld [vmem:[%s6788_s10 + $0x30] sm:$0xff]  ;;  %v5254_v43 = vpack.c.bf16 %v2109_v39, %v2108_v37 }
 0xbf8   :  { %v6049_v50 = vsub.f32 %v1922_v36, %v1933_v47  ;;  %v2091_v36 = vld [vmem:[%s6788_s10 + $0x38] sm:$0xff]  ;;  %v2093_v47 = vld [vmem:[%s6788_s10 + $0x48] sm:$0xff] }
 0xbf9   :  { %v1938_v51 = vmul.f32 %v6047_v48, %v6047_v48  ;;  %v5252_v41 = vpack.c.bf16 %v2091_v36, %v2090_v35  ;;  %v4654_v35 = vld [vmem:[%s6789_s11] ss:$0 sm:$0xff] }
 0xbfa   :  { %v1937_v25 = vmul.f32 %v6049_v50, %v6049_v50 }
 0xbfb   :  { %v1942_v26 = vsel %vm149_vm0, %v1938_v51, 0.0  ;;  %v2110_v51 = vld [vmem:[%s6788_s10 + $0xd0] sm:$0xff]  ;;  %5253 = vmatpush3.bf16.msra.mxu1 %v5252_v41 }
 0xbfc   :  { %1943 = vadd.xlane.f32.xlu0 %v1942_v26  ;;  %v1939_v52 = vsel %vm149_vm0, %v1937_v25, 0.0  ;;  %v2111_v25 = vld [vmem:[%s6788_s10 + $0xd8] sm:$0xff]  ;;  %v5256_v26 = vpack.c.bf16 %v2093_v47, %v2092_v46  ;;  %5255 = vmatprep.subr.bf16.mxu1 %v5254_v43 }
 0xbfd   :  { %1940 = vadd.xlane.f32.xlu1 %v1939_v52  ;;  %v5258_v52 = vpack.c.bf16 %v2111_v25, %v2110_v51 }
 0xbff   :  { %5257 = vmatpush3.bf16.msra.mxu1 %v5256_v26 }
 0xc00   :  { %5259 = vmatprep.subr.bf16.mxu1 %v5258_v52 }
 0xc03   :  { %5261 = vmatpush3.bf16.msra.mxu1 %v5260_v57 }
 0xc04   :  { %5263 = vmatprep.subr.bf16.mxu1 %v5262_v58 }
 0xc89   :  { %v1944_v45 = vpop.xlane.xlu0 %1943 }
 0xc8a   :  { %v1946_v59 = vmul.f32 0.015625, %v1944_v45  ;;  %v1941_v60 = vpop.xlane.xlu1 %1940 }
 0xc8b   :  { %v1945_v61 = vmul.f32 0.015625, %v1941_v60 }
 0xc8c   :  { %v1948_v62 = vadd.f32 1e-05, %v1946_v59 }
 0xc8d   :  { %v1947_v63 = vadd.f32 1e-05, %v1945_v61 }
 0xc8e   :  { %5456 = vrsqrt.f32 %v1948_v62  ;;  %v4658_v62 = vld [vmem:[%s6810_s29 + $0x88] sm:$0xff] }
 0xc8f   :  { %5458 = vrsqrt.f32 %v1947_v63  ;;  %v4660_v63 = vld [vmem:[%s6810_s29 + $0x98] sm:$0xff] }
 0xc98   :  { %v5457_v1 = vpop.eup %5456 }
 0xc99   :  { %v5459_v2 = vpop.eup %5458  ;;  %v1952_v5 = vmul.f32 %v5457_v1, %v6047_v48  ;;  %v2096_v48 = vld [vmem:[%s6788_s10 + $0x60] sm:$0xff]  ;;  %v5270_v1 = vpack.c.bf16 %v4660_v63, %v4658_v62 }
 0xc9a   :  { %v1951_v4 = vmul.f32 %v5459_v2, %v6049_v50  ;;  %v2097_v50 = vld [vmem:[%s6788_s10 + $0x68] sm:$0xff]  ;;  %v4657_v2 = vld [vmem:[%s6810_s29 + $0x80] sm:$0xff] }
 0xc9b   :  { %v1960_v9 = vmul.f32 %v4650_v3, %v1952_v5  ;;  %v5264_v11 = vpack.c.bf16 %v2097_v50, %v2096_v48  ;;  %5271 = vmatprep.subr.bf16.mxu0 %v5270_v1  ;;  %v4662_v5 = vld [vmem:[%s6810_s29 + $0xa8] sm:$0xff]  ;;  %v4668_v50 = vld [vmem:[%s6810_s29 + $0xd8] sm:$0xff] }
 0xc9c   :  { %v1959_v7 = vmul.f32 %v4650_v3, %v1951_v4  ;;  %v4659_v3 = vld [vmem:[%s6810_s29 + $0x90] sm:$0xff]  ;;  %v4666_v48 = vld [vmem:[%s6810_s29 + $0xc8] sm:$0xff] }
 0xc9d   :  { %v1968_v10 = vadd.f32 %v4651_v6, %v1960_v9  ;;  %5265 = vmatpush3.bf16.msra.mxu1 %v5264_v11  ;;  %v5272_v4 = vpack.c.bf16 %v4659_v3, %v4657_v2  ;;  %v4663_v9 = vld [vmem:[%s6810_s29 + $0xb0] sm:$0xff]  ;;  %v5278_v11 = vpack.c.bf16 %v4668_v50, %v4666_v48 }
 0xc9e   :  { %v1967_v8 = vadd.f32 %v4651_v6, %v1959_v7  ;;  %5267 = vmatprep.subr.bf16.mxu1 %v5266_v14  ;;  %v4664_v6 = vld [vmem:[%s6810_s29 + $0xb8] sm:$0xff]  ;;  %v5280_v14 = vpack.c.bf16 %v4667_v13, %v4665_v12 }
 0xc9f   :  { %v5274_v7 = vpack.c.bf16 %v4664_v6, %v4662_v5 }
 0xca0   :  { %4652 = vmatmul.mubr.msk.f32.vlgmr.msra.gmra.mrb[18].mxu0 %vm149_vm0, %v1967_v8 }
 0xca1   :  { %2073 = vmatprep.mubr.f32.mxu0 %v5630_v0  ;;  %5269 = vmatpush3.bf16.msra.mxu1 %v5268_v17  ;;  %v5282_v17 = vpack.c.bf16 %v4672_v16, %v4670_v15 }
 0xca2   :  { %5073 = vmatprep.subr.mxu1 %v5630_v0  ;;  %5273 = vmatpush1.bf16.msra.mxu0 %v5272_v4 }
 0xca3   :  { %5275 = vmatprep.subr.bf16.mxu0 %v5274_v7 }
 0xca4   :  { %4653 = vmatmul.mubr.msk.f32.gmra.mrb[20].mxu0 %vm149_vm0, %v1968_v10 }
 0xca5   :  { %2344 = vmatprep.mubr.f32.mxu0 %v5630_v0 }
 0xd73   :  { %v2069_v34 = vpop.f32.mrb[18].mxu0 }
 0xd74   :  { %v2070_v20 = vadd.f32 %v2069_v34, %v1990_v18  ;;  %v2071_v21 = vpop.f32.mrb[19].mxu0 }
 0xd75   :  { %v2072_v22 = vadd.f32 %v2071_v21, %v1994_v19 }
 0xd76   :  { %v2080_v27 = vmax.f32 %v2070_v20, 0.0 }
 0xd77   :  { %v2081_v23 = vmax.f32 %v2072_v22, 0.0  ;;  %v2075_v24 = vpop.f32.mrb[20].mxu0 }
 0xd78   :  { %v2076_v28 = vadd.f32 %v2075_v24, %v1990_v18  ;;  %v2077_v40 = vpop.f32.mrb[21].mxu0  ;;  %v4671_v18 = vld [vmem:[%s6810_s29 + $0xf0] sm:$0xff] }
 0xd79   :  { %v2078_v38 = vadd.f32 %v2077_v40, %v1994_v19  ;;  %2187 = vmatprep.mubr.f32.mxu1 %v2081_v23  ;;  %v5284_v19 = vpack.c.bf16 %v4671_v18, %v4669_v44 }
 0xd7a   :  { %2188 = vmatmul.mubr.f32.vlgmr.msra.gmra.mrb[20].mxu1 %v2080_v27  ;;  %v2082_v31 = vmax.f32 %v2076_v28, 0.0  ;;  %v4655_v28 = vld [vmem:[%s6790_s12] ss:$0 sm:$0xff] }
 0xd7b   :  { %v2083_v30 = vmax.f32 %v2078_v38, 0.0  ;;  %v4656_v38 = vld [vmem:[%s6791_s13] ss:$0 sm:$0xff] }
 0xd7d   :  { %2192 = vmatprep.mubr.f32.mxu1 %v2083_v30 }
 0xd7e   :  { %2193 = vmatmul.mubr.f32.gmra.mrb[22].mxu1 %v2082_v31 }
 0xd7f   :  { %5075 = vmatprep.mubr.msk.f32.mxu1 %vm5631_vm1, %v5630_v0 }
 0xe4d   :  { %v4854_v32 = vpop.f32.mrb[20].mxu1 }
 0xe4e   :  { %v4855_v36 = vpop.f32.mrb[21].mxu1 }
 0xe4f   :  { %v4856_v37 = vadd.f32 %v4855_v36, %v4854_v32 }
 0xe51   :  { %v2190_v39 = vadd.f32 %v4856_v37, %v4654_v35  ;;  %v4857_v41 = vpop.f32.mrb[22].mxu1 }
 0xe52   :  { %v4858_v43 = vpop.f32.mrb[23].mxu1 }
 0xe53   :  { %v4859_v46 = vadd.f32 %v4858_v43, %v4857_v41  ;;  %v2198_v47 = vadd.f32 %v2190_v39, %v1967_v8  ;;  %v4661_v8 = vld [vmem:[%s6810_s29 + $0xa0] sm:$0xff] }
 0xe54   :  { %v4673_v39 = vld [vmem:[%s6781_s3 + $0x2] sm:$0x3] }
 0xe55   :  { %v2195_v51 = vadd.f32 %v4859_v46, %v4654_v35  ;;  %v2202_v25 = vsel %vm149_vm0, %v2198_v47, 0.0  ;;  %v2267_v41 = vrot.slane %v4673_v39, %v5865_v29  ;;  %v2271_v43 = vrot.slane %v4673_v39, %v5871_v33 }
 0xe56   :  { %2203 = vadd.xlane.f32.xlu1 %v2202_v25 }
 0xe57   :  { %v2199_v26 = vadd.f32 %v2195_v51, %v1968_v10  ;;  %v5276_v10 = vpack.c.bf16 %v4663_v9, %v4661_v8 }
 0xe59   :  { %v2205_v52 = vsel %vm149_vm0, %v2199_v26, 0.0  ;;  %5277 = vmatpush1.bf16.msra.mxu0 %v5276_v10 }
 0xe5a   :  { %2206 = vadd.xlane.f32.xlu0 %v2205_v52  ;;  %5279 = vmatprep.subr.bf16.mxu0 %v5278_v11 }
 0xe5d   :  { %5281 = vmatpush1.bf16.msra.mxu0 %v5280_v14 }
 0xe5e   :  { %5283 = vmatprep.subr.bf16.mxu0 %v5282_v17 }
 0xe61   :  { %5285 = vmatpush1.bf16.msra.mxu0 %v5284_v19 }
 0xe62   :  { %5063 = vmatprep.subr.mxu0 %v5630_v0 }
 0xee3   :  { %v2204_v53 = vpop.xlane.xlu1 %2203 }
 0xee4   :  { %v2208_v42 = vmul.f32 0.015625, %v2204_v53 }
 0xee6   :  { %v2210_v54 = vsub.f32 %v2198_v47, %v2208_v42 }
 0xee7   :  { %v2207_v56 = vpop.xlane.xlu0 %2206 }
 0xee8   :  { %v2209_v57 = vmul.f32 0.015625, %v2207_v56  ;;  %v2212_v58 = vmul.f32 %v2210_v54, %v2210_v54 }
 0xeea   :  { %v2211_v45 = vsub.f32 %v2199_v26, %v2209_v57  ;;  %v2214_v59 = vsel %vm149_vm0, %v2212_v58, 0.0 }
 0xeeb   :  { %2215 = vadd.xlane.f32.xlu1 %v2214_v59 }
 0xeec   :  { %v2213_v60 = vmul.f32 %v2211_v45, %v2211_v45 }
 0xeee   :  { %v2217_v61 = vsel %vm149_vm0, %v2213_v60, 0.0 }
 0xeef   :  { %2218 = vadd.xlane.f32.xlu0 %v2217_v61 }
 0xf78   :  { %v2216_v34 = vpop.xlane.xlu1 %2215 }
 0xf79   :  { %v2220_v20 = vmul.f32 0.015625, %v2216_v34 }
 0xf7b   :  { %v2222_v21 = vadd.f32 1e-05, %v2220_v20 }
 0xf7c   :  { %v2219_v22 = vpop.xlane.xlu0 %2218 }
 0xf7d   :  { %5460 = vrsqrt.f32 %v2222_v21  ;;  %v2221_v23 = vmul.f32 0.015625, %v2219_v22 }
 0xf7f   :  { %v2223_v24 = vadd.f32 1e-05, %v2221_v23 }
 0xf81   :  { %5462 = vrsqrt.f32 %v2223_v24 }
 0xf87   :  { %v5461_v27 = vpop.eup %5460 }
 0xf88   :  { %v2226_v40 = vmul.f32 %v5461_v27, %v2210_v54 }
 0xf8a   :  { %v2234_v30 = vmul.f32 %v4655_v28, %v2226_v40 }
 0xf8b   :  { %v5463_v31 = vpop.eup %5462 }
 0xf8c   :  { %v6283_v32 = vadd.f32 %v4656_v38, %v2234_v30  ;;  %v2227_v35 = vmul.f32 %v5463_v31, %v2211_v45 }
 0xf8e   :  { %4674 = vmatmul.mubr.msk.f32.vlgmr.msra.gmra.mrb[22].mxu0 %vm149_vm0, %v6283_v32  ;;  %v2235_v36 = vmul.f32 %v4655_v28, %v2227_v35 }
 0xf8f   :  { %2350 = vmatprep.mubr.f32.mxu0 %v5630_v0 }
 0xf90   :  { %v6288_v37 = vadd.f32 %v4656_v38, %v2235_v36 }
 0xf92   :  { %4675 = vmatmul.mubr.msk.f32.gmra.mrb[24].mxu0 %vm149_vm0, %v6288_v37 }
 0xf93   :  { %5065 = vmatprep.mubr.msk.f32.mxu0 %vm5631_vm1, %v5630_v0 }
0x1061   :  { %v2346_v46 = vpop.f32.mrb[22].mxu0 }
0x1062   :  { %v6299_v47 = vadd.f32 %v2346_v46, %v2267_v41  ;;  %v2348_v51 = vpop.f32.mrb[23].mxu0 }
0x1063   :  { %v6301_v25 = vadd.f32 %v2348_v51, %v2271_v43 }
0x1064   :  { %2367 = vrot.lane.b32.xlu1 %v6299_v47, %s5632_s4 }
0x1065   :  { %v2352_v26 = vpop.f32.mrb[24].mxu0  ;;  %5074 = vmatpush3.msra.mxu1 %v6301_v25 }
0x1066   :  { %v6306_v52 = vadd.f32 %v2352_v26, %v2267_v41  ;;  %v2354_v53 = vpop.f32.mrb[25].mxu0  ;;  %5083 = vmatprep.subr.mxu1 %v5630_v0 }
0x1067   :  { %v6309_v42 = vadd.f32 %v2354_v53, %v2271_v43 }
0x1068   :  { %2444 = vrot.lane.b32.xlu0 %v6306_v52, %s5632_s4 }
0x10d6   :  { %v2368_v54 = vpop.permute.xlu1 %2367 }
0x10d7   :  { %5064 = vmatpush3.xpose.msk.msra.mxu0 %vm244_vm2, %v2368_v54 }
0x10d8   :  { %5068 = vmatprep.subr.mxu0 %v5630_v0 }
0x10da   :  { %v2445_v56 = vpop.permute.xlu0 %2444  ;;  %5066 = vmatmul.mubr.msk.f32.vlgmr.msra.gmra.mrb[26].mxu0 %vm244_vm2, %v6299_v47 }
0x10db   :  { %5069 = vmatpush3.xpose.msk.msra.mxu0 %vm244_vm2, %v2445_v56  ;;  %5070 = vmatprep.mubr.msk.f32.mxu0 %vm5631_vm1, %v5630_v0 }
0x10dc   :  { %5078 = vmatprep.subr.mxu0 %v5630_v0 }
0x10de   :  { %5071 = vmatmul.mubr.msk.f32.vlgmr.msra.gmra.mrb[28].mxu0 %vm244_vm2, %v6306_v52 }
0x10df   :  { %5079 = vmatpush3.msra.mxu0 %v6309_v42  ;;  %5080 = vmatprep.mubr.msk.f32.mxu0 %vm5631_vm1, %v5630_v0 }
0x10e0   :  { %5088 = vmatprep.subr.mxu0 %v5630_v0 }
0x11ad   :  { %v2439_v57 = vpop.f32.mrb[26].mxu0 }
0x11ae   :  { %v5067_v58 = vpop.f32.mrb[27].mxu0  ;;  %v2520_v63 = vmul.f32 0.25, %v2439_v57 }
0x11b0   :  { %v2522_v1 = vadd.f32 %v2520_v63, %v5910_v49 }
0x11b1   :  { %v2516_v45 = vpop.f32.mrb[28].mxu0 }
0x11b2   :  { %v2521_v59 = vmul.f32 0.25, %v2516_v45  ;;  %v5072_v60 = vpop.f32.mrb[29].mxu0  ;;  %v2524_v2 = vsel %vm412_vm3, %v2522_v1, -inf }
0x11b4   :  { %v2523_v61 = vadd.f32 %v2521_v59, %v5914_v55 }
0x11b6   :  { %v2527_v62 = vsel %vm412_vm3, %v2523_v61, -inf }
0x11b7   :  { %2528 = vmax.xlane.f32.xlu1 %v2527_v62 }
0x11c8   :  { %2772 = vrot.lane.b32.xlu1 %v6306_v52, %s5633_s26 }
0x11ec   :  { %2525 = vmax.xlane.f32.xlu1 %v2524_v2 }
0x11fd   :  { %2694 = vrot.lane.b32.xlu1 %v6299_v47, %s5633_s26 }
0x1244   :  { %v2529_v3 = vpop.xlane.xlu1 %2528 }
0x1245   :  { %v2531_v4 = vsub.f32 %v2523_v61, %v2529_v3 }
0x1247   :  { %v2534_v5 = vmul.f32 1.442695, %v2531_v4 }
0x1248   :  { %v2773_v8 = vpop.permute.xlu1 %2772 }
0x1249   :  { %5464 = vpow2.f32 %v2534_v5 }
0x1253   :  { %v5465_v6 = vpop.eup %5464 }
0x1254   :  { %v2539_v7 = vsel %vm412_vm3, %v5465_v6, 0.0 }
0x1255   :  { %2540 = vadd.xlane.f32.xlu0 %v2539_v7  ;;  %v2361_v7 = vld [vmem:[#allocation7 + $0x58] sm:$0xff] }
0x126b   :  { %2770 = vrot.lane.b32.xlu0 %v6306_v52, %s5634_s22 }
0x1279   :  { %v2526_v9 = vpop.xlane.xlu1 %2525 }
0x127a   :  { %v2530_v10 = vsub.f32 %v2522_v1, %v2526_v9  ;;  %v2358_v9 = vld [vmem:[#allocation7 + $0x40] sm:$0xff] }
0x127c   :  { %v2532_v48 = vmul.f32 1.442695, %v2530_v10  ;;  %v2359_v10 = vld [vmem:[#allocation7 + $0x48] sm:$0xff] }
0x127d   :  { %v2695_v18 = vpop.permute.xlu1 %2694 }
0x127e   :  { %5466 = vpow2.f32 %v2532_v48  ;;  %v5290_v48 = vpack.c.bf16 %v2359_v10, %v2358_v9 }
0x1288   :  { %v5467_v50 = vpop.eup %5466 }
0x1289   :  { %v2536_v11 = vsel %vm412_vm3, %v5467_v50, 0.0 }
0x128a   :  { %2537 = vadd.xlane.f32.xlu0 %v2536_v11 }
0x12a0   :  { %2692 = vrot.lane.b32.xlu0 %v6299_v47, %s5634_s22 }
0x12e2   :  { %v2541_v12 = vpop.xlane.xlu0 %2540 }
0x12e3   :  { %5468 = vrcp.f32 %v2541_v12 }
0x12e6   :  { %v2771_v15 = vpop.permute.xlu0 %2770 }
0x12ed   :  { %v5469_v13 = vpop.eup %5468 }
0x12ee   :  { %v2545_v14 = vmul.f32 %v5469_v13, %v5465_v6  ;;  %v2360_v6 = vld [vmem:[#allocation7 + $0x50] sm:$0xff] }
0x12f0   :  { %5081 = vmatmul.mubr.msk.f32.vlgmr.msra.gmra.mrb[30].mxu0 %vm412_vm3, %v2545_v14 }
0x12f1   :  { %5089 = vmatpush3.xpose.msk.msra.mxu0 %vm244_vm2, %v2773_v8  ;;  %5090 = vmatprep.mubr.msk.f32.mxu0 %vm5631_vm1, %v5630_v0  ;;  %v5286_v8 = vpack.c.bf16 %v2361_v7, %v2360_v6 }
0x12f2   :  { %5098 = vmatprep.subr.mxu0 %v5630_v0 }
0x12f4   :  { %5091 = vmatmul.mubr.msk.f32.vlgmr.msra.gmra.mrb[32].mxu0 %vm244_vm2, %v2771_v15 }
0x12f5   :  { %5100 = vmatprep.mubr.msk.f32.mxu0 %vm5631_vm1, %v5630_v0 }
0x1317   :  { %v2538_v16 = vpop.xlane.xlu0 %2537 }
0x1318   :  { %5470 = vrcp.f32 %v2538_v16 }
0x131b   :  { %v2693_v19 = vpop.permute.xlu0 %2692 }
0x1322   :  { %v5471_v17 = vpop.eup %5470 }
0x1323   :  { %v2544_v44 = vmul.f32 %v5471_v17, %v5467_v50 }
0x1325   :  { %5076 = vmatmul.mubr.msk.f32.vlgmr.msra.gmra.mrb[24].mxu1 %vm412_vm3, %v2544_v44 }
0x1326   :  { %5084 = vmatpush3.xpose.msk.msra.mxu1 %vm244_vm2, %v2695_v18  ;;  %5085 = vmatprep.mubr.msk.f32.mxu1 %vm5631_vm1, %v5630_v0 }
0x1327   :  { %5093 = vmatprep.subr.mxu1 %v5630_v0 }
0x1329   :  { %5086 = vmatmul.mubr.msk.f32.vlgmr.msra.gmra.mrb[26].mxu1 %vm244_vm2, %v2693_v19 }
0x132a   :  { %5095 = vmatprep.mubr.msk.f32.mxu1 %vm5631_vm1, %v5630_v0 }
0x13c3   :  { %v6357_v34 = vpop.f32.mrb[30].mxu0 }
0x13c4   :  { %v5082_v20 = vpop.f32.mrb[31].mxu0 }
0x13c7   :  { %v2844_v21 = vpop.f32.mrb[32].mxu0 }
0x13c8   :  { %v2849_v22 = vmul.f32 0.25, %v2844_v21  ;;  %v5092_v23 = vpop.f32.mrb[33].mxu0 }
0x13ca   :  { %v2851_v24 = vadd.f32 %v2849_v22, %v5914_v55 }
0x13cc   :  { %v2855_v27 = vsel %vm412_vm3, %v2851_v24, -inf }
0x13cd   :  { %2856 = vmax.xlane.f32.xlu1 %v2855_v27 }
0x13de   :  { %2952 = vrot.lane.b32.xlu1 %v6309_v42, %s5634_s22 }
0x13e2   :  { %3190 = vrot.lane.b32.xlu1 %v6299_v47, %s5635_s2 }
0x13e6   :  { %3270 = vrot.lane.b32.xlu1 %v6306_v52, %s5636_s1 }
0x13f8   :  { %v6367_v28 = vpop.f32.mrb[24].mxu1 }
0x13f9   :  { %v5077_v40 = vpop.f32.mrb[25].mxu1 }
0x13fc   :  { %v2766_v38 = vpop.f32.mrb[26].mxu1 }
0x13fd   :  { %v5087_v30 = vpop.f32.mrb[27].mxu1  ;;  %v2848_v31 = vmul.f32 0.25, %v2766_v38 }
0x13ff   :  { %v2850_v35 = vadd.f32 %v2848_v31, %v5910_v49 }
0x1401   :  { %v2852_v36 = vsel %vm412_vm3, %v2850_v35, -inf }
0x140a   :  { %2853 = vmax.xlane.f32.xlu1 %v2852_v36 }
0x145a   :  { %v2857_v39 = vpop.xlane.xlu1 %2856 }
0x145b   :  { %v2859_v41 = vsub.f32 %v2851_v24, %v2857_v39  ;;  %v2362_v39 = vld [vmem:[#allocation7 + $0x60] sm:$0xff] }
0x145d   :  { %v2862_v43 = vmul.f32 1.442695, %v2859_v41  ;;  %v2363_v41 = vld [vmem:[#allocation7 + $0x68] sm:$0xff] }
0x145e   :  { %v2953_v46 = vpop.permute.xlu1 %2952 }
0x145f   :  { %5472 = vpow2.f32 %v2862_v43  ;;  %5099 = vmatpush3.msra.mxu0 %v2953_v46  ;;  %v5294_v46 = vpack.c.bf16 %v2363_v41, %v2362_v39 }
0x1460   :  { %5117 = vmatprep.subr.mxu0 %v5630_v0 }
0x1462   :  { %v3191_v53 = vpop.permute.xlu1 %3190 }
0x1466   :  { %v3271_v54 = vpop.permute.xlu1 %3270 }
0x1469   :  { %v5473_v51 = vpop.eup %5472 }
0x146a   :  { %v2867_v26 = vsel %vm412_vm3, %v5473_v51, 0.0 }
0x146b   :  { %2868 = vadd.xlane.f32.xlu0 %v2867_v26 }
0x1481   :  { %3192 = vrot.lane.b32.xlu0 %v6299_v47, %s5636_s1  ;;  %s6812_s1 = sld [smem:[#allocation18_spill]] }
0x1485   :  { %3268 = vrot.lane.b32.xlu0 %v6306_v52, %s5635_s2 }
0x1497   :  { %v2854_v56 = vpop.xlane.xlu1 %2853 }
0x1498   :  { %v2858_v57 = vsub.f32 %v2850_v35, %v2854_v56 }
0x149a   :  { %v2860_v58 = vmul.f32 1.442695, %v2858_v57 }
0x149c   :  { %5474 = vpow2.f32 %v2860_v58 }
0x14a6   :  { %v5475_v45 = vpop.eup %5474 }
0x14a7   :  { %v2864_v59 = vsel %vm412_vm3, %v5475_v45, 0.0 }
0x14a8   :  { %2865 = vadd.xlane.f32.xlu0 %v2864_v59 }
0x14be   :  { %2875 = vrot.lane.b32.xlu0 %v6301_v25, %s5634_s22 }
0x14c2   :  { %3448 = vrot.lane.b32.xlu0 %v6309_v42, %s5635_s2 }
0x14c6   :  { %3609 = vrot.lane.b32.xlu0 %v6299_v47, %s6811_s24 }
0x14ca   :  { %3687 = vrot.lane.b32.xlu0 %v6306_v52, %s6811_s24 }
0x14ce   :  { %3607 = vrot.lane.b32.xlu0 %v6299_v47, %s5637_s14 }
0x14f8   :  { %v2869_v60 = vpop.xlane.xlu0 %2868 }
0x14f9   :  { %5476 = vrcp.f32 %v2869_v60 }
0x14fc   :  { %v3193_v63 = vpop.permute.xlu0 %3192 }
0x1500   :  { %v3269_v47 = vpop.permute.xlu0 %3268 }
0x1503   :  { %v5477_v61 = vpop.eup %5476 }
0x1504   :  { %v2873_v62 = vmul.f32 %v5477_v61, %v5473_v51 }
0x1506   :  { %5101 = vmatmul.mubr.msk.f32.vlgmr.msra.gmra.mrb[34].mxu0 %vm412_vm3, %v2873_v62 }
0x1507   :  { %5118 = vmatpush3.xpose.msk.msra.mxu0 %vm244_vm2, %v3193_v63  ;;  %5119 = vmatprep.mubr.msk.f32.mxu0 %vm5631_vm1, %v5630_v0 }
0x1508   :  { %5122 = vmatprep.subr.mxu0 %v5630_v0 }
0x150a   :  { %5120 = vmatmul.mubr.msk.f32.vlgmr.msra.gmra.mrb[36].mxu0 %vm244_vm2, %v3191_v53 }
0x150b   :  { %5123 = vmatpush3.xpose.msk.msra.mxu0 %vm244_vm2, %v3271_v54  ;;  %5124 = vmatprep.mubr.msk.f32.mxu0 %vm5631_vm1, %v5630_v0 }
0x150c   :  { %5132 = vmatprep.subr.mxu0 %v5630_v0 }
0x150e   :  { %5125 = vmatmul.mubr.msk.f32.vlgmr.msra.gmra.mrb[38].mxu0 %vm244_vm2, %v3269_v47 }
0x150f   :  { %5134 = vmatprep.mubr.msk.f32.mxu0 %vm5631_vm1, %v5630_v0 }
0x1535   :  { %v2866_v1 = vpop.xlane.xlu0 %2865 }
0x1536   :  { %5478 = vrcp.f32 %v2866_v1 }
0x1539   :  { %v2876_v2 = vpop.permute.xlu0 %2875 }
0x153a   :  { %5094 = vmatpush3.msra.mxu1 %v2876_v2 }
0x153b   :  { %5287 = vmatprep.subr.bf16.mxu1 %v5286_v8 }
0x153d   :  { %v3449_v3 = vpop.permute.xlu0 %3448 }
0x153e   :  { %5133 = vmatpush3.msra.mxu0 %v3449_v3 }
0x153f   :  { %5144 = vmatprep.subr.mxu0 %v5630_v0 }
0x1540   :  { %v5479_v4 = vpop.eup %5478 }
0x1541   :  { %v2872_v5 = vmul.f32 %v5479_v4, %v5475_v45  ;;  %v3610_v26 = vpop.permute.xlu0 %3609 }
0x1543   :  { %5096 = vmatmul.mubr.msk.f32.vlgmr.msra.gmra.mrb[28].mxu1 %vm412_vm3, %v2872_v5 }
0x1544   :  { %5289 = vmatpush3.bf16.msra.mxu1 %v5286_v8 }
0x1545   :  { %5291 = vmatprep.subr.bf16.mxu1 %v5290_v48  ;;  %v3688_v57 = vpop.permute.xlu0 %3687 }
0x15d9   :  { %v3024_v50 = vpop.f32.mrb[34].mxu0 }
0x15da   :  { %v5102_v11 = vpop.f32.mrb[35].mxu0 }
0x15dd   :  { %v3264_v12 = vpop.f32.mrb[36].mxu0 }
0x15de   :  { %v3346_v13 = vmul.f32 0.25, %v3264_v12  ;;  %v5121_v14 = vpop.f32.mrb[37].mxu0 }
0x15e0   :  { %v3348_v15 = vadd.f32 %v3346_v13, %v5910_v49 }
0x15e1   :  { %v3342_v16 = vpop.f32.mrb[38].mxu0 }
0x15e2   :  { %v3347_v17 = vmul.f32 0.25, %v3342_v16  ;;  %v5126_v44 = vpop.f32.mrb[39].mxu0  ;;  %v3350_v18 = vsel %vm412_vm3, %v3348_v15, -inf }
0x15e3   :  { %3351 = vmax.xlane.f32.xlu1 %v3350_v18  ;;  %v2365_v18 = vld [vmem:[#allocation7 + $0x78] sm:$0xff] }
0x15e4   :  { %v3349_v19 = vadd.f32 %v3347_v17, %v5914_v55 }
0x15e6   :  { %v3353_v20 = vsel %vm412_vm3, %v3349_v19, -inf }
0x15e7   :  { %3354 = vmax.xlane.f32.xlu1 %v3353_v20 }
0x1616   :  { %v2947_v21 = vpop.f32.mrb[28].mxu1 }
0x1617   :  { %v5097_v22 = vpop.f32.mrb[29].mxu1  ;;  %5107 = vmatprep.mubr.msk.f32.mxu1 %vm244_vm2, %v2947_v21 }
0x1618   :  { %5108 = vmatmul.mubr.msk.f32.vlgmr.msra.gmra.mrb[30].mxu1 %vm244_vm2, %v3024_v50 }
0x1619   :  { %5114 = vmatprep.mubr.msk.f32.mxu1 %vm244_vm2, %v6367_v28  ;;  %5293 = vmatpush3.bf16.msra.mxu1 %v5290_v48 }
0x161a   :  { %5127 = vmatprep.subr.mxu1 %v5630_v0 }
0x1620   :  { %5115 = vmatmul.mubr.msk.f32.vlgmr.msra.gmra.mrb[30].mxu1 %vm244_vm2, %v6357_v34 }
0x1621   :  { %5129 = vmatprep.mubr.msk.f32.mxu1 %vm5631_vm1, %v5630_v0 }
0x1670   :  { %v3352_v23 = vpop.xlane.xlu1 %3351 }
0x1671   :  { %v3356_v24 = vsub.f32 %v3348_v15, %v3352_v23 }
0x1673   :  { %v3358_v27 = vmul.f32 1.442695, %v3356_v24 }
0x1674   :  { %v3355_v40 = vpop.xlane.xlu1 %3354 }
0x1675   :  { %5480 = vpow2.f32 %v3358_v27  ;;  %v3357_v38 = vsub.f32 %v3349_v19, %v3355_v40 }
0x1677   :  { %v3360_v30 = vmul.f32 1.442695, %v3357_v38 }
0x1679   :  { %5482 = vpow2.f32 %v3360_v30 }
0x167f   :  { %v5481_v31 = vpop.eup %5480 }
0x1680   :  { %v3362_v28 = vsel %vm412_vm3, %v5481_v31, 0.0 }
0x1681   :  { %3363 = vadd.xlane.f32.xlu1 %v3362_v28 }
0x1683   :  { %v5483_v35 = vpop.eup %5482 }
0x1684   :  { %v3365_v36 = vsel %vm412_vm3, %v5483_v35, 0.0 }
0x1685   :  { %3366 = vadd.xlane.f32.xlu1 %v3365_v36 }
0x1696   :  { %3372 = vrot.lane.b32.xlu1 %v6301_v25, %s5635_s2 }
0x169a   :  { %3685 = vrot.lane.b32.xlu1 %v6306_v52, %s5637_s14  ;;  %v3608_v52 = vpop.permute.xlu0 %3607 }
0x170e   :  { %v3364_v34 = vpop.xlane.xlu1 %3363 }
0x170f   :  { %5484 = vrcp.f32 %v3364_v34 }
0x1712   :  { %v3367_v43 = vpop.xlane.xlu1 %3366 }
0x1713   :  { %5486 = vrcp.f32 %v3367_v43 }
0x1716   :  { %v3373_v51 = vpop.permute.xlu1 %3372 }
0x1717   :  { %5128 = vmatpush3.msra.mxu1 %v3373_v51 }
0x1718   :  { %5295 = vmatprep.subr.bf16.mxu1 %v5294_v46 }
0x1719   :  { %v5485_v53 = vpop.eup %5484 }
0x171a   :  { %v3370_v54 = vmul.f32 %v5485_v53, %v5481_v31  ;;  %v3686_v62 = vpop.permute.xlu1 %3685 }
0x171c   :  { %5130 = vmatmul.mubr.msk.f32.vlgmr.msra.gmra.mrb[32].mxu1 %vm412_vm3, %v3370_v54 }
0x171d   :  { %v5487_v56 = vpop.eup %5486  ;;  %5297 = vmatpush3.bf16.msra.mxu1 %v5294_v46 }
0x171e   :  { %v3371_v58 = vmul.f32 %v5487_v56, %v5483_v35  ;;  %5149 = vmatprep.subr.mxu1 %v5630_v0 }
0x1720   :  { %5135 = vmatmul.mubr.msk.f32.vlgmr.msra.gmra.mrb[40].mxu0 %vm412_vm3, %v3371_v58  ;;  %v4715_v58 = vld [vmem:[%s6786_s8 + $0x88] sm:$0xff] }
0x1721   :  { %5145 = vmatpush3.xpose.msk.msra.mxu0 %vm244_vm2, %v3610_v26  ;;  %5146 = vmatprep.mubr.msk.f32.mxu0 %vm5631_vm1, %v5630_v0 }
0x1722   :  { %5154 = vmatprep.subr.mxu0 %v5630_v0 }
0x1724   :  { %5147 = vmatmul.mubr.msk.f32.vlgmr.msra.gmra.mrb[42].mxu0 %vm244_vm2, %v3608_v52  ;;  %v4717_v52 = vld [vmem:[%s6786_s8 + $0x98] sm:$0xff] }
0x1725   :  { %5156 = vmatprep.mubr.msk.f32.mxu0 %vm5631_vm1, %v5630_v0 }
0x17ef   :  { %v3444_v45 = vpop.f32.mrb[32].mxu1 }
0x17f0   :  { %v5131_v59 = vpop.f32.mrb[33].mxu1  ;;  %5141 = vmatprep.mubr.msk.f32.mxu1 %vm244_vm2, %v3444_v45  ;;  %v5302_v45 = vpack.c.bf16 %v4717_v52, %v4715_v58  ;;  %v4761_v58 = vld [vmem:[%s6788_s10 + $0x1e0] sm:$0xff]  ;;  %v4762_v52 = vld [vmem:[%s6788_s10 + $0x1e8] sm:$0xff] }
0x17f1   :  { %v4714_v59 = vld [vmem:[%s6786_s8 + $0x80] sm:$0xff] }
0x17f3   :  { %v3520_v60 = vpop.f32.mrb[40].mxu0 }
0x17f4   :  { %v5136_v61 = vpop.f32.mrb[41].mxu0  ;;  %5142 = vmatmul.mubr.msk.f32.vlgmr.msra.gmra.mrb[30].mxu1 %vm244_vm2, %v3520_v60  ;;  %v4716_v60 = vld [vmem:[%s6786_s8 + $0x90] sm:$0xff] }
0x17f5   :  { %5150 = vmatpush3.xpose.msk.msra.mxu1 %vm244_vm2, %v3688_v57  ;;  %5151 = vmatprep.mubr.msk.f32.mxu1 %vm5631_vm1, %v5630_v0  ;;  %v5304_v61 = vpack.c.bf16 %v4716_v60, %v4714_v59  ;;  %v5342_v59 = vpack.c.bf16 %v4762_v52, %v4761_v58 }
0x17f6   :  { %5159 = vmatprep.subr.mxu1 %v5630_v0 }
0x17f7   :  { %v3681_v63 = vpop.f32.mrb[42].mxu0 }
0x17f8   :  { %v3763_v47 = vmul.f32 0.25, %v3681_v63  ;;  %v5148_v1 = vpop.f32.mrb[43].mxu0  ;;  %5152 = vmatmul.mubr.msk.f32.vlgmr.msra.gmra.mrb[34].mxu1 %vm244_vm2, %v3686_v62  ;;  %v4719_v62 = vld [vmem:[%s6786_s8 + $0xa8] sm:$0xff]  ;;  %v4721_v63 = vld [vmem:[%s6786_s8 + $0xb8] sm:$0xff] }
0x17f9   :  { %5161 = vmatprep.mubr.msk.f32.mxu1 %vm5631_vm1, %v5630_v0  ;;  %v4718_v1 = vld [vmem:[%s6786_s8 + $0xa0] sm:$0xff] }
0x17fa   :  { %v3765_v2 = vadd.f32 %v3763_v47, %v5910_v49  ;;  %v5306_v47 = vpack.c.bf16 %v4721_v63, %v4719_v62 }
0x17fc   :  { %v3767_v3 = vsel %vm412_vm3, %v3765_v2, -inf }
0x17fd   :  { %3768 = vmax.xlane.f32.xlu0 %v3767_v3 }
0x188a   :  { %v3769_v4 = vpop.xlane.xlu0 %3768 }
0x188b   :  { %v3773_v5 = vsub.f32 %v3765_v2, %v3769_v4  ;;  %v4720_v2 = vld [vmem:[%s6786_s8 + $0xb0] sm:$0xff]  ;;  %v4723_v4 = vld [vmem:[%s6786_s8 + $0xc8] sm:$0xff] }
0x188c   :  { %v5308_v3 = vpack.c.bf16 %v4720_v2, %v4718_v1 }
0x188d   :  { %v3775_v6 = vmul.f32 1.442695, %v3773_v5  ;;  %v4725_v5 = vld [vmem:[%s6786_s8 + $0xd8] sm:$0xff] }
0x188f   :  { %5488 = vpow2.f32 %v3775_v6  ;;  %v5310_v6 = vpack.c.bf16 %v4725_v5, %v4723_v4  ;;  %v4712_v4 = vld [vmem:[%s6784_s6 + $0x1] ss:$0 sm:$0xff] }
0x1899   :  { %v5489_v7 = vpop.eup %5488 }
0x189a   :  { %v3779_v8 = vsel %vm412_vm3, %v5489_v7, 0.0 }
0x189b   :  { %3780 = vadd.xlane.f32.xlu0 %v3779_v8  ;;  %v4724_v8 = vld [vmem:[%s6786_s8 + $0xd0] sm:$0xff] }
0x18cb   :  { %v3759_v9 = vpop.f32.mrb[34].mxu1 }
0x18cc   :  { %v3764_v10 = vmul.f32 0.25, %v3759_v9  ;;  %v5153_v48 = vpop.f32.mrb[35].mxu1 }
0x18cd   :  { %v4729_v48 = vld [vmem:[%s6786_s8 + $0xf8] sm:$0xff] }
0x18ce   :  { %v3766_v50 = vadd.f32 %v3764_v10, %v5914_v55  ;;  %v4727_v10 = vld [vmem:[%s6786_s8 + $0xe8] sm:$0xff] }
0x18d0   :  { %v3770_v11 = vsel %vm412_vm3, %v3766_v50, -inf }
0x18d1   :  { %3771 = vmax.xlane.f32.xlu1 %v3770_v11  ;;  %v5314_v11 = vpack.c.bf16 %v4729_v48, %v4727_v10 }
0x18e2   :  { %3789 = vrot.lane.b32.xlu1 %v6301_v25, %s5637_s14  ;;  %v2364_v25 = vld [vmem:[#allocation7 + $0x70] sm:$0xff] }
0x18e3   :  { %v5298_v20 = vpack.c.bf16 %v2365_v18, %v2364_v25 }
0x1928   :  { %v3781_v49 = vpop.xlane.xlu0 %3780 }
0x1929   :  { %5490 = vrcp.f32 %v3781_v49  ;;  %v4728_v49 = vld [vmem:[%s6786_s8 + $0xf0] sm:$0xff] }
0x1933   :  { %v5491_v13 = vpop.eup %5490 }
0x1934   :  { %v3787_v16 = vmul.f32 %v5491_v13, %v5489_v7  ;;  %v4722_v7 = vld [vmem:[%s6786_s8 + $0xc0] sm:$0xff] }
0x1935   :  { %v5312_v9 = vpack.c.bf16 %v4724_v8, %v4722_v7  ;;  %v4749_v13 = vld [vmem:[%s6788_s10 + $0x180] sm:$0xff] }
0x1936   :  { %v4713_v7 = vld [vmem:[%s6785_s7 + $0x1] ss:$0 sm:$0xff] }
0x195e   :  { %v3772_v12 = vpop.xlane.xlu1 %3771 }
0x195f   :  { %v3774_v14 = vsub.f32 %v3766_v50, %v3772_v12  ;;  %v4726_v50 = vld [vmem:[%s6786_s8 + $0xe0] sm:$0xff] }
0x1960   :  { %v5316_v12 = vpack.c.bf16 %v4728_v49, %v4726_v50  ;;  %v4764_v49 = vld [vmem:[%s6788_s10 + $0x1f8] sm:$0xff] }
0x1961   :  { %v3777_v15 = vmul.f32 1.442695, %v3774_v14  ;;  %v4750_v14 = vld [vmem:[%s6788_s10 + $0x188] sm:$0xff] }
0x1962   :  { %v3790_v17 = vpop.permute.xlu1 %3789 }
0x1963   :  { %5492 = vpow2.f32 %v3777_v15  ;;  %5155 = vmatpush3.msra.mxu0 %v3790_v17  ;;  %v4733_v15 = vld [vmem:[%s6788_s10 + $0x100] sm:$0xff]  ;;  %v4734_v17 = vld [vmem:[%s6788_s10 + $0x108] sm:$0xff] }
0x1964   :  { %5157 = vmatmul.mubr.msk.f32.vlgmr.msra.gmra.mrb[44].mxu0 %vm412_vm3, %v3787_v16  ;;  %5303 = vmatprep.subr.bf16.mxu0 %v5302_v45  ;;  %v5318_v16 = vpack.c.bf16 %v4750_v14, %v4749_v13  ;;  %v5320_v25 = vpack.c.bf16 %v4734_v17, %v4733_v15  ;;  %v4747_v13 = vld [vmem:[%s6788_s10 + $0x170] sm:$0xff]  ;;  %v4748_v14 = vld [vmem:[%s6788_s10 + $0x178] sm:$0xff] }
0x1965   :  { %4182 = vmatprep.mubr.f32.mxu0 %v5630_v0  ;;  %5305 = vmatpush1.bf16.msra.mxu0 %v5304_v61  ;;  %v5348_v15 = vpack.c.bf16 %v4748_v14, %v4747_v13  ;;  %v4475_v14 = vld [vmem:[%s6794_s16 + $0x20] sm:$0xff] }
0x1966   :  { %5307 = vmatprep.subr.bf16.mxu0 %v5306_v47 }
0x1969   :  { %5309 = vmatpush1.bf16.msra.mxu0 %v5308_v3 }
0x196a   :  { %5311 = vmatprep.subr.bf16.mxu0 %v5310_v6 }
0x196d   :  { %v5493_v55 = vpop.eup %5492  ;;  %5313 = vmatpush1.bf16.msra.mxu0 %v5312_v9 }
0x196e   :  { %v3782_v44 = vsel %vm412_vm3, %v5493_v55, 0.0  ;;  %5315 = vmatprep.subr.bf16.mxu0 %v5314_v11  ;;  %v4763_v11 = vld [vmem:[%s6788_s10 + $0x1f0] sm:$0xff] }
0x196f   :  { %3783 = vadd.xlane.f32.xlu0 %v3782_v44  ;;  %v4752_v44 = vld [vmem:[%s6788_s10 + $0x198] sm:$0xff] }
0x1971   :  { %5317 = vmatpush1.bf16.msra.mxu0 %v5316_v12  ;;  %v5346_v12 = vpack.c.bf16 %v4764_v49, %v4763_v11  ;;  %v4476_v11 = vld [vmem:[%s6794_s16 + $0x28] sm:$0xff]  ;;  %v4478_v49 = vld [vmem:[%s6794_s16 + $0x38] sm:$0xff] }
0x1972   :  { %v5366_v13 = vpack.c.bf16 %v4478_v49, %v4476_v11 }
0x1985   :  { %3865 = vrot.lane.b32.xlu0 %v6309_v42, %s5637_s14  ;;  %v4709_v42 = vld [vmem:[%s6783_s5 + $0x1] ss:$0 sm:$0xff] }
0x19fc   :  { %v3784_v19 = vpop.xlane.xlu0 %3783 }
0x19fd   :  { %5494 = vrcp.f32 %v3784_v19  ;;  %v4735_v19 = vld [vmem:[%s6788_s10 + $0x110] sm:$0xff] }
0x1a00   :  { %v3866_v21 = vpop.permute.xlu0 %3865 }
0x1a01   :  { %5160 = vmatpush3.msra.mxu1 %v3866_v21  ;;  %v4753_v21 = vld [vmem:[%s6788_s10 + $0x1a0] sm:$0xff] }
0x1a02   :  { %5299 = vmatprep.subr.bf16.mxu1 %v5298_v20 }
0x1a07   :  { %v5495_v22 = vpop.eup %5494 }
0x1a08   :  { %v3788_v23 = vmul.f32 %v5495_v22, %v5493_v55  ;;  %v4751_v55 = vld [vmem:[%s6788_s10 + $0x190] sm:$0xff]  ;;  %v4754_v22 = vld [vmem:[%s6788_s10 + $0x1a8] sm:$0xff] }
0x1a09   :  { %v5322_v18 = vpack.c.bf16 %v4752_v44, %v4751_v55 }
0x1a0a   :  { %5162 = vmatmul.mubr.msk.f32.vlgmr.msra.gmra.mrb[36].mxu1 %vm412_vm3, %v3788_v23 }
0x1a0b   :  { %5301 = vmatpush3.bf16.msra.mxu1 %v5298_v20  ;;  %v4736_v20 = vld [vmem:[%s6788_s10 + $0x118] sm:$0xff] }
0x1a0c   :  { %5319 = vmatprep.subr.bf16.mxu1 %v5318_v16  ;;  %v5324_v23 = vpack.c.bf16 %v4736_v20, %v4735_v19  ;;  %v4730_v16 = vld [vmem:[%s6787_s9 + $0x2] sm:$0x3] }
0x1a0d   :  { %v4105_v17 = vrot.slane %v4730_v16, %v5865_v29  ;;  %v4109_v55 = vrot.slane %v4730_v16, %v5871_v33  ;;  %v4480_v16 = vld [vmem:[%s6794_s16 + $0x48] sm:$0xff] }
0x1a37   :  { %v3861_v24 = vpop.f32.mrb[44].mxu0 }
0x1a38   :  { %v5158_v27 = vpop.f32.mrb[45].mxu0  ;;  %5168 = vmatprep.mubr.msk.f32.mxu1 %vm244_vm2, %v3861_v24  ;;  %v5326_v24 = vpack.c.bf16 %v4754_v22, %v4753_v21 }
0x1a39   :  { %v4737_v27 = vld [vmem:[%s6788_s10 + $0x120] sm:$0xff] }
0x1add   :  { %v3937_v40 = vpop.f32.mrb[36].mxu1 }
0x1ade   :  { %v5163_v38 = vpop.f32.mrb[37].mxu1  ;;  %5169 = vmatmul.mubr.msk.f32.vlgmr.msra.gmra.mrb[30].mxu1 %vm244_vm2, %v3937_v40  ;;  %v4738_v40 = vld [vmem:[%s6788_s10 + $0x128] sm:$0xff] }
0x1adf   :  { %5321 = vmatpush3.bf16.msra.mxu1 %v5320_v25  ;;  %v4755_v38 = vld [vmem:[%s6788_s10 + $0x1b0] sm:$0xff] }
0x1ae0   :  { %5323 = vmatprep.subr.bf16.mxu1 %v5322_v18 }
0x1ae3   :  { %5325 = vmatpush3.bf16.msra.mxu1 %v5324_v23 }
0x1ae4   :  { %5327 = vmatprep.subr.bf16.mxu1 %v5326_v24 }
0x1bb1   :  { %v5170_v30 = vpop.f32.mrb[30].mxu1 }
0x1bb2   :  { %v4033_v31 = vadd.f32 %v5170_v30, %v4709_v42  ;;  %v4013_v28 = vpop.f32.mrb[31].mxu1  ;;  %v5328_v30 = vpack.c.bf16 %v4738_v40, %v4737_v27 }
0x1bb3   :  { %v4032_v35 = vadd.f32 %v4709_v42, %v4013_v28  ;;  %v4756_v42 = vld [vmem:[%s6788_s10 + $0x1b8] sm:$0xff]  ;;  %v4739_v28 = vld [vmem:[%s6788_s10 + $0x130] sm:$0xff] }
0x1bb4   :  { %v4035_v36 = vadd.f32 %v4033_v31, %v6288_v37  ;;  %v5330_v31 = vpack.c.bf16 %v4756_v42, %v4755_v38  ;;  %5329 = vmatpush3.bf16.msra.mxu1 %v5328_v30  ;;  %v4766_v30 = vld [vmem:[%s6789_s11 + $0x1] ss:$0 sm:$0xff] }
0x1bb5   :  { %v4034_v34 = vadd.f32 %v4032_v35, %v6283_v32  ;;  %v4740_v35 = vld [vmem:[%s6788_s10 + $0x138] sm:$0xff] }
0x1bb6   :  { %v4043_v39 = vsel %vm149_vm0, %v4035_v36, 0.0  ;;  %5331 = vmatprep.subr.bf16.mxu1 %v5330_v31 }
0x1bb7   :  { %4044 = vadd.xlane.f32.xlu0 %v4043_v39  ;;  %v4040_v41 = vsel %vm149_vm0, %v4034_v34, 0.0  ;;  %v5332_v39 = vpack.c.bf16 %v4740_v35, %v4739_v28 }
0x1bb8   :  { %4041 = vadd.xlane.f32.xlu1 %v4040_v41 }
0x1bb9   :  { %5333 = vmatpush3.bf16.msra.mxu1 %v5332_v39 }
0x1c44   :  { %v4045_v43 = vpop.xlane.xlu0 %4044 }
0x1c45   :  { %v4047_v46 = vmul.f32 0.015625, %v4045_v43  ;;  %v4042_v51 = vpop.xlane.xlu1 %4041  ;;  %v4741_v43 = vld [vmem:[%s6788_s10 + $0x140] sm:$0xff] }
0x1c46   :  { %v4046_v26 = vmul.f32 0.015625, %v4042_v51  ;;  %v4759_v51 = vld [vmem:[%s6788_s10 + $0x1d0] sm:$0xff] }
0x1c47   :  { %v6463_v53 = vsub.f32 %v4035_v36, %v4047_v46  ;;  %v4757_v36 = vld [vmem:[%s6788_s10 + $0x1c0] sm:$0xff]  ;;  %v4742_v46 = vld [vmem:[%s6788_s10 + $0x148] sm:$0xff] }
0x1c48   :  { %v6465_v54 = vsub.f32 %v4034_v34, %v4046_v26  ;;  %v4758_v34 = vld [vmem:[%s6788_s10 + $0x1c8] sm:$0xff]  ;;  %v4760_v26 = vld [vmem:[%s6788_s10 + $0x1d8] sm:$0xff] }
0x1c49   :  { %v4051_v56 = vmul.f32 %v6463_v53, %v6463_v53  ;;  %v5334_v41 = vpack.c.bf16 %v4758_v34, %v4757_v36 }
0x1c4a   :  { %v4050_v32 = vmul.f32 %v6465_v54, %v6465_v54 }
0x1c4b   :  { %v4055_v37 = vsel %vm149_vm0, %v4051_v56, 0.0  ;;  %v5336_v56 = vpack.c.bf16 %v4742_v46, %v4741_v43  ;;  %5335 = vmatprep.subr.bf16.mxu1 %v5334_v41 }
0x1c4c   :  { %4056 = vadd.xlane.f32.xlu0 %v4055_v37  ;;  %v4052_v57 = vsel %vm149_vm0, %v4050_v32, 0.0  ;;  %v5338_v32 = vpack.c.bf16 %v4760_v26, %v4759_v51  ;;  %v4743_v37 = vld [vmem:[%s6788_s10 + $0x150] sm:$0xff] }
0x1c4d   :  { %4053 = vadd.xlane.f32.xlu1 %v4052_v57  ;;  %v4744_v57 = vld [vmem:[%s6788_s10 + $0x158] sm:$0xff]  ;;  %5337 = vmatpush3.bf16.msra.mxu1 %v5336_v56 }
0x1c4e   :  { %v5340_v45 = vpack.c.bf16 %v4744_v57, %v4743_v37  ;;  %5339 = vmatprep.subr.bf16.mxu1 %v5338_v32 }
0x1c51   :  { %5341 = vmatpush3.bf16.msra.mxu1 %v5340_v45 }
0x1c52   :  { %5343 = vmatprep.subr.bf16.mxu1 %v5342_v59 }
0x1cd9   :  { %v4057_v60 = vpop.xlane.xlu0 %4056 }
0x1cda   :  { %v4059_v61 = vmul.f32 0.015625, %v4057_v60  ;;  %v4054_v62 = vpop.xlane.xlu1 %4053 }
0x1cdb   :  { %v4058_v63 = vmul.f32 0.015625, %v4054_v62  ;;  %v4381_v62 = vld [vmem:[#allocation8 + $0x8] sm:$0xff] }
0x1cdc   :  { %v4061_v47 = vadd.f32 1e-05, %v4059_v61  ;;  %v4380_v61 = vld [vmem:[#allocation8] sm:$0xff] }
0x1cdd   :  { %v4060_v1 = vadd.f32 1e-05, %v4058_v63  ;;  %v5351_v63 = vpack.c.bf16 %v4381_v62, %v4380_v61 }
0x1cde   :  { %5496 = vrsqrt.f32 %v4061_v47  ;;  %v5638_v47 = vmov 0.0|0.0  }
0x1cdf   :  { %5498 = vrsqrt.f32 %v4060_v1  ;;  %v4382_v1 = vld [vmem:[#allocation8 + $0x10] sm:$0xff] }
0x1ce8   :  { %v5497_v2 = vpop.eup %5496 }
0x1ce9   :  { %v5499_v3 = vpop.eup %5498  ;;  %v4065_v6 = vmul.f32 %v5497_v2, %v6463_v53  ;;  %v4745_v53 = vld [vmem:[%s6788_s10 + $0x160] sm:$0xff]  ;;  %v4383_v2 = vld [vmem:[#allocation8 + $0x18] sm:$0xff] }
0x1cea   :  { %v4064_v5 = vmul.f32 %v5499_v3, %v6465_v54  ;;  %v4746_v54 = vld [vmem:[%s6788_s10 + $0x168] sm:$0xff]  ;;  %v5354_v3 = vpack.c.bf16 %v4383_v2, %v4382_v1  ;;  %v4769_v2 = vld [vmem:[%s6790_s12 + $0x1] ss:$0 sm:$0xff] }
0x1ceb   :  { %v4073_v10 = vmul.f32 %v4712_v4, %v4065_v6  ;;  %v5344_v50 = vpack.c.bf16 %v4746_v54, %v4745_v53  ;;  %v4471_v53 = vld [vmem:[%s6794_s16] sm:$0xff] }
0x1cec   :  { %v4072_v8 = vmul.f32 %v4712_v4, %v4064_v5  ;;  %v4384_v4 = vld [vmem:[#allocation8 + $0x20] sm:$0xff]  ;;  %v4385_v5 = vld [vmem:[#allocation8 + $0x28] sm:$0xff] }
0x1ced   :  { %v4081_v48 = vadd.f32 %v4713_v7, %v4073_v10  ;;  %5345 = vmatpush3.bf16.msra.mxu1 %v5344_v50  ;;  %v5357_v6 = vpack.c.bf16 %v4385_v5, %v4384_v4  ;;  %v4472_v10 = vld [vmem:[%s6794_s16 + $0x8] sm:$0xff]  ;;  %v4473_v50 = vld [vmem:[%s6794_s16 + $0x10] sm:$0xff]  ;;  %v4770_v4 = vld [vmem:[%s6791_s13 + $0x1] ss:$0 sm:$0xff] }
0x1cee   :  { %v4080_v9 = vadd.f32 %v4713_v7, %v4072_v8  ;;  %5347 = vmatprep.subr.bf16.mxu1 %v5346_v12  ;;  %v4386_v7 = vld [vmem:[#allocation8 + $0x30] sm:$0xff]  ;;  %v4387_v8 = vld [vmem:[#allocation8 + $0x38] sm:$0xff]  ;;  %v5364_v12 = vpack.c.bf16 %v4473_v50, %v4471_v53 }
0x1cf0   :  { %4731 = vmatmul.mubr.msk.f32.vlgmr.msra.gmra.mrb[46].mxu0 %vm149_vm0, %v4080_v9 }
0x1cf1   :  { %4188 = vmatprep.mubr.f32.mxu0 %v5630_v0  ;;  %5349 = vmatpush3.bf16.msra.mxu1 %v5348_v15  ;;  %v4477_v15 = vld [vmem:[%s6794_s16 + $0x30] sm:$0xff] }
0x1cf2   :  { %5350 = vmatprep.subr.bf16.mxu1 %v5638_v47 }
0x1cf4   :  { %4732 = vmatmul.mubr.msk.f32.gmra.mrb[48].mxu0 %vm149_vm0, %v4081_v48 }
0x1cf5   :  { %4579 = vmatprep.mubr.f32.mxu0 %v5630_v0 }
0x1dc3   :  { %v4184_v44 = vpop.f32.mrb[46].mxu0 }
0x1dc4   :  { %v4185_v25 = vadd.f32 %v4184_v44, %v4105_v17  ;;  %v4186_v18 = vpop.f32.mrb[47].mxu0 }
0x1dc5   :  { %v4187_v19 = vadd.f32 %v4186_v18, %v4109_v55  ;;  %v4481_v18 = vld [vmem:[%s6794_s16 + $0x50] sm:$0xff] }
0x1dc6   :  { %v4195_v22 = vmax.f32 %v4185_v25, 0.0  ;;  %v4479_v25 = vld [vmem:[%s6794_s16 + $0x40] sm:$0xff] }
0x1dc7   :  { %v4196_v20 = vmax.f32 %v4187_v19, 0.0  ;;  %v4190_v21 = vpop.f32.mrb[48].mxu0  ;;  %v4484_v19 = vld [vmem:[%s6794_s16 + $0x68] sm:$0xff] }
0x1dc8   :  { %v4191_v23 = vadd.f32 %v4190_v21, %v4105_v17  ;;  %v4192_v24 = vpop.f32.mrb[49].mxu0  ;;  %v4482_v17 = vld [vmem:[%s6794_s16 + $0x58] sm:$0xff]  ;;  %v5372_v21 = vpack.c.bf16 %v4481_v18, %v4479_v25  ;;  %v4499_v18 = vld [vmem:[%s6794_s16 + $0xe0] sm:$0xff] }
0x1dc9   :  { %v4193_v27 = vadd.f32 %v4192_v24, %v4109_v55  ;;  %4304 = vmatprep.mubr.f32.mxu1 %v4196_v20  ;;  %v5368_v55 = vpack.c.bf16 %v4477_v15, %v4475_v14  ;;  %v5370_v44 = vpack.c.bf16 %v4482_v17, %v4480_v16  ;;  %v4486_v20 = vld [vmem:[%s6794_s16 + $0x78] sm:$0xff]  ;;  %v4485_v24 = vld [vmem:[%s6794_s16 + $0x70] sm:$0xff] }
0x1dca   :  { %4305 = vmatmul.mubr.f32.vlgmr.msra.gmra.mrb[38].mxu1 %v4195_v22  ;;  %v4197_v38 = vmax.f32 %v4191_v23, 0.0  ;;  %v5374_v22 = vpack.c.bf16 %v4486_v20, %v4484_v19  ;;  %v4483_v23 = vld [vmem:[%s6794_s16 + $0x60] sm:$0xff]  ;;  %v4501_v19 = vld [vmem:[%s6794_s16 + $0xf0] sm:$0xff] }
0x1dcb   :  { %v4198_v40 = vmax.f32 %v4193_v27, 0.0  ;;  %5352 = vmatpush3.bf16.msra.mxu1 %v5351_v63  ;;  %v4488_v27 = vld [vmem:[%s6794_s16 + $0x88] sm:$0xff]  ;;  %v5392_v20 = vpack.c.bf16 %v4501_v19, %v4499_v18 }
0x1dcc   :  { %5353 = vmatprep.subr.bf16.mxu1 %v5638_v47 }
0x1dcd   :  { %4309 = vmatprep.mubr.f32.mxu1 %v4198_v40  ;;  %v4490_v40 = vld [vmem:[%s6794_s16 + $0x98] sm:$0xff] }
0x1dce   :  { %4310 = vmatmul.mubr.f32.gmra.mrb[40].mxu1 %v4197_v38  ;;  %v5376_v38 = vpack.c.bf16 %v4485_v24, %v4483_v23 }
0x1dcf   :  { %5187 = vmatprep.mubr.msk.f32.mxu1 %vm5631_vm1, %v5630_v0  ;;  %5355 = vmatpush3.bf16.msra.mxu1 %v5354_v3 }
0x1dd0   :  { %5356 = vmatprep.subr.bf16.mxu1 %v5638_v47 }
0x1dd3   :  { %5358 = vmatpush3.bf16.msra.mxu1 %v5357_v6 }
0x1dd4   :  { %5359 = vmatprep.subr.bf16.mxu1 %v5638_v47 }
0x1e9d   :  { %v4940_v42 = vpop.f32.mrb[38].mxu1 }
0x1e9e   :  { %v4941_v31 = vpop.f32.mrb[39].mxu1 }
0x1e9f   :  { %v4942_v28 = vadd.f32 %v4941_v31, %v4940_v42  ;;  %v5378_v42 = vpack.c.bf16 %v4490_v40, %v4488_v27  ;;  %v4489_v31 = vld [vmem:[%s6794_s16 + $0x90] sm:$0xff]  ;;  %v4503_v27 = vld [vmem:[%s6812_s1] sm:$0x3] }
0x1ea0   :  { %v4508_v40 = vrot.slane %v4503_v27, %v5865_v29 }
0x1ea1   :  { %v4307_v35 = vadd.f32 %v4942_v28, %v4766_v30  ;;  %v4943_v36 = vpop.f32.mrb[40].mxu1  ;;  %v4492_v28 = vld [vmem:[%s6794_s16 + $0xa8] sm:$0xff] }
0x1ea2   :  { %v4944_v34 = vpop.f32.mrb[41].mxu1 }
0x1ea3   :  { %v4945_v39 = vadd.f32 %v4944_v34, %v4943_v36  ;;  %v4315_v41 = vadd.f32 %v4307_v35, %v4080_v9  ;;  %v5360_v9 = vpack.c.bf16 %v4387_v8, %v4386_v7  ;;  %v4494_v35 = vld [vmem:[%s6794_s16 + $0xb8] sm:$0xff] }
0x1ea4   :  { %v5382_v34 = vpack.c.bf16 %v4494_v35, %v4492_v28 }
0x1ea5   :  { %v4312_v43 = vadd.f32 %v4945_v39, %v4766_v30  ;;  %v4321_v46 = vsel %vm149_vm0, %v4315_v41, 0.0  ;;  %5361 = vmatpush3.bf16.msra.mxu1 %v5360_v9  ;;  %v4487_v30 = vld [vmem:[%s6794_s16 + $0x80] sm:$0xff] }
0x1ea6   :  { %4322 = vadd.xlane.f32.xlu1 %v4321_v46  ;;  %v5380_v36 = vpack.c.bf16 %v4489_v31, %v4487_v30  ;;  %v4491_v39 = vld [vmem:[%s6794_s16 + $0xa0] sm:$0xff]  ;;  %v4498_v46 = vld [vmem:[%s6794_s16 + $0xd8] sm:$0xff] }
0x1ea7   :  { %v4316_v51 = vadd.f32 %v4312_v43, %v4081_v48  ;;  %v4474_v48 = vld [vmem:[%s6794_s16 + $0x18] sm:$0xff]  ;;  %v4496_v43 = vld [vmem:[%s6794_s16 + $0xc8] sm:$0xff] }
0x1ea8   :  { %v5362_v54 = vpack.c.bf16 %v4474_v48, %v4472_v10 }
0x1ea9   :  { %v4324_v26 = vsel %vm149_vm0, %v4316_v51, 0.0 }
0x1eaa   :  { %4325 = vadd.xlane.f32.xlu0 %v4324_v26  ;;  %5363 = vmatprep.subr.bf16.mxu0 %v5362_v54  ;;  %v5386_v26 = vpack.c.bf16 %v4498_v46, %v4496_v43 }
0x1eab   :  { %5365 = vmatpush1.bf16.msra.mxu0 %v5364_v12 }
0x1eac   :  { %5367 = vmatprep.subr.bf16.mxu0 %v5366_v13 }
0x1eaf   :  { %5369 = vmatpush1.bf16.msra.mxu0 %v5368_v55 }
0x1eb0   :  { %5371 = vmatprep.subr.bf16.mxu0 %v5370_v44 }
0x1eb3   :  { %5373 = vmatpush1.bf16.msra.mxu0 %v5372_v21  ;;  %v4771_v21 = vld [vmem:[%s6793_s15] ss:$0 sm:$0xff] }
0x1eb4   :  { %5375 = vmatprep.subr.bf16.mxu0 %v5374_v22 }
0x1eb7   :  { %5377 = vmatpush1.bf16.msra.mxu0 %v5376_v38  ;;  %v4512_v38 = vrot.slane %v4503_v27, %v5871_v33 }
0x1eb8   :  { %5379 = vmatprep.subr.bf16.mxu0 %v5378_v42 }
0x1ebb   :  { %5381 = vmatpush1.bf16.msra.mxu0 %v5380_v36 }
0x1ebc   :  { %5383 = vmatprep.subr.bf16.mxu0 %v5382_v34 }
0x1f33   :  { %v4323_v0 = vpop.xlane.xlu1 %4322 }
0x1f34   :  { %v4327_v56 = vmul.f32 0.015625, %v4323_v0  ;;  %v4495_v0 = vld [vmem:[%s6794_s16 + $0xc0] sm:$0xff] }
0x1f36   :  { %v6641_v32 = vsub.f32 %v4315_v41, %v4327_v56  ;;  %v4493_v41 = vld [vmem:[%s6794_s16 + $0xb0] sm:$0xff] }
0x1f37   :  { %v4326_v37 = vpop.xlane.xlu0 %4325  ;;  %v4497_v56 = vld [vmem:[%s6794_s16 + $0xd0] sm:$0xff] }
0x1f38   :  { %v4328_v57 = vmul.f32 0.015625, %v4326_v37  ;;  %v4331_v58 = vmul.f32 %v6641_v32, %v6641_v32  ;;  %v4500_v37 = vld [vmem:[%s6794_s16 + $0xe8] sm:$0xff] }
0x1f3a   :  { %v6645_v52 = vsub.f32 %v4316_v51, %v4328_v57  ;;  %v4333_v45 = vsel %vm149_vm0, %v4331_v58, 0.0  ;;  %v5384_v51 = vpack.c.bf16 %v4493_v41, %v4491_v39  ;;  %v4502_v57 = vld [vmem:[%s6794_s16 + $0xf8] sm:$0xff]  ;;  %v5388_v58 = vpack.c.bf16 %v4497_v56, %v4495_v0  ;;  %s5639_s16 = smov [#allocation10]  }
0x1f3b   :  { %4334 = vadd.xlane.f32.xlu1 %v4333_v45  ;;  %v5390_v45 = vpack.c.bf16 %v4502_v57, %v4500_v37  ;;  %s4604_s24 = sshll.u32 %s5639_s16, 4  ;;  %s4605_s24 = int_to_ptr.vmem [resolvable:$true] %s4604_s24 }
0x1f3c   :  { %v4332_v59 = vmul.f32 %v6645_v52, %v6645_v52  ;;  %5385 = vmatpush1.bf16.msra.mxu0 %v5384_v51  ;;  %s5592_s15 = scalar_lea.vmem %s4605_s24, 64  ;;  %p5597_p5 = scmp.lt.s32.totalorder %s4605_s24, %s4605_s24 }
0x1f3d   :  { %5387 = vmatprep.subr.bf16.mxu0 %v5386_v26  ;;  %p5593_p4 = scmp.ne.s32.totalorder %s4605_s24, %s5592_s15  ;;  %p5598_p6 = scmp.lt.s32.totalorder %s5592_s15, %s5592_s15 }
0x1f3e   :  { %v4336_v60 = vsel %vm149_vm0, %v4332_v59, 0.0 }
0x1f3f   :  { %4337 = vadd.xlane.f32.xlu0 %v4336_v60  ;;  %p5599_p7 = por %p5598_p6, %p5597_p5 }
0x1f40   :  { %5389 = vmatpush1.bf16.msra.mxu0 %v5388_v58 }
0x1f41   :  { %5391 = vmatprep.subr.bf16.mxu0 %v5390_v45  ;;  %p5600_p8 = pnand %p5599_p7, %p5593_p4 }
0x1f44   :  { %5393 = vmatpush1.bf16.msra.mxu0 %v5392_v20 }
0x1fc8   :  { %v4335_v59 = vpop.xlane.xlu1 %4334 }
0x1fc9   :  { %v4339_v60 = vmul.f32 0.015625, %v4335_v59 }
0x1fcb   :  { %v4341_v61 = vadd.f32 1e-05, %v4339_v60 }
0x1fcc   :  { %v4338_v62 = vpop.xlane.xlu0 %4337 }
0x1fcd   :  { %5500 = vrsqrt.f32 %v4341_v61  ;;  %v4340_v63 = vmul.f32 0.015625, %v4338_v62 }
0x1fcf   :  { %v4342_v47 = vadd.f32 1e-05, %v4340_v63 }
0x1fd1   :  { %5502 = vrsqrt.f32 %v4342_v47 }
0x1fd7   :  { %v5501_v1 = vpop.eup %5500 }
0x1fd8   :  { %v4345_v3 = vmul.f32 %v5501_v1, %v6641_v32 }
0x1fda   :  { %v4353_v5 = vmul.f32 %v4769_v2, %v4345_v3 }
0x1fdb   :  { %v5503_v6 = vpop.eup %5502 }
0x1fdc   :  { %v4361_v7 = vadd.f32 %v4770_v4, %v4353_v5  ;;  %v4346_v8 = vmul.f32 %v5503_v6, %v6645_v52 }
0x1fde   :  { %v4363_v9 = vsel %vm149_vm0, %v4361_v7, 0.0  ;;  %v4354_v10 = vmul.f32 %v4769_v2, %v4346_v8 }
0x1fdf   :  { %v4364_v48 = vrot.slane %v4363_v9, 4 }
0x1fe0   :  { %v4362_v53 = vadd.f32 %v4770_v4, %v4354_v10 }
0x1fe1   :  { %v4365_v54 = vadd.f32 %v4364_v48, %v4363_v9 }
0x1fe2   :  { %v4370_v50 = vsel %vm149_vm0, %v4362_v53, 0.0 }
0x1fe3   :  { %v4371_v11 = vrot.slane %v4370_v50, 4  ;;  %v4366_v49 = vrot.slane %v4365_v54, 2 }
0x1fe5   :  { %v4367_v32 = vadd.f32 %v4366_v49, %v4365_v54  ;;  %v4372_v12 = vadd.f32 %v4371_v11, %v4370_v50 }
0x1fe7   :  { %v4368_v13 = vrot.slane %v4367_v32, 1  ;;  %v4373_v14 = vrot.slane %v4372_v12, 2 }
0x1fe9   :  { %v4374_v15 = vadd.f32 %v4373_v14, %v4372_v12  ;;  %v4369_v16 = vadd.f32 %v4368_v13, %v4367_v32 }
0x1feb   :  { %v4375_v17 = vrot.slane %v4374_v15, 1  ;;  %v4378_v52 = vmul.f32 0.125, %v4369_v16 }
0x1fed   :  { %v4376_v55 = vadd.f32 %v4375_v17, %v4374_v15 }
0x1fef   :  { %v4379_v44 = vmul.f32 0.125, %v4376_v55 }
0x1ff1   :  { %v4398_v25 = vsel %vm4397_vm4, %v4379_v44, %v4378_v52 }
0x1ff2   :  { %5188 = vmatmul.mubr.msk.f32.vlgmr.msra.gmra.mrb[42].mxu1 %vm149_vm0, %v4398_v25 }
0x20c5   :  { %v4467_v22 = vpop.f32.mrb[42].mxu1 }
0x20c6   :  { %v4468_v23 = vadd.f32 %v4771_v21, %v4467_v22  ;;  %v5189_v24 = vpop.f32.mrb[43].mxu1 }
0x20c8   :  { %4580 = vmatmul.mubr.f32.vlgmr.msra.gmra.mrb[50].mxu0 %v4468_v23 }
0x219b   :  { %v4581_v42 = vpop.f32.mrb[50].mxu0 }
0x219c   :  { %v4582_v30 = vadd.f32 %v4581_v42, %v4508_v40  ;;  %v4583_v31 = vpop.f32.mrb[51].mxu0 }
0x219d   :  { %v4584_v28 = vadd.f32 %v4583_v31, %v4512_v38 }
0x219f   :  { %v4588_v35 = vcombine.low %v4582_v30, %v4584_v28 }
0x21a1   :  { %4773 = vst.sshfl [vmem:[#allocation10] sm:$0x33 pattern:$0x76325410] %v4588_v35 }
0x21a2   :  { %5603 = shalt.err (!%p5600_p8)
}
0x21a3   :  { %s6813_s0 = sld [smem:[#allocation19_spill]] }
0x21a9   :  { %s5604_s30 = scalar_lea.hbm %s6813_s0, 64 }
0x21aa   :  { %p5605_p9 = scmp.ne.s32.totalorder %s6813_s0, %s5604_s30  ;;  %p5608_p10 = scmp.lt.u32.totalorder %s5604_s30, %s6813_s0 }
0x21ac   :  { %p5610_p11 = pnand %p5608_p10, %p5605_p9 }
0x21ae   :  { %5613 = shalt.err (!%p5610_p11)
}
0x21af   :  { %4607 = dma.vmem_to_hbm [thread:$0]  %s4605_s24, 64, %s6813_s0, [#allocation4]  }
0x21b0   :  { %5620 = dma.done.wait [#allocation4], 64  }
0x21b1   :  { %5621 = vsyncadd [#allocation4], 4294967232 }
0x21b2   :  { %4611 = vsyncpa [#allocation3], 1 }
0x21b3   :  { %4612 = vsyncpa [#allocation6], 1 }
0x21b4   :  { %4613 = vsyncpa [#allocation9], 1 }
0x21b5   :  { %4614 = vsyncpa [#allocation4], 1 }

</bundles_post_ra>
